<compile_context>
chip_gen: v6e
topology: v6e:2x2x1
jax: 0.10.0
libtpu: 0.0.40
codegen_flags: <defaults>
</compile_context>

<pallas_src>
import functools
import math

import jax
import jax.numpy as jnp
from jax import lax
from jax.experimental import pallas as pl
from jax.experimental.pallas import tpu as pltpu


# ----------------------------------------------------------------------------
# Fused kernel: projections + per-(batch, head) attention + output fc.
# Each grid step handles `batch_tile` batch elements (M = batch_tile * L rows).
# ----------------------------------------------------------------------------
def _fused_mha_kernel(q_ref, k_ref, v_ref,
                      wq_ref, bq_ref, wk_ref, bk_ref, wv_ref, bv_ref,
                      wf_ref, bf_ref,
                      o_ref, a_ref,
                      *, n_head, batch_tile, seq_len, d_k, d_v, d_model):
    L = seq_len

    # Flattened activations for this step; cast to bf16 for the MXU.
    xq = q_ref[...].astype(jnp.bfloat16)            # (M, d_model)
    xk = k_ref[...].astype(jnp.bfloat16)
    xv = v_ref[...].astype(jnp.bfloat16)

    # Fused projections over all heads and all rows of this step:
    # (M, d_model) @ (d_model, n_head*d_k)  -> lane-dense N = 128.
    # (1/temperature is already folded into wq/bq on the host.)
    qp = jnp.dot(xq, wq_ref[...], preferred_element_type=jnp.float32) + bq_ref[...]
    kp = jnp.dot(xk, wk_ref[...], preferred_element_type=jnp.float32) + bk_ref[...]
    vp = jnp.dot(xv, wv_ref[...], preferred_element_type=jnp.float32) + bv_ref[...]

    o_rows = []
    for bi in range(batch_tile):                    # small static unroll
        rows = slice(bi * L, (bi + 1) * L)
        attn_heads = []
        o_heads = []
        for h in range(n_head):                     # small static unroll
            qh = qp[rows, h * d_k:(h + 1) * d_k].astype(jnp.bfloat16)
            kh = kp[rows, h * d_k:(h + 1) * d_k].astype(jnp.bfloat16)
            vh = vp[rows, h * d_v:(h + 1) * d_v].astype(jnp.bfloat16)

            # scores (L, L): contract the feature axis of both (no transpose)
            s = lax.dot_general(qh, kh,
                                dimension_numbers=(((1,), (1,)), ((), ())),
                                preferred_element_type=jnp.float32)

            # numerically-stable softmax (f32); exact reciprocal because the
            # normalized attention matrix is a kernel output.
            m = jnp.max(s, axis=-1, keepdims=True)
            p = jnp.exp(s - m)
            denom = jnp.sum(p, axis=-1, keepdims=True)
            attn = p * pl.reciprocal(denom)         # (L, L) f32
            attn_heads.append(attn)

            oh = jnp.dot(attn.astype(jnp.bfloat16), vh,
                         preferred_element_type=jnp.float32)      # (L, d_v)
            o_heads.append(oh.astype(jnp.bfloat16))

        # Lane-dense (L, n_head*L) store of this batch element's attention maps.
        a_ref[bi] = jnp.concatenate(attn_heads, axis=-1).astype(a_ref.dtype)
        # (L, n_head*d_v) head-concatenated attention output for the fc.
        o_rows.append(jnp.concatenate(o_heads, axis=-1))

    o_all = jnp.concatenate(o_rows, axis=0)         # (M, n_head*d_v) bf16

    # Fused output fc: (M, 128) @ (128, d_model), K = 128.
    out = jnp.dot(o_all, wf_ref[...], preferred_element_type=jnp.float32) + bf_ref[...]
    o_ref[...] = out.astype(o_ref.dtype)


def mha_forward(params, q, k, v, *, n_head, d_model, d_k, d_v, batch_tile=None):
    """q, k, v: (b, L, d_model) -> (out (b, L, d_model), attn (b, n_head, L, L))."""
    b, L, _ = q.shape
    if batch_tile is None:
        # Fold as much batch as possible into M, but keep 2 grid steps when
        # possible so both v7x TensorCores get work ("parallel" axis).
        batch_tile = b // 2 if (b >= 2 and b % 2 == 0) else b
    assert b % batch_tile == 0
    num_steps = b // batch_tile
    M = batch_tile * L
    inv_temp = 1.0 / math.sqrt(d_k)

    # Host-side, one-time weight prep: fold 1/temperature into the q
    # projection and cast MXU operands to bf16 (biases stay f32, added after
    # the f32-accumulated matmuls).
    wq = (params["w_q"] * inv_temp).astype(jnp.bfloat16)     # (d_model, H*d_k)
    bq = (params["b_q"] * inv_temp).reshape(1, n_head * d_k)
    wk = params["w_k"].astype(jnp.bfloat16)
    bk = params["b_k"].reshape(1, n_head * d_k)
    wv = params["w_v"].astype(jnp.bfloat16)
    bv = params["b_v"].reshape(1, n_head * d_v)
    wf = params["w_f"].astype(jnp.bfloat16)                  # (H*d_v, d_model)
    bf = params["b_f"].reshape(1, d_model)

    # Flatten batch*seq on the host so the kernel sees lane/sublane-friendly
    # 2-D row blocks (no in-kernel reshapes).
    q2 = q.reshape(b * L, d_model)
    k2 = k.reshape(b * L, d_model)
    v2 = v.reshape(b * L, d_model)

    kernel = functools.partial(_fused_mha_kernel, n_head=n_head,
                               batch_tile=batch_tile, seq_len=L,
                               d_k=d_k, d_v=d_v, d_model=d_model)

    out2, attn_packed = pl.pallas_call(
        kernel,
        out_shape=(
            jax.ShapeDtypeStruct((b * L, d_model), q.dtype),
            jax.ShapeDtypeStruct((b, L, n_head * L), q.dtype),
        ),
        grid_spec=pltpu.PrefetchScalarGridSpec(
            num_scalar_prefetch=0,
            grid=(num_steps,),
            in_specs=[
                pl.BlockSpec((M, d_model), lambda i: (i, 0)),
                pl.BlockSpec((M, d_model), lambda i: (i, 0)),
                pl.BlockSpec((M, d_model), lambda i: (i, 0)),
                pl.BlockSpec((d_model, n_head * d_k), lambda i: (0, 0)),
                pl.BlockSpec((1, n_head * d_k), lambda i: (0, 0)),
                pl.BlockSpec((d_model, n_head * d_k), lambda i: (0, 0)),
                pl.BlockSpec((1, n_head * d_k), lambda i: (0, 0)),
                pl.BlockSpec((d_model, n_head * d_v), lambda i: (0, 0)),
                pl.BlockSpec((1, n_head * d_v), lambda i: (0, 0)),
                pl.BlockSpec((n_head * d_v, d_model), lambda i: (0, 0)),
                pl.BlockSpec((1, d_model), lambda i: (0, 0)),
            ],
            out_specs=(
                pl.BlockSpec((M, d_model), lambda i: (i, 0)),
                pl.BlockSpec((batch_tile, L, n_head * L), lambda i: (i, 0, 0)),
            ),
        ),
        compiler_params=pltpu.CompilerParams(
            dimension_semantics=("parallel",),
        ),
    )(q2, k2, v2, wq, bq, wk, bk, wv, bv, wf, bf)

    out = out2.reshape(b, L, d_model)
    # Wrapper-side layout plumbing: unpack the lane-dense (b, L, H*L) slab.
    attn = attn_packed.reshape(b, L, n_head, L).transpose(0, 2, 1, 3)
    return out, attn


# ----------------------------------------------------------------------------
# Deterministic synthetic parameters (1x1-conv weights as (in, out) matrices)
# ----------------------------------------------------------------------------
def init_params(key, n_head, d_model, d_k, d_v):
    def lin(k, fan_in, fan_out):
        scale = 1.0 / math.sqrt(fan_in)
        kw, kb = jax.random.split(k)
        w = jax.random.uniform(kw, (fan_in, fan_out), jnp.float32, -scale, scale)
        b = jax.random.uniform(kb, (fan_out,), jnp.float32, -scale, scale)
        return w, b

    kq, kk, kv, kf = jax.random.split(key, 4)
    w_q, b_q = lin(kq, d_model, n_head * d_k)
    w_k, b_k = lin(kk, d_model, n_head * d_k)
    w_v, b_v = lin(kv, d_model, n_head * d_v)
    w_f, b_f = lin(kf, n_head * d_v, d_model)
    return dict(w_q=w_q, b_q=b_q, w_k=w_k, b_k=b_k,
                w_v=w_v, b_v=b_v, w_f=w_f, b_f=b_f)


# ----------------------------------------------------------------------------
# Pure-JAX f32 reference (mirrors the PyTorch module's forward)
# ----------------------------------------------------------------------------
def mha_reference(params, q, k, v, *, n_head, d_model, d_k, d_v):
    b, L, _ = q.shape
    temp = math.sqrt(d_k)

    def proj(x, w, bias):
        return x.reshape(b * L, d_model) @ w + bias

    qp = proj(q, params["w_q"], params["b_q"]).reshape(b, L, n_head, d_k).transpose(0, 2, 1, 3)
    kp = proj(k, params["w_k"], params["b_k"]).reshape(b, L, n_head, d_k).transpose(0, 2, 1, 3)
    vp = proj(v, params["w_v"], params["b_v"]).reshape(b, L, n_head, d_v).transpose(0, 2, 1, 3)

    s = jnp.einsum("bhld,bhmd->bhlm", qp / temp, kp)
    attn = jax.nn.softmax(s, axis=-1)
    out = jnp.einsum("bhlm,bhmd->bhld", attn, vp)

    o = out.transpose(0, 2, 1, 3).reshape(b * L, n_head * d_v) @ params["w_f"] + params["b_f"]
    return o.reshape(b, L, d_model), attn


# ----------------------------------------------------------------------------
if __name__ == "__main__":
    # Module hard-codes len_q = len_k = len_v = 64; its .view calls require
    # d_k == d_v == d_model.
    b = 4
    L = 64
    n_head = 4
    d_model = 32
    d_k = 32
    d_v = 32

    key = jax.random.PRNGKey(0)
    kparam, kq, kk, kv = jax.random.split(key, 4)
    params = init_params(kparam, n_head, d_model, d_k, d_v)

    q_in = jax.random.normal(kq, (b, L, d_model), jnp.float32)
    k_in = jax.random.normal(kk, (b, L, d_model), jnp.float32)
    v_in = jax.random.normal(kv, (b, L, d_model), jnp.float32)

    fwd = jax.jit(functools.partial(
        mha_forward, n_head=n_head, d_model=d_model, d_k=d_k, d_v=d_v))
    out, attn = fwd(params, q_in, k_in, v_in)
    jax.block_until_ready((out, attn))

    out_ref, attn_ref = mha_reference(
        params, q_in, k_in, v_in,
        n_head=n_head, d_model=d_model, d_k=d_k, d_v=d_v)

    assert out.shape == (b, L, d_model)
    assert attn.shape == (b, n_head, L, L)
    # softmax rows sum to 1 (exact reciprocal used for the stored attn)
    assert bool(jnp.allclose(jnp.sum(attn, axis=-1), 1.0, atol=1e-3))
    # bf16 MXU operands with f32 accumulation -> relaxed tolerances
    assert bool(jnp.allclose(attn, attn_ref, atol=1e-2, rtol=1e-2))
    assert bool(jnp.allclose(out, out_ref, atol=2e-2, rtol=2e-2))

    print("KERNEL_OK")
</pallas_src>

<mosaic_0001>
module attributes {stable_mosaic.version = 11 : i64} {
  func.func @_fused_mha_kernel(%arg0: i32, %arg1: memref<128x32xf32, #tpu.memory_space<vmem>>, %arg2: memref<128x32xf32, #tpu.memory_space<vmem>>, %arg3: memref<128x32xf32, #tpu.memory_space<vmem>>, %arg4: memref<32x128xbf16, #tpu.memory_space<vmem>>, %arg5: memref<1x128xf32, #tpu.memory_space<vmem>>, %arg6: memref<32x128xbf16, #tpu.memory_space<vmem>>, %arg7: memref<1x128xf32, #tpu.memory_space<vmem>>, %arg8: memref<32x128xbf16, #tpu.memory_space<vmem>>, %arg9: memref<1x128xf32, #tpu.memory_space<vmem>>, %arg10: memref<128x32xbf16, #tpu.memory_space<vmem>>, %arg11: memref<1x32xf32, #tpu.memory_space<vmem>>, %arg12: memref<128x32xf32, #tpu.memory_space<vmem>>, %arg13: memref<2x64x256xf32, #tpu.memory_space<vmem>>) attributes {dimension_semantics = [#tpu.dimension_semantics<parallel>], iteration_bounds = array<i64: 2>, scalar_prefetch = 0 : i64, scratch_operands = 0 : i64, tpu.core_type = #tpu.core_type<tc>, window_params = [{transform_indices = @transform_0, window_bounds = array<i64: 128, 32>}, {transform_indices = @transform_1, window_bounds = array<i64: 128, 32>}, {transform_indices = @transform_2, window_bounds = array<i64: 128, 32>}, {pipeline_mode = #tpu.pipeline_mode<synchronous>, transform_indices = @transform_3, window_bounds = array<i64: 32, 128>}, {pipeline_mode = #tpu.pipeline_mode<synchronous>, transform_indices = @transform_4, window_bounds = array<i64: 1, 128>}, {pipeline_mode = #tpu.pipeline_mode<synchronous>, transform_indices = @transform_5, window_bounds = array<i64: 32, 128>}, {pipeline_mode = #tpu.pipeline_mode<synchronous>, transform_indices = @transform_6, window_bounds = array<i64: 1, 128>}, {pipeline_mode = #tpu.pipeline_mode<synchronous>, transform_indices = @transform_7, window_bounds = array<i64: 32, 128>}, {pipeline_mode = #tpu.pipeline_mode<synchronous>, transform_indices = @transform_8, window_bounds = array<i64: 1, 128>}, {pipeline_mode = #tpu.pipeline_mode<synchronous>, transform_indices = @transform_9, window_bounds = array<i64: 128, 32>}, {pipeline_mode = #tpu.pipeline_mode<synchronous>, transform_indices = @transform_10, window_bounds = array<i64: 1, 32>}, {transform_indices = @transform_11, window_bounds = array<i64: 128, 32>}, {transform_indices = @transform_12, window_bounds = array<i64: 2, 64, 256>}]} {
    %c0 = arith.constant 0 : index
    %c0_0 = arith.constant 0 : index
    %0 = vector.load %arg1[%c0, %c0_0] : memref<128x32xf32, #tpu.memory_space<vmem>>, vector<128x32xf32>
    %1 = arith.truncf %0 : vector<128x32xf32> to vector<128x32xbf16>
    %c0_1 = arith.constant 0 : index
    %c0_2 = arith.constant 0 : index
    %2 = vector.load %arg2[%c0_1, %c0_2] : memref<128x32xf32, #tpu.memory_space<vmem>>, vector<128x32xf32>
    %3 = arith.truncf %2 : vector<128x32xf32> to vector<128x32xbf16>
    %c0_3 = arith.constant 0 : index
    %c0_4 = arith.constant 0 : index
    %4 = vector.load %arg3[%c0_3, %c0_4] : memref<128x32xf32, #tpu.memory_space<vmem>>, vector<128x32xf32>
    %5 = arith.truncf %4 : vector<128x32xf32> to vector<128x32xbf16>
    %c0_5 = arith.constant 0 : index
    %c0_6 = arith.constant 0 : index
    %6 = vector.load %arg4[%c0_5, %c0_6] : memref<32x128xbf16, #tpu.memory_space<vmem>>, vector<32x128xbf16>
    %cst = arith.constant dense<0.000000e+00> : vector<128x128xf32>
    %7 = tpu.matmul %1, %6, %cst {dimension_numbers = #tpu.dot_dimension_numbers<[1], [0], [0], [1], [0, 0, 1, 1], [], []>} : vector<128x32xbf16>, vector<32x128xbf16>, vector<128x128xf32> -> vector<128x128xf32>
    %c0_7 = arith.constant 0 : index
    %c0_8 = arith.constant 0 : index
    %8 = vector.load %arg5[%c0_7, %c0_8] : memref<1x128xf32, #tpu.memory_space<vmem>>, vector<1x128xf32>
    %9 = vector.broadcast %8 : vector<1x128xf32> to vector<128x128xf32>
    %10 = arith.addf %7, %9 : vector<128x128xf32>
    %c0_9 = arith.constant 0 : index
    %c0_10 = arith.constant 0 : index
    %11 = vector.load %arg6[%c0_9, %c0_10] : memref<32x128xbf16, #tpu.memory_space<vmem>>, vector<32x128xbf16>
    %cst_11 = arith.constant dense<0.000000e+00> : vector<128x128xf32>
    %12 = tpu.matmul %3, %11, %cst_11 {dimension_numbers = #tpu.dot_dimension_numbers<[1], [0], [0], [1], [0, 0, 1, 1], [], []>} : vector<128x32xbf16>, vector<32x128xbf16>, vector<128x128xf32> -> vector<128x128xf32>
    %c0_12 = arith.constant 0 : index
    %c0_13 = arith.constant 0 : index
    %13 = vector.load %arg7[%c0_12, %c0_13] : memref<1x128xf32, #tpu.memory_space<vmem>>, vector<1x128xf32>
    %14 = vector.broadcast %13 : vector<1x128xf32> to vector<128x128xf32>
    %15 = arith.addf %12, %14 : vector<128x128xf32>
    %c0_14 = arith.constant 0 : index
    %c0_15 = arith.constant 0 : index
    %16 = vector.load %arg8[%c0_14, %c0_15] : memref<32x128xbf16, #tpu.memory_space<vmem>>, vector<32x128xbf16>
    %cst_16 = arith.constant dense<0.000000e+00> : vector<128x128xf32>
    %17 = tpu.matmul %5, %16, %cst_16 {dimension_numbers = #tpu.dot_dimension_numbers<[1], [0], [0], [1], [0, 0, 1, 1], [], []>} : vector<128x32xbf16>, vector<32x128xbf16>, vector<128x128xf32> -> vector<128x128xf32>
    %c0_17 = arith.constant 0 : index
    %c0_18 = arith.constant 0 : index
    %18 = vector.load %arg9[%c0_17, %c0_18] : memref<1x128xf32, #tpu.memory_space<vmem>>, vector<1x128xf32>
    %19 = vector.broadcast %18 : vector<1x128xf32> to vector<128x128xf32>
    %20 = arith.addf %17, %19 : vector<128x128xf32>
    %21 = vector.extract_strided_slice %10 {offsets = [0, 0], sizes = [64, 32], strides = [1, 1]} : vector<128x128xf32> to vector<64x32xf32>
    %22 = arith.truncf %21 : vector<64x32xf32> to vector<64x32xbf16>
    %23 = vector.extract_strided_slice %15 {offsets = [0, 0], sizes = [64, 32], strides = [1, 1]} : vector<128x128xf32> to vector<64x32xf32>
    %24 = arith.truncf %23 : vector<64x32xf32> to vector<64x32xbf16>
    %25 = vector.extract_strided_slice %20 {offsets = [0, 0], sizes = [64, 32], strides = [1, 1]} : vector<128x128xf32> to vector<64x32xf32>
    %26 = arith.truncf %25 : vector<64x32xf32> to vector<64x32xbf16>
    %cst_19 = arith.constant dense<0.000000e+00> : vector<64x64xf32>
    %27 = tpu.matmul %22, %24, %cst_19 {dimension_numbers = #tpu.dot_dimension_numbers<[1], [1], [0], [0], [0, 0, 1, 0], [], []>} : vector<64x32xbf16>, vector<64x32xbf16>, vector<64x64xf32> -> vector<64x64xf32>
    %cst_20 = arith.constant dense<0xFF800000> : vector<64xf32>
    %28 = vector.multi_reduction <maximumf>, %27, %cst_20 [1] : vector<64x64xf32> to vector<64xf32>
    %29 = vector.shape_cast %28 : vector<64xf32> to vector<64x1xf32>
    %30 = vector.broadcast %29 : vector<64x1xf32> to vector<64x64xf32>
    %31 = arith.subf %27, %30 : vector<64x64xf32>
    %32 = math.exp %31 : vector<64x64xf32>
    %cst_21 = arith.constant dense<0.000000e+00> : vector<64xf32>
    %33 = vector.multi_reduction <add>, %32, %cst_21 [1] : vector<64x64xf32> to vector<64xf32>
    %34 = vector.shape_cast %33 : vector<64xf32> to vector<64x1xf32>
    %35 = tpu.reciprocal %34 : vector<64x1xf32> -> vector<64x1xf32>
    %36 = vector.broadcast %35 : vector<64x1xf32> to vector<64x64xf32>
    %37 = arith.mulf %32, %36 : vector<64x64xf32>
    %38 = arith.truncf %37 : vector<64x64xf32> to vector<64x64xbf16>
    %cst_22 = arith.constant dense<0.000000e+00> : vector<64x32xf32>
    %39 = tpu.matmul %38, %26, %cst_22 {dimension_numbers = #tpu.dot_dimension_numbers<[1], [0], [0], [1], [0, 0, 1, 1], [], []>} : vector<64x64xbf16>, vector<64x32xbf16>, vector<64x32xf32> -> vector<64x32xf32>
    %40 = arith.truncf %39 : vector<64x32xf32> to vector<64x32xbf16>
    %41 = vector.extract_strided_slice %10 {offsets = [0, 32], sizes = [64, 32], strides = [1, 1]} : vector<128x128xf32> to vector<64x32xf32>
    %42 = arith.truncf %41 : vector<64x32xf32> to vector<64x32xbf16>
    %43 = vector.extract_strided_slice %15 {offsets = [0, 32], sizes = [64, 32], strides = [1, 1]} : vector<128x128xf32> to vector<64x32xf32>
    %44 = arith.truncf %43 : vector<64x32xf32> to vector<64x32xbf16>
    %45 = vector.extract_strided_slice %20 {offsets = [0, 32], sizes = [64, 32], strides = [1, 1]} : vector<128x128xf32> to vector<64x32xf32>
    %46 = arith.truncf %45 : vector<64x32xf32> to vector<64x32xbf16>
    %cst_23 = arith.constant dense<0.000000e+00> : vector<64x64xf32>
    %47 = tpu.matmul %42, %44, %cst_23 {dimension_numbers = #tpu.dot_dimension_numbers<[1], [1], [0], [0], [0, 0, 1, 0], [], []>} : vector<64x32xbf16>, vector<64x32xbf16>, vector<64x64xf32> -> vector<64x64xf32>
    %cst_24 = arith.constant dense<0xFF800000> : vector<64xf32>
    %48 = vector.multi_reduction <maximumf>, %47, %cst_24 [1] : vector<64x64xf32> to vector<64xf32>
    %49 = vector.shape_cast %48 : vector<64xf32> to vector<64x1xf32>
    %50 = vector.broadcast %49 : vector<64x1xf32> to vector<64x64xf32>
    %51 = arith.subf %47, %50 : vector<64x64xf32>
    %52 = math.exp %51 : vector<64x64xf32>
    %cst_25 = arith.constant dense<0.000000e+00> : vector<64xf32>
    %53 = vector.multi_reduction <add>, %52, %cst_25 [1] : vector<64x64xf32> to vector<64xf32>
    %54 = vector.shape_cast %53 : vector<64xf32> to vector<64x1xf32>
    %55 = tpu.reciprocal %54 : vector<64x1xf32> -> vector<64x1xf32>
    %56 = vector.broadcast %55 : vector<64x1xf32> to vector<64x64xf32>
    %57 = arith.mulf %52, %56 : vector<64x64xf32>
    %58 = arith.truncf %57 : vector<64x64xf32> to vector<64x64xbf16>
    %cst_26 = arith.constant dense<0.000000e+00> : vector<64x32xf32>
    %59 = tpu.matmul %58, %46, %cst_26 {dimension_numbers = #tpu.dot_dimension_numbers<[1], [0], [0], [1], [0, 0, 1, 1], [], []>} : vector<64x64xbf16>, vector<64x32xbf16>, vector<64x32xf32> -> vector<64x32xf32>
    %60 = arith.truncf %59 : vector<64x32xf32> to vector<64x32xbf16>
    %61 = vector.extract_strided_slice %10 {offsets = [0, 64], sizes = [64, 32], strides = [1, 1]} : vector<128x128xf32> to vector<64x32xf32>
    %62 = arith.truncf %61 : vector<64x32xf32> to vector<64x32xbf16>
    %63 = vector.extract_strided_slice %15 {offsets = [0, 64], sizes = [64, 32], strides = [1, 1]} : vector<128x128xf32> to vector<64x32xf32>
    %64 = arith.truncf %63 : vector<64x32xf32> to vector<64x32xbf16>
    %65 = vector.extract_strided_slice %20 {offsets = [0, 64], sizes = [64, 32], strides = [1, 1]} : vector<128x128xf32> to vector<64x32xf32>
    %66 = arith.truncf %65 : vector<64x32xf32> to vector<64x32xbf16>
    %cst_27 = arith.constant dense<0.000000e+00> : vector<64x64xf32>
    %67 = tpu.matmul %62, %64, %cst_27 {dimension_numbers = #tpu.dot_dimension_numbers<[1], [1], [0], [0], [0, 0, 1, 0], [], []>} : vector<64x32xbf16>, vector<64x32xbf16>, vector<64x64xf32> -> vector<64x64xf32>
    %cst_28 = arith.constant dense<0xFF800000> : vector<64xf32>
    %68 = vector.multi_reduction <maximumf>, %67, %cst_28 [1] : vector<64x64xf32> to vector<64xf32>
    %69 = vector.shape_cast %68 : vector<64xf32> to vector<64x1xf32>
    %70 = vector.broadcast %69 : vector<64x1xf32> to vector<64x64xf32>
    %71 = arith.subf %67, %70 : vector<64x64xf32>
    %72 = math.exp %71 : vector<64x64xf32>
    %cst_29 = arith.constant dense<0.000000e+00> : vector<64xf32>
    %73 = vector.multi_reduction <add>, %72, %cst_29 [1] : vector<64x64xf32> to vector<64xf32>
    %74 = vector.shape_cast %73 : vector<64xf32> to vector<64x1xf32>
    %75 = tpu.reciprocal %74 : vector<64x1xf32> -> vector<64x1xf32>
    %76 = vector.broadcast %75 : vector<64x1xf32> to vector<64x64xf32>
    %77 = arith.mulf %72, %76 : vector<64x64xf32>
    %78 = arith.truncf %77 : vector<64x64xf32> to vector<64x64xbf16>
    %cst_30 = arith.constant dense<0.000000e+00> : vector<64x32xf32>
    %79 = tpu.matmul %78, %66, %cst_30 {dimension_numbers = #tpu.dot_dimension_numbers<[1], [0], [0], [1], [0, 0, 1, 1], [], []>} : vector<64x64xbf16>, vector<64x32xbf16>, vector<64x32xf32> -> vector<64x32xf32>
    %80 = arith.truncf %79 : vector<64x32xf32> to vector<64x32xbf16>
    %81 = vector.extract_strided_slice %10 {offsets = [0, 96], sizes = [64, 32], strides = [1, 1]} : vector<128x128xf32> to vector<64x32xf32>
    %82 = arith.truncf %81 : vector<64x32xf32> to vector<64x32xbf16>
    %83 = vector.extract_strided_slice %15 {offsets = [0, 96], sizes = [64, 32], strides = [1, 1]} : vector<128x128xf32> to vector<64x32xf32>
    %84 = arith.truncf %83 : vector<64x32xf32> to vector<64x32xbf16>
    %85 = vector.extract_strided_slice %20 {offsets = [0, 96], sizes = [64, 32], strides = [1, 1]} : vector<128x128xf32> to vector<64x32xf32>
    %86 = arith.truncf %85 : vector<64x32xf32> to vector<64x32xbf16>
    %cst_31 = arith.constant dense<0.000000e+00> : vector<64x64xf32>
    %87 = tpu.matmul %82, %84, %cst_31 {dimension_numbers = #tpu.dot_dimension_numbers<[1], [1], [0], [0], [0, 0, 1, 0], [], []>} : vector<64x32xbf16>, vector<64x32xbf16>, vector<64x64xf32> -> vector<64x64xf32>
    %cst_32 = arith.constant dense<0xFF800000> : vector<64xf32>
    %88 = vector.multi_reduction <maximumf>, %87, %cst_32 [1] : vector<64x64xf32> to vector<64xf32>
    %89 = vector.shape_cast %88 : vector<64xf32> to vector<64x1xf32>
    %90 = vector.broadcast %89 : vector<64x1xf32> to vector<64x64xf32>
    %91 = arith.subf %87, %90 : vector<64x64xf32>
    %92 = math.exp %91 : vector<64x64xf32>
    %cst_33 = arith.constant dense<0.000000e+00> : vector<64xf32>
    %93 = vector.multi_reduction <add>, %92, %cst_33 [1] : vector<64x64xf32> to vector<64xf32>
    %94 = vector.shape_cast %93 : vector<64xf32> to vector<64x1xf32>
    %95 = tpu.reciprocal %94 : vector<64x1xf32> -> vector<64x1xf32>
    %96 = vector.broadcast %95 : vector<64x1xf32> to vector<64x64xf32>
    %97 = arith.mulf %92, %96 : vector<64x64xf32>
    %98 = arith.truncf %97 : vector<64x64xf32> to vector<64x64xbf16>
    %cst_34 = arith.constant dense<0.000000e+00> : vector<64x32xf32>
    %99 = tpu.matmul %98, %86, %cst_34 {dimension_numbers = #tpu.dot_dimension_numbers<[1], [0], [0], [1], [0, 0, 1, 1], [], []>} : vector<64x64xbf16>, vector<64x32xbf16>, vector<64x32xf32> -> vector<64x32xf32>
    %100 = arith.truncf %99 : vector<64x32xf32> to vector<64x32xbf16>
    %101 = tpu.concatenate %37, %57, %77, %97 in 1 : vector<64x64xf32>, vector<64x64xf32>, vector<64x64xf32>, vector<64x64xf32> -> vector<64x256xf32>
    %c0_35 = arith.constant 0 : index
    %c0_36 = arith.constant 0 : index
    %c0_37 = arith.constant 0 : index
    %102 = vector.load %arg13[%c0_35, %c0_36, %c0_37] : memref<2x64x256xf32, #tpu.memory_space<vmem>>, vector<1x64x256xf32>
    %103 = vector.shape_cast %102 : vector<1x64x256xf32> to vector<64x256xf32>
    %104 = vector.shape_cast %101 : vector<64x256xf32> to vector<1x64x256xf32>
    tpu.vector_store %arg13[%c0_35, %c0_36, %c0_37], %104 {strides = array<i32>} : memref<2x64x256xf32, #tpu.memory_space<vmem>>, vector<1x64x256xf32>,
    %105 = tpu.concatenate %40, %60, %80, %100 in 1 : vector<64x32xbf16>, vector<64x32xbf16>, vector<64x32xbf16>, vector<64x32xbf16> -> vector<64x128xbf16>
    %106 = vector.extract_strided_slice %10 {offsets = [64, 0], sizes = [64, 32], strides = [1, 1]} : vector<128x128xf32> to vector<64x32xf32>
    %107 = arith.truncf %106 : vector<64x32xf32> to vector<64x32xbf16>
    %108 = vector.extract_strided_slice %15 {offsets = [64, 0], sizes = [64, 32], strides = [1, 1]} : vector<128x128xf32> to vector<64x32xf32>
    %109 = arith.truncf %108 : vector<64x32xf32> to vector<64x32xbf16>
    %110 = vector.extract_strided_slice %20 {offsets = [64, 0], sizes = [64, 32], strides = [1, 1]} : vector<128x128xf32> to vector<64x32xf32>
    %111 = arith.truncf %110 : vector<64x32xf32> to vector<64x32xbf16>
    %cst_38 = arith.constant dense<0.000000e+00> : vector<64x64xf32>
    %112 = tpu.matmul %107, %109, %cst_38 {dimension_numbers = #tpu.dot_dimension_numbers<[1], [1], [0], [0], [0, 0, 1, 0], [], []>} : vector<64x32xbf16>, vector<64x32xbf16>, vector<64x64xf32> -> vector<64x64xf32>
    %cst_39 = arith.constant dense<0xFF800000> : vector<64xf32>
    %113 = vector.multi_reduction <maximumf>, %112, %cst_39 [1] : vector<64x64xf32> to vector<64xf32>
    %114 = vector.shape_cast %113 : vector<64xf32> to vector<64x1xf32>
    %115 = vector.broadcast %114 : vector<64x1xf32> to vector<64x64xf32>
    %116 = arith.subf %112, %115 : vector<64x64xf32>
    %117 = math.exp %116 : vector<64x64xf32>
    %cst_40 = arith.constant dense<0.000000e+00> : vector<64xf32>
    %118 = vector.multi_reduction <add>, %117, %cst_40 [1] : vector<64x64xf32> to vector<64xf32>
    %119 = vector.shape_cast %118 : vector<64xf32> to vector<64x1xf32>
    %120 = tpu.reciprocal %119 : vector<64x1xf32> -> vector<64x1xf32>
    %121 = vector.broadcast %120 : vector<64x1xf32> to vector<64x64xf32>
    %122 = arith.mulf %117, %121 : vector<64x64xf32>
    %123 = arith.truncf %122 : vector<64x64xf32> to vector<64x64xbf16>
    %cst_41 = arith.constant dense<0.000000e+00> : vector<64x32xf32>
    %124 = tpu.matmul %123, %111, %cst_41 {dimension_numbers = #tpu.dot_dimension_numbers<[1], [0], [0], [1], [0, 0, 1, 1], [], []>} : vector<64x64xbf16>, vector<64x32xbf16>, vector<64x32xf32> -> vector<64x32xf32>
    %125 = arith.truncf %124 : vector<64x32xf32> to vector<64x32xbf16>
    %126 = vector.extract_strided_slice %10 {offsets = [64, 32], sizes = [64, 32], strides = [1, 1]} : vector<128x128xf32> to vector<64x32xf32>
    %127 = arith.truncf %126 : vector<64x32xf32> to vector<64x32xbf16>
    %128 = vector.extract_strided_slice %15 {offsets = [64, 32], sizes = [64, 32], strides = [1, 1]} : vector<128x128xf32> to vector<64x32xf32>
    %129 = arith.truncf %128 : vector<64x32xf32> to vector<64x32xbf16>
    %130 = vector.extract_strided_slice %20 {offsets = [64, 32], sizes = [64, 32], strides = [1, 1]} : vector<128x128xf32> to vector<64x32xf32>
    %131 = arith.truncf %130 : vector<64x32xf32> to vector<64x32xbf16>
    %cst_42 = arith.constant dense<0.000000e+00> : vector<64x64xf32>
    %132 = tpu.matmul %127, %129, %cst_42 {dimension_numbers = #tpu.dot_dimension_numbers<[1], [1], [0], [0], [0, 0, 1, 0], [], []>} : vector<64x32xbf16>, vector<64x32xbf16>, vector<64x64xf32> -> vector<64x64xf32>
    %cst_43 = arith.constant dense<0xFF800000> : vector<64xf32>
    %133 = vector.multi_reduction <maximumf>, %132, %cst_43 [1] : vector<64x64xf32> to vector<64xf32>
    %134 = vector.shape_cast %133 : vector<64xf32> to vector<64x1xf32>
    %135 = vector.broadcast %134 : vector<64x1xf32> to vector<64x64xf32>
    %136 = arith.subf %132, %135 : vector<64x64xf32>
    %137 = math.exp %136 : vector<64x64xf32>
    %cst_44 = arith.constant dense<0.000000e+00> : vector<64xf32>
    %138 = vector.multi_reduction <add>, %137, %cst_44 [1] : vector<64x64xf32> to vector<64xf32>
    %139 = vector.shape_cast %138 : vector<64xf32> to vector<64x1xf32>
    %140 = tpu.reciprocal %139 : vector<64x1xf32> -> vector<64x1xf32>
    %141 = vector.broadcast %140 : vector<64x1xf32> to vector<64x64xf32>
    %142 = arith.mulf %137, %141 : vector<64x64xf32>
    %143 = arith.truncf %142 : vector<64x64xf32> to vector<64x64xbf16>
    %cst_45 = arith.constant dense<0.000000e+00> : vector<64x32xf32>
    %144 = tpu.matmul %143, %131, %cst_45 {dimension_numbers = #tpu.dot_dimension_numbers<[1], [0], [0], [1], [0, 0, 1, 1], [], []>} : vector<64x64xbf16>, vector<64x32xbf16>, vector<64x32xf32> -> vector<64x32xf32>
    %145 = arith.truncf %144 : vector<64x32xf32> to vector<64x32xbf16>
    %146 = vector.extract_strided_slice %10 {offsets = [64, 64], sizes = [64, 32], strides = [1, 1]} : vector<128x128xf32> to vector<64x32xf32>
    %147 = arith.truncf %146 : vector<64x32xf32> to vector<64x32xbf16>
    %148 = vector.extract_strided_slice %15 {offsets = [64, 64], sizes = [64, 32], strides = [1, 1]} : vector<128x128xf32> to vector<64x32xf32>
    %149 = arith.truncf %148 : vector<64x32xf32> to vector<64x32xbf16>
    %150 = vector.extract_strided_slice %20 {offsets = [64, 64], sizes = [64, 32], strides = [1, 1]} : vector<128x128xf32> to vector<64x32xf32>
    %151 = arith.truncf %150 : vector<64x32xf32> to vector<64x32xbf16>
    %cst_46 = arith.constant dense<0.000000e+00> : vector<64x64xf32>
    %152 = tpu.matmul %147, %149, %cst_46 {dimension_numbers = #tpu.dot_dimension_numbers<[1], [1], [0], [0], [0, 0, 1, 0], [], []>} : vector<64x32xbf16>, vector<64x32xbf16>, vector<64x64xf32> -> vector<64x64xf32>
    %cst_47 = arith.constant dense<0xFF800000> : vector<64xf32>
    %153 = vector.multi_reduction <maximumf>, %152, %cst_47 [1] : vector<64x64xf32> to vector<64xf32>
    %154 = vector.shape_cast %153 : vector<64xf32> to vector<64x1xf32>
    %155 = vector.broadcast %154 : vector<64x1xf32> to vector<64x64xf32>
    %156 = arith.subf %152, %155 : vector<64x64xf32>
    %157 = math.exp %156 : vector<64x64xf32>
    %cst_48 = arith.constant dense<0.000000e+00> : vector<64xf32>
    %158 = vector.multi_reduction <add>, %157, %cst_48 [1] : vector<64x64xf32> to vector<64xf32>
    %159 = vector.shape_cast %158 : vector<64xf32> to vector<64x1xf32>
    %160 = tpu.reciprocal %159 : vector<64x1xf32> -> vector<64x1xf32>
    %161 = vector.broadcast %160 : vector<64x1xf32> to vector<64x64xf32>
    %162 = arith.mulf %157, %161 : vector<64x64xf32>
    %163 = arith.truncf %162 : vector<64x64xf32> to vector<64x64xbf16>
    %cst_49 = arith.constant dense<0.000000e+00> : vector<64x32xf32>
    %164 = tpu.matmul %163, %151, %cst_49 {dimension_numbers = #tpu.dot_dimension_numbers<[1], [0], [0], [1], [0, 0, 1, 1], [], []>} : vector<64x64xbf16>, vector<64x32xbf16>, vector<64x32xf32> -> vector<64x32xf32>
    %165 = arith.truncf %164 : vector<64x32xf32> to vector<64x32xbf16>
    %166 = vector.extract_strided_slice %10 {offsets = [64, 96], sizes = [64, 32], strides = [1, 1]} : vector<128x128xf32> to vector<64x32xf32>
    %167 = arith.truncf %166 : vector<64x32xf32> to vector<64x32xbf16>
    %168 = vector.extract_strided_slice %15 {offsets = [64, 96], sizes = [64, 32], strides = [1, 1]} : vector<128x128xf32> to vector<64x32xf32>
    %169 = arith.truncf %168 : vector<64x32xf32> to vector<64x32xbf16>
    %170 = vector.extract_strided_slice %20 {offsets = [64, 96], sizes = [64, 32], strides = [1, 1]} : vector<128x128xf32> to vector<64x32xf32>
    %171 = arith.truncf %170 : vector<64x32xf32> to vector<64x32xbf16>
    %cst_50 = arith.constant dense<0.000000e+00> : vector<64x64xf32>
    %172 = tpu.matmul %167, %169, %cst_50 {dimension_numbers = #tpu.dot_dimension_numbers<[1], [1], [0], [0], [0, 0, 1, 0], [], []>} : vector<64x32xbf16>, vector<64x32xbf16>, vector<64x64xf32> -> vector<64x64xf32>
    %cst_51 = arith.constant dense<0xFF800000> : vector<64xf32>
    %173 = vector.multi_reduction <maximumf>, %172, %cst_51 [1] : vector<64x64xf32> to vector<64xf32>
    %174 = vector.shape_cast %173 : vector<64xf32> to vector<64x1xf32>
    %175 = vector.broadcast %174 : vector<64x1xf32> to vector<64x64xf32>
    %176 = arith.subf %172, %175 : vector<64x64xf32>
    %177 = math.exp %176 : vector<64x64xf32>
    %cst_52 = arith.constant dense<0.000000e+00> : vector<64xf32>
    %178 = vector.multi_reduction <add>, %177, %cst_52 [1] : vector<64x64xf32> to vector<64xf32>
    %179 = vector.shape_cast %178 : vector<64xf32> to vector<64x1xf32>
    %180 = tpu.reciprocal %179 : vector<64x1xf32> -> vector<64x1xf32>
    %181 = vector.broadcast %180 : vector<64x1xf32> to vector<64x64xf32>
    %182 = arith.mulf %177, %181 : vector<64x64xf32>
    %183 = arith.truncf %182 : vector<64x64xf32> to vector<64x64xbf16>
    %cst_53 = arith.constant dense<0.000000e+00> : vector<64x32xf32>
    %184 = tpu.matmul %183, %171, %cst_53 {dimension_numbers = #tpu.dot_dimension_numbers<[1], [0], [0], [1], [0, 0, 1, 1], [], []>} : vector<64x64xbf16>, vector<64x32xbf16>, vector<64x32xf32> -> vector<64x32xf32>
    %185 = arith.truncf %184 : vector<64x32xf32> to vector<64x32xbf16>
    %186 = tpu.concatenate %122, %142, %162, %182 in 1 : vector<64x64xf32>, vector<64x64xf32>, vector<64x64xf32>, vector<64x64xf32> -> vector<64x256xf32>
    %c1 = arith.constant 1 : index
    %c0_54 = arith.constant 0 : index
    %c0_55 = arith.constant 0 : index
    %187 = vector.load %arg13[%c1, %c0_54, %c0_55] : memref<2x64x256xf32, #tpu.memory_space<vmem>>, vector<1x64x256xf32>
    %188 = vector.shape_cast %187 : vector<1x64x256xf32> to vector<64x256xf32>
    %189 = vector.shape_cast %186 : vector<64x256xf32> to vector<1x64x256xf32>
    tpu.vector_store %arg13[%c1, %c0_54, %c0_55], %189 {strides = array<i32>} : memref<2x64x256xf32, #tpu.memory_space<vmem>>, vector<1x64x256xf32>,
    %190 = tpu.concatenate %125, %145, %165, %185 in 1 : vector<64x32xbf16>, vector<64x32xbf16>, vector<64x32xbf16>, vector<64x32xbf16> -> vector<64x128xbf16>
    %191 = tpu.concatenate %105, %190 in 0 : vector<64x128xbf16>, vector<64x128xbf16> -> vector<128x128xbf16>
    %c0_56 = arith.constant 0 : index
    %c0_57 = arith.constant 0 : index
    %192 = vector.load %arg10[%c0_56, %c0_57] : memref<128x32xbf16, #tpu.memory_space<vmem>>, vector<128x32xbf16>
    %cst_58 = arith.constant dense<0.000000e+00> : vector<128x32xf32>
    %193 = tpu.matmul %191, %192, %cst_58 {dimension_numbers = #tpu.dot_dimension_numbers<[1], [0], [0], [1], [0, 0, 1, 1], [], []>} : vector<128x128xbf16>, vector<128x32xbf16>, vector<128x32xf32> -> vector<128x32xf32>
    %c0_59 = arith.constant 0 : index
    %c0_60 = arith.constant 0 : index
    %194 = vector.load %arg11[%c0_59, %c0_60] : memref<1x32xf32, #tpu.memory_space<vmem>>, vector<1x32xf32>
    %195 = vector.broadcast %194 : vector<1x32xf32> to vector<128x32xf32>
    %196 = arith.addf %193, %195 : vector<128x32xf32>
    %c0_61 = arith.constant 0 : index
    %c0_62 = arith.constant 0 : index
    %197 = vector.load %arg12[%c0_61, %c0_62] : memref<128x32xf32, #tpu.memory_space<vmem>>, vector<128x32xf32>
    tpu.vector_store %arg12[%c0_61, %c0_62], %196 {strides = array<i32>} : memref<128x32xf32, #tpu.memory_space<vmem>>, vector<128x32xf32>,
    return
  }
  func.func @transform_0(%arg0: i32) -> (i32, i32) {
    %c0_i32 = arith.constant 0 : i32
    %c0_i32_0 = arith.constant 0 : i32
    return %arg0, %c0_i32 : i32, i32
  }
  func.func @transform_1(%arg0: i32) -> (i32, i32) {
    %c0_i32 = arith.constant 0 : i32
    %c0_i32_0 = arith.constant 0 : i32
    return %arg0, %c0_i32 : i32, i32
  }
  func.func @transform_2(%arg0: i32) -> (i32, i32) {
    %c0_i32 = arith.constant 0 : i32
    %c0_i32_0 = arith.constant 0 : i32
    return %arg0, %c0_i32 : i32, i32
  }
  func.func @transform_3(%arg0: i32) -> (i32, i32) {
    %c0_i32 = arith.constant 0 : i32
    %c0_i32_0 = arith.constant 0 : i32
    %c0_i32_1 = arith.constant 0 : i32
    return %c0_i32, %c0_i32_0 : i32, i32
  }
  func.func @transform_4(%arg0: i32) -> (i32, i32) {
    %c0_i32 = arith.constant 0 : i32
    %c0_i32_0 = arith.constant 0 : i32
    %c0_i32_1 = arith.constant 0 : i32
    return %c0_i32, %c0_i32_0 : i32, i32
  }
  func.func @transform_5(%arg0: i32) -> (i32, i32) {
    %c0_i32 = arith.constant 0 : i32
    %c0_i32_0 = arith.constant 0 : i32
    %c0_i32_1 = arith.constant 0 : i32
    return %c0_i32, %c0_i32_0 : i32, i32
  }
  func.func @transform_6(%arg0: i32) -> (i32, i32) {
    %c0_i32 = arith.constant 0 : i32
    %c0_i32_0 = arith.constant 0 : i32
    %c0_i32_1 = arith.constant 0 : i32
    return %c0_i32, %c0_i32_0 : i32, i32
  }
  func.func @transform_7(%arg0: i32) -> (i32, i32) {
    %c0_i32 = arith.constant 0 : i32
    %c0_i32_0 = arith.constant 0 : i32
    %c0_i32_1 = arith.constant 0 : i32
    return %c0_i32, %c0_i32_0 : i32, i32
  }
  func.func @transform_8(%arg0: i32) -> (i32, i32) {
    %c0_i32 = arith.constant 0 : i32
    %c0_i32_0 = arith.constant 0 : i32
    %c0_i32_1 = arith.constant 0 : i32
    return %c0_i32, %c0_i32_0 : i32, i32
  }
  func.func @transform_9(%arg0: i32) -> (i32, i32) {
    %c0_i32 = arith.constant 0 : i32
    %c0_i32_0 = arith.constant 0 : i32
    %c0_i32_1 = arith.constant 0 : i32
    return %c0_i32, %c0_i32_0 : i32, i32
  }
  func.func @transform_10(%arg0: i32) -> (i32, i32) {
    %c0_i32 = arith.constant 0 : i32
    %c0_i32_0 = arith.constant 0 : i32
    %c0_i32_1 = arith.constant 0 : i32
    return %c0_i32, %c0_i32_0 : i32, i32
  }
  func.func @transform_11(%arg0: i32) -> (i32, i32) {
    %c0_i32 = arith.constant 0 : i32
    %c0_i32_0 = arith.constant 0 : i32
    return %arg0, %c0_i32 : i32, i32
  }
  func.func @transform_12(%arg0: i32) -> (i32, i32, i32) {
    %c0_i32 = arith.constant 0 : i32
    %c0_i32_0 = arith.constant 0 : i32
    %c0_i32_1 = arith.constant 0 : i32
    return %arg0, %c0_i32, %c0_i32_0 : i32, i32, i32
  }
}

</mosaic_0001>

<bundles_post_ra>
// kernel: mha_forward.1
= control target key start
LH: loop header
LB: loop body
LE: loop exit
PB: predicated region body
PF: predicated region fallthrough
CT: control target
= control target key end

     0   :  { %s4984_s21 = smov 0   ;;  %s6720_s0 = inlined_call_operand.vmem [shape: f32[256,32], index: 0, kind: input, shape index: {}]   ;;  %s6721_s1 = inlined_call_operand.vmem [shape: f32[256,32], index: 1, kind: input, shape index: {}]   ;;  %s6722_s2 = inlined_call_operand.vmem [shape: f32[256,32], index: 2, kind: input, shape index: {}]   ;;  %s6723_s3 = inlined_call_operand.vmem [shape: bf16[32,128], index: 3, kind: input, shape index: {}]   ;;  %s6724_s4 = inlined_call_operand.vmem [shape: f32[1,128], index: 4, kind: input, shape index: {}]   ;;  %s6725_s5 = inlined_call_operand.vmem [shape: bf16[32,128], index: 5, kind: input, shape index: {}]   ;;  %s6726_s6 = inlined_call_operand.vmem [shape: f32[1,128], index: 6, kind: input, shape index: {}]   ;;  %s6727_s7 = inlined_call_operand.vmem [shape: bf16[32,128], index: 7, kind: input, shape index: {}]   ;;  %s6728_s8 = inlined_call_operand.vmem [shape: f32[1,128], index: 8, kind: input, shape index: {}]   ;;  %s6729_s9 = inlined_call_operand.vmem [shape: bf16[128,32], index: 9, kind: input, shape index: {}]   ;;  %s6730_s10 = inlined_call_operand.vmem [shape: f32[1,32], index: 10, kind: input, shape index: {}]   ;;  %s6731_s11 = inlined_call_operand.vmem [shape: f32[256,32], index: 11, kind: output, shape index: {0}]   ;;  %s6732_s12 = inlined_call_operand.vmem [shape: f32[4,64,256], index: 12, kind: output, shape index: {1}]  }
   0x1 LB: > { %s3926_s22 = sadd.s32 4294967295, %s4914_s21   ;;  %p3930_p0 = scmp.ge.s32.totalorder %s4914_s21, 1  ;;  %s4914_s21 = sphi %s4984_s21, %s23_s21  }
   0x2   : > { %p388_p1 = scmp.lt.s32.totalorder %s4914_s21, 3 }
   0x4   : > { %p389_p2 = pnand %p3930_p0, %p388_p1 }
   0x6   : > { %392 = sbr.rel (%p389_p2) target bundleno = 4402 (0x1132), region = 64 }
   0xb   : > { %v4636_v0 = vld [vmem:[%s6723_s3 + $0x8] sm:$0xff]   ;;  %s3931_s25 = sshll.u32 %s3926_s22, 4  ;;  %v4637_v1 = vld [vmem:[%s6723_s3] sm:$0xff]   ;;  %vm573_vm0 = vcmask 261120   ;;  %s4916_s17 = smov 96   ;;  %vm1084_vm1 = vcmask 523264  }
   0xc   : > { %p447_p3 = scmp.lt.s32.totalorder %s3931_s25, 31  ;;  %4589 = vmatprep.subr.bf16.mxu1 %v4636_v0  ;;  %4241 = vmatprep.subr.bf16.mxu0 %v4636_v0  ;;  %v4638_v2 = vld [vmem:[%s6725_s5 + $0x8] sm:$0xff]   ;;  %v4639_v12 = vld [vmem:[%s6725_s5] sm:$0xff]   ;;  %s4917_s18 = smov 64   ;;  %vm2292_vm2 = vcmask 785408  }
   0xd   : > { %4591 = vmatpush3.bf16.msra.mxu1 %v4636_v0  ;;  %4242 = vmatpush3.bf16.msra.mxu0 %v4636_v0  ;;  %v4640_v40 = vld [vmem:[%s6727_s7 + $0x8] sm:$0xff]   ;;  %v4641_v41 = vld [vmem:[%s6727_s7] sm:$0xff]   ;;  %s4918_s23 = smov 32  }
   0xe   : > { %s7013_s25 = smov (!%p447_p3, %s3931_s25), 31  ;;  %4590 = vmatprep.subr.bf16.mxu1 %v4637_v1  ;;  %4243 = vmatprep.subr.bf16.mxu0 %v4637_v1 }
   0xf   : > { %s5003_s30 = sshll.u32 %s7013_s25, 3 }
  0x10   : > { %s5009_s15 = scalar_lea.vmem %s6720_s0, %s5003_s30  ;;  %s5036_s20 = scalar_lea.vmem %s6721_s1, %s5003_s30 }
  0x11   : > { %4592 = vmatpush3.bf16.msra.mxu1 %v4637_v1  ;;  %v482_v3 = vld [vmem:[%s5009_s15 + $0x20] sm:$0xff]  ;;  %v483_v4 = vld [vmem:[%s5009_s15 + $0x28] sm:$0xff]  ;;  %v484_v5 = vld [vmem:[%s5009_s15 + $0x30] sm:$0xff]  ;;  %4244 = vmatpush3.bf16.msra.mxu0 %v4637_v1  ;;  %s5066_s29 = scalar_lea.vmem %s6722_s2, %s5003_s30  ;;  %s6486_s19 = scalar_lea.vmem %s6731_s11, %s5003_s30 }
  0x12   : > { %v496_v6 = vpack.c.bf16 %v483_v4, %v482_v3  ;;  %v485_v7 = vld [vmem:[%s5009_s15 + $0x38] sm:$0xff]  ;;  %4261 = vmatprep.subr.bf16.mxu1 %v4638_v2  ;;  %v486_v8 = vld [vmem:[%s5009_s15 + $0x40] sm:$0xff]  ;;  %v487_v9 = vld [vmem:[%s5009_s15 + $0x48] sm:$0xff]  ;;  %4281 = vmatprep.subr.bf16.mxu0 %v4640_v40  ;;  %s3939_s30 = sshll.u32 %s3926_s22, 1 }
  0x13   : > { %v497_v10 = vpack.c.bf16 %v485_v7, %v484_v5  ;;  %v498_v11 = vpack.c.bf16 %v487_v9, %v486_v8  ;;  %v488_v13 = vld [vmem:[%s5009_s15 + $0x50] sm:$0xff]  ;;  %v489_v14 = vld [vmem:[%s5009_s15 + $0x58] sm:$0xff]  ;;  %v490_v15 = vld [vmem:[%s5009_s15 + $0x60] sm:$0xff]  ;;  %p471_p4 = scmp.lt.s32.totalorder %s3939_s30, 3 }
  0x14   : > { %4249 = vmatprep.mubr.msk.bf16.mxu1 %vm573_vm0, %v496_v6  ;;  %v491_v16 = vld [vmem:[%s5009_s15 + $0x68] sm:$0xff]  ;;  %v478_v17 = vld [vmem:[%s5009_s15] sm:$0xff]  ;;  %v480_v19 = vld [vmem:[%s5009_s15 + $0x10] sm:$0xff]  ;;  %v499_v21 = vpack.c.bf16 %v489_v14, %v488_v13 }
  0x15   : > { %4250 = vmatmul.mubr.msk.bf16.vlgmr.msra.gmra.mxu1 %vm573_vm0, %v497_v10  ;;  %v479_v18 = vld [vmem:[%s5009_s15 + $0x8] sm:$0xff]  ;;  %v481_v20 = vld [vmem:[%s5009_s15 + $0x18] sm:$0xff]  ;;  %v500_v24 = vpack.c.bf16 %v491_v16, %v490_v15  ;;  %v492_v25 = vld [vmem:[%s5009_s15 + $0x70] sm:$0xff]  ;;  %s7015_s30 = smov (!%p471_p4, %s3939_s30), 3 }
  0x16   : > { %4262 = vmatpush3.bf16.msra.mxu1 %v4638_v2  ;;  %4253 = vmatprep.mubr.msk.bf16.mxu1 %vm573_vm0, %v498_v11  ;;  %v494_v22 = vpack.c.bf16 %v479_v18, %v478_v17  ;;  %v495_v23 = vpack.c.bf16 %v481_v20, %v480_v19  ;;  %v493_v26 = vld [vmem:[%s5009_s15 + $0x78] sm:$0xff]  ;;  %v502_v27 = vld [vmem:[%s5036_s20] sm:$0xff]  ;;  %v503_v28 = vld [vmem:[%s5036_s20 + $0x8] sm:$0xff]  ;;  %s4066_s22 = sshll.u32 %s7015_s30, 7 }
  0x17   : > { %4263 = vmatprep.subr.bf16.mxu1 %v4639_v12  ;;  %v501_v29 = vpack.c.bf16 %v493_v26, %v492_v25  ;;  %v518_v30 = vpack.c.bf16 %v503_v28, %v502_v27  ;;  %v504_v31 = vld [vmem:[%s5036_s20 + $0x10] sm:$0xff]  ;;  %v505_v32 = vld [vmem:[%s5036_s20 + $0x18] sm:$0xff]  ;;  %v506_v33 = vld [vmem:[%s5036_s20 + $0x20] sm:$0xff] }
  0x18   : > { %4245 = vmatprep.mubr.msk.bf16.mxu0 %vm573_vm0, %v494_v22  ;;  %v507_v34 = vld [vmem:[%s5036_s20 + $0x28] sm:$0xff]  ;;  %v519_v35 = vpack.c.bf16 %v505_v32, %v504_v31  ;;  %v508_v37 = vld [vmem:[%s5036_s20 + $0x30] sm:$0xff]  ;;  %v509_v38 = vld [vmem:[%s5036_s20 + $0x38] sm:$0xff] }
  0x19   : > { %4246 = vmatmul.mubr.msk.bf16.vlgmr.msra.gmra.mxu0 %vm573_vm0, %v495_v23  ;;  %v520_v36 = vpack.c.bf16 %v507_v34, %v506_v33  ;;  %v521_v39 = vpack.c.bf16 %v509_v38, %v508_v37  ;;  %v526_v42 = vld [vmem:[%s5066_s29] sm:$0xff]  ;;  %v527_v43 = vld [vmem:[%s5066_s29 + $0x8] sm:$0xff]  ;;  %v528_v45 = vld [vmem:[%s5066_s29 + $0x10] sm:$0xff] }
  0x1a   : > { %4264 = vmatpush3.bf16.msra.mxu1 %v4639_v12  ;;  %4282 = vmatpush3.bf16.msra.mxu0 %v4640_v40  ;;  %v542_v44 = vpack.c.bf16 %v527_v43, %v526_v42  ;;  %v529_v46 = vld [vmem:[%s5066_s29 + $0x18] sm:$0xff]  ;;  %v530_v48 = vld [vmem:[%s5066_s29 + $0x20] sm:$0xff]  ;;  %v531_v49 = vld [vmem:[%s5066_s29 + $0x28] sm:$0xff] }
  0x1b   : > { %4283 = vmatprep.subr.bf16.mxu0 %v4641_v41  ;;  %v543_v47 = vpack.c.bf16 %v529_v46, %v528_v45  ;;  %v544_v50 = vpack.c.bf16 %v531_v49, %v530_v48  ;;  %v532_v51 = vld [vmem:[%s5066_s29 + $0x30] sm:$0xff]  ;;  %v533_v52 = vld [vmem:[%s5066_s29 + $0x38] sm:$0xff]  ;;  %v510_v54 = vld [vmem:[%s5036_s20 + $0x40] sm:$0xff] }
  0x1c   : > { %4285 = vmatprep.mubr.msk.bf16.mxu0 %vm573_vm0, %v542_v44  ;;  %v545_v53 = vpack.c.bf16 %v533_v52, %v532_v51  ;;  %v511_v55 = vld [vmem:[%s5036_s20 + $0x48] sm:$0xff]  ;;  %v512_v57 = vld [vmem:[%s5036_s20 + $0x50] sm:$0xff]  ;;  %v513_v58 = vld [vmem:[%s5036_s20 + $0x58] sm:$0xff] }
  0x1d   : > { %4254 = vmatmul.mubr.msk.bf16.gmra.mxu1 %vm573_vm0, %v499_v21  ;;  %v522_v56 = vpack.c.bf16 %v511_v55, %v510_v54  ;;  %v523_v59 = vpack.c.bf16 %v513_v58, %v512_v57  ;;  %v514_v60 = vld [vmem:[%s5036_s20 + $0x60] sm:$0xff]  ;;  %v515_v61 = vld [vmem:[%s5036_s20 + $0x68] sm:$0xff]  ;;  %v516_v63 = vld [vmem:[%s5036_s20 + $0x70] sm:$0xff] }
  0x1e   : > { %4257 = vmatprep.mubr.msk.bf16.mxu1 %vm573_vm0, %v500_v24  ;;  %4284 = vmatpush3.bf16.msra.mxu0 %v4641_v41  ;;  %v524_v62 = vpack.c.bf16 %v515_v61, %v514_v60  ;;  %v517_v0 = vld [vmem:[%s5036_s20 + $0x78] sm:$0xff]  ;;  %v5105_v7 = vld [vmem:[%s6724_s4] ss:$0 sm:$0xff]  ;;  %v535_v49 = vld [vmem:[%s5066_s29 + $0x48] sm:$0xff] }
  0x1f   : > { %v525_v1 = vpack.c.bf16 %v517_v0, %v516_v63  ;;  %v534_v48 = vld [vmem:[%s5066_s29 + $0x40] sm:$0xff]  ;;  %v537_v54 = vld [vmem:[%s5066_s29 + $0x58] sm:$0xff]  ;;  %v539_v0 = vld [vmem:[%s5066_s29 + $0x68] sm:$0xff] }
  0x20   : > { %v546_v52 = vpack.c.bf16 %v535_v49, %v534_v48  ;;  %v538_v63 = vld [vmem:[%s5066_s29 + $0x60] sm:$0xff] }
  0x21   : > { %4286 = vmatmul.mubr.msk.bf16.vlgmr.msra.gmra.mxu0 %vm573_vm0, %v543_v47 }
  0x22   : > { %4289 = vmatprep.mubr.msk.bf16.mxu0 %vm573_vm0, %v544_v50 }
  0x25   : > { %4258 = vmatmul.mubr.msk.bf16.gmra.mxu1 %vm573_vm0, %v501_v29 }
  0x26   : > { %4265 = vmatprep.mubr.msk.bf16.mxu1 %vm573_vm0, %v518_v30 }
  0x29   : > { %4290 = vmatmul.mubr.msk.bf16.gmra.mxu0 %vm573_vm0, %v545_v53  ;;  %v536_v53 = vld [vmem:[%s5066_s29 + $0x50] sm:$0xff] }
  0x2a   : > { %4293 = vmatprep.mubr.msk.bf16.mxu0 %vm573_vm0, %v546_v52 }
  0x2d   : > { %4266 = vmatmul.mubr.msk.bf16.vlgmr.msra.gmra.mxu1 %vm573_vm0, %v519_v35  ;;  %v5134_v35 = vld [vmem:[%s6726_s6] ss:$0 sm:$0xff] }
  0x2e   : > { %4269 = vmatprep.mubr.msk.bf16.mxu1 %vm573_vm0, %v520_v36 }
  0x35   : > { %4270 = vmatmul.mubr.msk.bf16.gmra.mxu1 %vm573_vm0, %v521_v39 }
  0x36   : > { %4273 = vmatprep.mubr.msk.bf16.mxu1 %vm573_vm0, %v522_v56  ;;  %v547_v56 = vpack.c.bf16 %v537_v54, %v536_v53 }
  0x38   : > { %4294 = vmatmul.mubr.msk.bf16.gmra.mxu0 %vm573_vm0, %v547_v56 }
  0x3d   : > { %4274 = vmatmul.mubr.msk.bf16.gmra.mxu1 %vm573_vm0, %v523_v59 }
  0x3e   : > { %4277 = vmatprep.mubr.msk.bf16.mxu1 %vm573_vm0, %v524_v62 }
  0x45   : > { %4278 = vmatmul.mubr.msk.bf16.gmra.mxu1 %vm573_vm0, %v525_v1 }
  0xd5   : > { %v5092_v2 = vpop.f32.mrf.mxu1 }
  0xd7   : > { %v5094_v3 = vpop.f32.mrf.mxu1 }
  0xd9   : > { %v5096_v4 = vpop.f32.mrf.mxu1  ;;  %v5100_v6 = vpop.f32.mrf.mxu0 }
  0xda   : > { %v641_v1 = vadd.f32 %v5100_v6, %v5105_v7 }
  0xdb   : > { %v5098_v5 = vpop.f32.mrf.mxu1  ;;  %v632_v10 = vpop.f32.mrf.mxu0 }
  0xdc   : > { %v633_v15 = vadd.f32 %v5105_v7, %v632_v10  ;;  %v652_v62 = vadd.f32 %v5105_v7, %v5098_v5  ;;  %v540_v10 = vld [vmem:[%s5066_s29 + $0x70] sm:$0xff] }
  0xdd   : > { %v4255_v8 = vpop.f32.mrf.mxu1  ;;  %v5109_v13 = vpop.f32.mrf.mxu0 }
  0xde   : > { %v673_v9 = vadd.f32 %v4255_v8, %v5105_v7  ;;  %v644_v8 = vadd.f32 %v5109_v13, %v5105_v7 }
  0xdf   : > { %v664_v11 = vpop.f32.mrf.mxu1  ;;  %v635_v17 = vpop.f32.mrf.mxu0 }
  0xe0   : > { %v665_v12 = vadd.f32 %v5105_v7, %v664_v11  ;;  %v636_v19 = vadd.f32 %v5105_v7, %v635_v17  ;;  %v541_v11 = vld [vmem:[%s5066_s29 + $0x78] sm:$0xff]  ;;  %v5192_v6 = vpack.c.bf16 %v644_v8, %v641_v1 }
  0xe1   : > { %v4256_v14 = vpop.f32.mrf.mxu1  ;;  %v549_v5 = vpack.c.bf16 %v541_v11, %v540_v10 }
  0xe2   : > { %v676_v16 = vadd.f32 %v4256_v14, %v5105_v7  ;;  %v5117_v23 = vpack.c.bf16 %v636_v19, %v633_v15  ;;  %v657_v15 = vadd.f32 %v5092_v2, %v5105_v7 }
  0xe3   : > { %v667_v18 = vpop.f32.mrf.mxu1 }
  0xe4   : > { %v5114_v20 = vpack.c.bf16 %v676_v16, %v673_v9  ;;  %v668_v21 = vadd.f32 %v5105_v7, %v667_v18  ;;  %4309 = vmatprep.mubr.msk.bf16.mxu1 %vm573_vm0, %v5117_v23  ;;  %v548_v9 = vpack.c.bf16 %v539_v0, %v538_v63 }
  0xe5   : > { %v4259_v22 = vpop.f32.mrf.mxu1 }
  0xe6   : > { %6816 = vst [vmem:[#allocation2_spill] sm:$0xff] %v5114_v20  ;;  %v5119_v24 = vpack.c.bf16 %v668_v21, %v665_v12  ;;  %v689_v25 = vadd.f32 %v4259_v22, %v5105_v7  ;;  %v649_v12 = vadd.f32 %v5105_v7, %v5094_v3  ;;  %4297 = vmatprep.mubr.msk.bf16.mxu0 %vm573_vm0, %v548_v9 }
  0xe7   : > { %v680_v26 = vpop.f32.mrf.mxu1  ;;  %4298 = vmatmul.mubr.msk.bf16.gmra.mxu0 %vm573_vm0, %v549_v5  ;;  %v660_v3 = vadd.f32 %v5096_v4, %v5105_v7  ;;  %v4287_v4 = vpop.f32.mrf.mxu0 }
  0xe8   : > { %6817 = vst [vmem:[#allocation3_spill] sm:$0xff] %v5119_v24  ;;  %v681_v27 = vadd.f32 %v5105_v7, %v680_v26  ;;  %v5189_v14 = vpack.c.bf16 %v652_v62, %v649_v12 }
  0xe9   : > { %v4260_v28 = vpop.f32.mrf.mxu1  ;;  %v5216_v17 = vpack.c.bf16 %v660_v3, %v657_v15  ;;  %v920_v18 = vpop.f32.mrf.mxu0 }
  0xea   : > { %v692_v29 = vadd.f32 %v4260_v28, %v5105_v7 }
  0xeb   : > { %v683_v30 = vpop.f32.mrf.mxu1  ;;  %v4288_v21 = vpop.f32.mrf.mxu0 }
  0xec   : > { %v5126_v31 = vpack.c.bf16 %v692_v29, %v689_v25  ;;  %v684_v32 = vadd.f32 %v5105_v7, %v683_v30  ;;  %v5237_v7 = vld [vmem:[%s6728_s8] ss:$0 sm:$0xff] }
  0xed   : > { %v4267_v33 = vpop.f32.mrf.mxu1  ;;  %v929_v19 = vadd.f32 %v4287_v4, %v5237_v7  ;;  %v932_v22 = vadd.f32 %v4288_v21, %v5237_v7  ;;  %v923_v25 = vpop.f32.mrf.mxu0 }
  0xee   : > { %6818 = vst [vmem:[#allocation4_spill] sm:$0xff] %v5126_v31  ;;  %v5129_v34 = vpack.c.bf16 %v684_v32, %v681_v27  ;;  %v785_v38 = vadd.f32 %v4267_v33, %v5134_v35 }
  0xef   : > { %v776_v36 = vpop.f32.mrf.mxu1  ;;  %v5243_v26 = vpack.c.bf16 %v932_v22, %v929_v19  ;;  %v4291_v27 = vpop.f32.mrf.mxu0 }
  0xf0   : > { %6819 = vst [vmem:[#allocation5_spill] sm:$0xff] %v5129_v34  ;;  %v777_v44 = vadd.f32 %v5134_v35, %v776_v36  ;;  %v945_v29 = vadd.f32 %v4291_v27, %v5237_v7 }
  0xf1   : > { %v4268_v37 = vpop.f32.mrf.mxu1  ;;  %v936_v28 = vpop.f32.mrf.mxu0 }
  0xf2   : > { %v788_v39 = vadd.f32 %v4268_v37, %v5134_v35  ;;  %v937_v32 = vadd.f32 %v5237_v7, %v936_v28 }
  0xf3   : > { %v779_v40 = vpop.f32.mrf.mxu1  ;;  %v4292_v30 = vpop.f32.mrf.mxu0 }
  0xf4   : > { %v5138_v41 = vpack.c.bf16 %v788_v39, %v785_v38  ;;  %v780_v42 = vadd.f32 %v5134_v35, %v779_v40  ;;  %v948_v33 = vadd.f32 %v4292_v30, %v5237_v7  ;;  %v921_v39 = vadd.f32 %v5237_v7, %v920_v18 }
  0xf5   : > { %v4271_v43 = vpop.f32.mrf.mxu1  ;;  %v939_v36 = vpop.f32.mrf.mxu0  ;;  %v924_v40 = vadd.f32 %v5237_v7, %v923_v25 }
  0xf6   : > { %1276 = vrot.lane.b32.xlu1 %v5138_v41, %s4916_s17  ;;  %v5144_v46 = vpack.c.bf16 %v780_v42, %v777_v44  ;;  %v801_v50 = vadd.f32 %v4271_v43, %v5134_v35  ;;  %v1011_v16 = vsel %vm573_vm0, %v5138_v41, 0  ;;  %v5250_v37 = vpack.c.bf16 %v948_v33, %v945_v29 }
  0xf7   : > { %v792_v45 = vpop.f32.mrf.mxu1  ;;  %v940_v38 = vadd.f32 %v5237_v7, %v939_v36  ;;  %v5262_v43 = vpack.c.bf16 %v924_v40, %v921_v39 }
  0xf8   : > { %v793_v57 = vadd.f32 %v5134_v35, %v792_v45  ;;  %v1008_v2 = vsel %vm573_vm0, %v5144_v46, 0  ;;  %v4295_v30 = vpop.f32.mrf.mxu0 }
  0xf9   : > { %v4272_v47 = vpop.f32.mrf.mxu1  ;;  %v5255_v42 = vpack.c.bf16 %v940_v38, %v937_v32  ;;  %v961_v33 = vadd.f32 %v4295_v30, %v5237_v7 }
  0xfa   : > { %v804_v51 = vadd.f32 %v4272_v47, %v5134_v35  ;;  %1274 = vrot.lane.b32.xlu1 %v5144_v46, %s4916_s17  ;;  %v952_v32 = vpop.f32.mrf.mxu0 }
  0xfb   : > { %v795_v55 = vpop.f32.mrf.mxu1  ;;  %v953_v38 = vadd.f32 %v5237_v7, %v952_v32 }
  0xfc   : > { %v5155_v58 = vpack.c.bf16 %v804_v51, %v801_v50  ;;  %v796_v59 = vadd.f32 %v5134_v35, %v795_v55  ;;  %v4296_v36 = vpop.f32.mrf.mxu0 }
  0xfd   : > { %v4275_v44 = vpop.f32.mrf.mxu1  ;;  %v964_v39 = vadd.f32 %v4296_v36, %v5237_v7 }
  0xfe   : > { %v5160_v60 = vpack.c.bf16 %v796_v59, %v793_v57  ;;  %1280 = vrot.lane.b32.xlu0 %v5155_v58, %s4916_s17  ;;  %4593 = vmatprep.subr.msk.bf16.mxu1 %vm573_vm0, %v5155_v58  ;;  %v1017_v61 = vsel %vm573_vm0, %v5155_v58, 0  ;;  %v817_v47 = vadd.f32 %v4275_v44, %v5134_v35  ;;  %v955_v40 = vpop.f32.mrf.mxu0 }
  0xff   : > { %1574 = vrot.lane.b32.xlu1 %v5155_v58, %s4917_s18  ;;  %4302 = vmatpush3.bf16.xpose.msra.mxu1 %v1017_v61  ;;  %v808_v45 = vpop.f32.mrf.mxu1  ;;  %v5318_v44 = vpack.c.bf16 %v964_v39, %v961_v33 }
 0x100   : > { %4594 = vmatprep.subr.msk.bf16.mxu1 %vm573_vm0, %v5160_v60  ;;  %v1014_v13 = vsel %vm573_vm0, %v5160_v60, 0  ;;  %v809_v49 = vadd.f32 %v5134_v35, %v808_v45  ;;  %v956_v45 = vadd.f32 %v5237_v7, %v955_v40 }
 0x101   : > { %v4276_v48 = vpop.f32.mrf.mxu1 }
 0x102   : > { %1278 = vrot.lane.b32.xlu0 %v5160_v60, %s4916_s17  ;;  %v820_v50 = vadd.f32 %v4276_v48, %v5134_v35  ;;  %v5321_v48 = vpack.c.bf16 %v956_v45, %v953_v38 }
 0x103   : > { %1572 = vrot.lane.b32.xlu1 %v5160_v60, %s4917_s18  ;;  %v811_v51 = vpop.f32.mrf.mxu1 }
 0x104   : > { %v5280_v52 = vpack.c.bf16 %v820_v50, %v817_v47  ;;  %v812_v53 = vadd.f32 %v5134_v35, %v811_v51 }
 0x105   : > { %v4279_v54 = vpop.f32.mrf.mxu1 }
 0x106   : > { %1262 = vrot.lane.b32.xlu0 %v5117_v23, %s4916_s17  ;;  %6820 = vst [vmem:[#allocation6_spill] sm:$0xff] %v5280_v52  ;;  %v5283_v55 = vpack.c.bf16 %v812_v53, %v809_v49  ;;  %v833_v57 = vadd.f32 %v4279_v54, %v5134_v35 }
 0x107   : > { %1266 = vrot.lane.b32.xlu1 %v5189_v14, %s4916_s17  ;;  %4304 = vmatpush3.bf16.xpose.msra.mxu1 %v1014_v13  ;;  %v5285_v56 = vpop.f32.mrf.mxu1 }
 0x108   : > { %4595 = vmatprep.subr.msk.bf16.mxu1 %vm573_vm0, %v5138_v41  ;;  %6821 = vst [vmem:[#allocation7_spill] sm:$0xff] %v5283_v55 }
 0x109   : > { %v4280_v59 = vpop.f32.mrf.mxu1 }
 0x10a   : > { %1264 = vrot.lane.b32.xlu0 %v5192_v6, %s4916_s17  ;;  %v836_v61 = vadd.f32 %v4280_v59, %v5134_v35 }
 0x10b   : > { %1568 = vrot.lane.b32.xlu1 %v5144_v46, %s4917_s18  ;;  %v5331_v59 = vpop.f32.mrf.mxu1 }
 0x10c   : > { %v5289_v62 = vpack.c.bf16 %v836_v61, %v833_v57  ;;  %6822 = vst [vmem:[#allocation8_spill] sm:$0xff] %v5331_v59 }
 0x10e   : > { %1570 = vrot.lane.b32.xlu0 %v5138_v41, %s4917_s18 }
 0x10f   : > { %1562 = vrot.lane.b32.xlu1 %v5192_v6, %s4917_s18  ;;  %4306 = vmatpush3.bf16.xpose.msra.mxu1 %v1011_v16 }
 0x110   : > { %4596 = vmatprep.subr.msk.bf16.mxu1 %vm573_vm0, %v5144_v46 }
 0x112   : > { %1268 = vrot.lane.b32.xlu0 %v5216_v17, %s4916_s17 }
 0x113   : > { %1566 = vrot.lane.b32.xlu1 %v5216_v17, %s4917_s18 }
 0x116   : > { %1560 = vrot.lane.b32.xlu0 %v5117_v23, %s4917_s18 }
 0x117   : > { %4308 = vmatpush3.bf16.xpose.msra.mxu1 %v1008_v2  ;;  %1473 = vrot.lane.b32.xlu1 %v5250_v37, %s4916_s17 }
 0x118   : > { %4317 = vmatprep.subr.bf16.mxu1 %v5250_v37 }
 0x11a   : > { %1564 = vrot.lane.b32.xlu0 %v5189_v14, %s4917_s18 }
 0x11b   : > { %1471 = vrot.lane.b32.xlu1 %v5255_v42, %s4916_s17 }
 0x11e   : > { %4310 = vmatmul.mubr.msk.bf16.vlgmr.msra.gmra.mxu1 %vm573_vm0, %v5192_v6  ;;  %1469 = vrot.lane.b32.xlu0 %v5243_v26, %s4916_s17 }
 0x11f   : > { %4313 = vmatprep.mubr.msk.bf16.mxu1 %vm573_vm0, %v5189_v14  ;;  %4318 = vmatpush3.bf16.msra.mxu1 %v5250_v37 }
 0x120   : > { %4319 = vmatprep.subr.bf16.mxu1 %v5255_v42  ;;  %1467 = vrot.lane.b32.xlu1 %v5262_v43, %s4916_s17 }
 0x123   : > { %4320 = vmatpush3.bf16.msra.mxu1 %v5255_v42 }
 0x124   : > { %4321 = vmatprep.subr.bf16.mxu1 %v5243_v26  ;;  %1763 = vrot.lane.b32.xlu1 %v5250_v37, %s4917_s18 }
 0x126   : > { %4314 = vmatmul.mubr.msk.bf16.gmra.mxu1 %vm573_vm0, %v5216_v17 }
 0x127   : > { %4322 = vmatpush3.bf16.msra.mxu1 %v5243_v26 }
 0x128   : > { %4323 = vmatprep.subr.bf16.mxu1 %v5262_v43  ;;  %1761 = vrot.lane.b32.xlu1 %v5255_v42, %s4917_s18 }
 0x12b   : > { %4324 = vmatpush3.bf16.msra.mxu1 %v5262_v43 }
 0x168   : > { %v1277_v9 = vpop.permute.xlu1 %1276 }
 0x169   : > { %v1298_v11 = vsel %vm573_vm0, %v1277_v9, 0 }
 0x16c   : > { %v1275_v35 = vpop.permute.xlu1 %1274 }
 0x16d   : > { %v1295_v13 = vsel %vm573_vm0, %v1275_v35, 0 }
 0x170   : > { %v1281_v63 = vpop.permute.xlu0 %1280 }
 0x171   : > { %4597 = vmatprep.subr.msk.bf16.mxu0 %vm573_vm0, %v1281_v63  ;;  %v1304_v0 = vsel %vm573_vm0, %v1281_v63, 0  ;;  %v1575_v12 = vpop.permute.xlu1 %1574 }
 0x172   : > { %4334 = vmatpush3.bf16.xpose.msra.mxu0 %v1304_v0  ;;  %v1598_v2 = vsel %vm573_vm0, %v1575_v12, 0 }
 0x174   : > { %v1279_v1 = vpop.permute.xlu0 %1278 }
 0x175   : > { %4598 = vmatprep.subr.msk.bf16.mxu0 %vm573_vm0, %v1279_v1  ;;  %v1301_v10 = vsel %vm573_vm0, %v1279_v1, 0  ;;  %v1573_v3 = vpop.permute.xlu1 %1572 }
 0x176   : > { %v1595_v19 = vsel %vm573_vm0, %v1573_v3, 0 }
 0x178   : > { %v1263_v8 = vpop.permute.xlu0 %1262 }
 0x179   : > { %4341 = vmatprep.mubr.msk.bf16.mxu0 %vm573_vm0, %v1263_v8  ;;  %v1267_v16 = vpop.permute.xlu1 %1266 }
 0x17a   : > { %4336 = vmatpush3.bf16.xpose.msra.mxu0 %v1301_v10 }
 0x17b   : > { %4599 = vmatprep.subr.msk.bf16.mxu0 %vm573_vm0, %v1277_v9 }
 0x17c   : > { %v1265_v5 = vpop.permute.xlu0 %1264 }
 0x17d   : > { %v1569_v22 = vpop.permute.xlu1 %1568 }
 0x17e   : > { %v1589_v25 = vsel %vm573_vm0, %v1569_v22, 0 }
 0x180   : > { %v1571_v15 = vpop.permute.xlu0 %1570 }
 0x181   : > { %v1592_v21 = vsel %vm573_vm0, %v1571_v15, 0  ;;  %v1563_v27 = vpop.permute.xlu1 %1562 }
 0x182   : > { %4338 = vmatpush3.bf16.xpose.msra.mxu0 %v1298_v11 }
 0x183   : > { %4600 = vmatprep.subr.msk.bf16.mxu0 %vm573_vm0, %v1275_v35 }
 0x184   : > { %v1269_v4 = vpop.permute.xlu0 %1268 }
 0x185   : > { %v1567_v29 = vpop.permute.xlu1 %1566 }
 0x188   : > { %v1561_v18 = vpop.permute.xlu0 %1560 }
 0x189   : > { %v5329_v57 = vpop.permute.xlu1 %1473 }
 0x18a   : > { %4340 = vmatpush3.bf16.xpose.msra.mxu0 %v1295_v13  ;;  %4349 = vmatprep.subr.bf16.mxu1 %v5329_v57 }
 0x18b   : > { %4601 = vmatprep.subr.msk.bf16.mxu0 %vm573_vm0, %v1575_v12 }
 0x18c   : > { %v1565_v28 = vpop.permute.xlu0 %1564 }
 0x191   : > { %4342 = vmatmul.mubr.msk.bf16.vlgmr.msra.gmra.mxu0 %vm573_vm0, %v1265_v5 }
 0x192   : > { %4345 = vmatprep.mubr.msk.bf16.mxu0 %vm573_vm0, %v1267_v16  ;;  %4366 = vmatpush3.bf16.xpose.msra.mxu0 %v1598_v2 }
 0x193   : > { %4602 = vmatprep.subr.msk.bf16.mxu0 %vm573_vm0, %v1573_v3 }
 0x199   : > { %4346 = vmatmul.mubr.msk.bf16.gmra.mxu0 %vm573_vm0, %v1269_v4 }
 0x19a   : > { %4368 = vmatpush3.bf16.xpose.msra.mxu0 %v1595_v19  ;;  %4373 = vmatprep.mubr.msk.bf16.mxu0 %vm573_vm0, %v1561_v18 }
 0x19b   : > { %4603 = vmatprep.subr.msk.bf16.mxu0 %vm573_vm0, %v1571_v15 }
 0x1a2   : > { %4370 = vmatpush3.bf16.xpose.msra.mxu0 %v1592_v21 }
 0x1a3   : > { %4604 = vmatprep.subr.msk.bf16.mxu0 %vm573_vm0, %v1569_v22 }
 0x1a7   : > { %v4299_v47 = vpop.f32.mrf.mxu0 }
 0x1a8   : > { %v977_v50 = vadd.f32 %v4299_v47, %v5237_v7 }
 0x1a9   : > { %v5323_v49 = vpop.f32.mrf.mxu0 }
 0x1aa   : > { %4372 = vmatpush3.bf16.xpose.msra.mxu0 %v1589_v25 }
 0x1ab   : > { %v4300_v51 = vpop.f32.mrf.mxu0 }
 0x1ac   : > { %v980_v53 = vadd.f32 %v4300_v51, %v5237_v7 }
 0x1ad   : > { %v5357_v2 = vpop.f32.mrf.mxu0 }
 0x1ae   : > { %v5327_v54 = vpack.c.bf16 %v980_v53, %v977_v50  ;;  %v5395_v50 = vpop.permute.xlu0 %1469 }
 0x1b1   : > { %4374 = vmatmul.mubr.msk.bf16.vlgmr.msra.gmra.mxu0 %vm573_vm0, %v1563_v27 }
 0x1b2   : > { %4377 = vmatprep.mubr.msk.bf16.mxu0 %vm573_vm0, %v1565_v28  ;;  %v5373_v28 = vpop.permute.xlu1 %1471 }
 0x1b6   : > { %v5385_v38 = vpop.permute.xlu1 %1467 }
 0x1b9   : > { %4378 = vmatmul.mubr.msk.bf16.gmra.mxu0 %vm573_vm0, %v1567_v29 }
 0x1ba   : > { %v5397_v51 = vpop.permute.xlu1 %1763 }
 0x1de   : > { %v5334_v61 = vpop.f32.mrf.mxu1 }
 0x1df   : > { %v1091_v63 = vsel %vm1084_vm1, %v5334_v61, -inf }
 0x1e0   : > { %1092 = vmax.xlane.f32.xlu0 %v1091_v63  ;;  %v5338_v0 = vpop.f32.mrf.mxu1  ;;  %v5399_v63 = vpop.permute.xlu1 %1761 }
 0x1e1   : > { %v1085_v7 = vsel %vm1084_vm1, %v5338_v0, -inf }
 0x1e2   : > { %v4312_v1 = vpop.f32.mrf.mxu1 }
 0x1e3   : > { %v1094_v35 = vsel %vm1084_vm1, %v4312_v1, -inf }
 0x1e4   : > { %1086 = vmax.xlane.f32.xlu0 %v1085_v7  ;;  %v1056_v8 = vpop.f32.mrf.mxu1 }
 0x1e5   : > { %v1088_v9 = vsel %vm1084_vm1, %v1056_v8, -inf }
 0x1e6   : > { %1089 = vmax.xlane.f32.xlu1 %v1088_v9  ;;  %v5343_v10 = vpop.f32.mrf.mxu1 }
 0x1e7   : > { %v1103_v12 = vsel %vm1084_vm1, %v5343_v10, -inf }
 0x1e8   : > { %1095 = vmax.xlane.f32.xlu0 %v1094_v35  ;;  %v5346_v11 = vpop.f32.mrf.mxu1 }
 0x1e9   : > { %v1097_v15 = vsel %vm1084_vm1, %v5346_v11, -inf }
 0x1ea   : > { %1104 = vmax.xlane.f32.xlu1 %v1103_v12  ;;  %v4316_v5 = vpop.f32.mrf.mxu1 }
 0x1eb   : > { %v1106_v13 = vsel %vm1084_vm1, %v4316_v5, -inf }
 0x1ec   : > { %1107 = vmax.xlane.f32.xlu0 %v1106_v13  ;;  %v5351_v3 = vpop.f32.mrf.mxu1 }
 0x1ed   : > { %v1100_v16 = vsel %vm1084_vm1, %v5351_v3, -inf }
 0x1ee   : > { %1098 = vmax.xlane.f32.xlu1 %v1097_v15 }
 0x1f0   : > { %1101 = vmax.xlane.f32.xlu0 %v1100_v16 }
 0x251   : > { %v5359_v4 = vpop.f32.mrf.mxu0 }
 0x252   : > { %v1377_v18 = vsel %vm1084_vm1, %v5359_v4, -inf }
 0x253   : > { %v5363_v19 = vpop.f32.mrf.mxu0  ;;  %1378 = vmax.xlane.f32.xlu1 %v1377_v18 }
 0x254   : > { %v1371_v22 = vsel %vm1084_vm1, %v5363_v19, -inf }
 0x255   : > { %v5365_v21 = vpop.f32.mrf.mxu0 }
 0x256   : > { %v1380_v25 = vsel %vm1084_vm1, %v5365_v21, -inf }
 0x257   : > { %v5371_v27 = vpop.f32.mrf.mxu0  ;;  %1372 = vmax.xlane.f32.xlu1 %v1371_v22  ;;  %1381 = vmax.xlane.f32.xlu0 %v1380_v25 }
 0x258   : > { %v1374_v32 = vsel %vm1084_vm1, %v5371_v27, -inf }
 0x259   : > { %v5375_v29 = vpop.f32.mrf.mxu0 }
 0x25a   : > { %v1389_v30 = vsel %vm1084_vm1, %v5375_v29, -inf }
 0x25b   : > { %v5381_v33 = vpop.f32.mrf.mxu0  ;;  %1390 = vmax.xlane.f32.xlu1 %v1389_v30  ;;  %1375 = vmax.xlane.f32.xlu0 %v1374_v32 }
 0x25c   : > { %v1383_v39 = vsel %vm1084_vm1, %v5381_v33, -inf }
 0x25d   : > { %v5383_v36 = vpop.f32.mrf.mxu0 }
 0x25e   : > { %v1392_v40 = vsel %vm1084_vm1, %v5383_v36, -inf }
 0x25f   : > { %v5391_v45 = vpop.f32.mrf.mxu0  ;;  %1384 = vmax.xlane.f32.xlu1 %v1383_v39  ;;  %1393 = vmax.xlane.f32.xlu0 %v1392_v40 }
 0x260   : > { %v1386_v47 = vsel %vm1084_vm1, %v5391_v45, -inf }
 0x263   : > { %1387 = vmax.xlane.f32.xlu0 %v1386_v47 }
 0x269   : > { %v1093_v53 = vpop.xlane.xlu0 %1092 }
 0x26d   : > { %v1087_v7 = vpop.xlane.xlu0 %1086 }
 0x26e   : > { %v1109_v31 = vsub.f32 %v5338_v0, %v1087_v7 }
 0x26f   : > { %v1090_v9 = vpop.xlane.xlu1 %1089 }
 0x270   : > { %v1110_v35 = vsub.f32 %v1056_v8, %v1090_v9  ;;  %v1117_v34 = vmul.f32 1.442695, %v1109_v31 }
 0x271   : > { %v5401_v12 = vpop.f32.mrf.mxu0  ;;  %v1096_v13 = vpop.xlane.xlu0 %1095 }
 0x272   : > { %v1112_v15 = vsub.f32 %v4312_v1, %v1096_v13  ;;  %v1671_v16 = vsel %vm1084_vm1, %v5401_v12, -inf  ;;  %v1119_v25 = vmul.f32 1.442695, %v1110_v35 }
 0x273   : > { %v5405_v18 = vpop.f32.mrf.mxu0  ;;  %1672 = vmax.xlane.f32.xlu1 %v1671_v16 }
 0x274   : > { %v1123_v22 = vmul.f32 1.442695, %v1112_v15  ;;  %v1665_v8 = vsel %vm1084_vm1, %v5405_v18, -inf }
 0x275   : > { %v5407_v30 = vpop.f32.mrf.mxu0  ;;  %v1108_v32 = vpop.xlane.xlu0 %1107 }
 0x276   : > { %4650 = vpow2.f32 %v1123_v22  ;;  %v1116_v39 = vsub.f32 %v4316_v5, %v1108_v32  ;;  %v1674_v40 = vsel %vm1084_vm1, %v5407_v30, -inf }
 0x277   : > { %v5413_v1 = vpop.f32.mrf.mxu0  ;;  %1666 = vmax.xlane.f32.xlu1 %v1665_v8  ;;  %1675 = vmax.xlane.f32.xlu0 %v1674_v40  ;;  %4652 = vpow2.f32 %v1119_v25 }
 0x278   : > { %v1131_v35 = vmul.f32 1.442695, %v1116_v39  ;;  %v1668_v5 = vsel %vm1084_vm1, %v5413_v1, -inf }
 0x279   : > { %v5415_v47 = vpop.f32.mrf.mxu0  ;;  %v1102_v9 = vpop.xlane.xlu0 %1101 }
 0x27a   : > { %v1114_v13 = vsub.f32 %v5351_v3, %v1102_v9  ;;  %4654 = vpow2.f32 %v1131_v35 }
 0x27b   : > { %v5420_v15 = vpop.f32.mrf.mxu0  ;;  %1669 = vmax.xlane.f32.xlu0 %v1668_v5 }
 0x27c   : > { %v1127_v22 = vmul.f32 1.442695, %v1114_v13 }
 0x27d   : > { %v5422_v16 = vpop.f32.mrf.mxu0 }
 0x27e   : > { %v1686_v32 = vsel %vm1084_vm1, %v5422_v16, -inf  ;;  %4656 = vpow2.f32 %v1127_v22 }
 0x27f   : > { %v5426_v8 = vpop.f32.mrf.mxu0  ;;  %1687 = vmax.xlane.f32.xlu0 %v1686_v32  ;;  %v1111_v32 = vsub.f32 %v5334_v61, %v1093_v53  ;;  %v1677_v61 = vsel %vm1084_vm1, %v5420_v15, -inf }
 0x280   : > { %v1680_v3 = vsel %vm1084_vm1, %v5426_v8, -inf }
 0x283   : > { %v5430_v25 = vpop.eup %4650  ;;  %1681 = vmax.xlane.f32.xlu0 %v1680_v3  ;;  %v1105_v3 = vpop.xlane.xlu1 %1104 }
 0x284   : > { %v1142_v39 = vsel %vm1084_vm1, %v5430_v25, 0.0  ;;  %v5434_v40 = vpop.eup %4652 }
 0x285   : > { %v1136_v9 = vsel %vm1084_vm1, %v5434_v40, 0.0 }
 0x287   : > { %1143 = vadd.xlane.f32.xlu0 %v1142_v39  ;;  %v5440_v35 = vpop.eup %4654  ;;  %v1121_v39 = vmul.f32 1.442695, %v1111_v32  ;;  %v1099_v20 = vpop.xlane.xlu1 %1098 }
 0x288   : > { %1759 = vrot.lane.b32.xlu1 %v5243_v26, %s4917_s18  ;;  %v1154_v13 = vsel %vm1084_vm1, %v5440_v35, 0.0  ;;  %v1113_v55 = vsub.f32 %v5346_v11, %v1099_v20 }
 0x289   : > { %4658 = vpow2.f32 %v1121_v39 }
 0x28a   : > { %4660 = vpow2.f32 %v1117_v34 }
 0x28b   : > { %1137 = vadd.xlane.f32.xlu0 %v1136_v9  ;;  %v5444_v5 = vpop.eup %4656  ;;  %v1115_v9 = vsub.f32 %v5343_v10, %v1105_v3 }
 0x28c   : > { %v1148_v22 = vsel %vm1084_vm1, %v5444_v5, 0.0 }
 0x28d   : > { %v1129_v24 = vmul.f32 1.442695, %v1115_v9 }
 0x28f   : > { %1155 = vadd.xlane.f32.xlu0 %v1154_v13  ;;  %4662 = vpow2.f32 %v1129_v24  ;;  %v1125_v13 = vmul.f32 1.442695, %v1113_v55 }
 0x291   : > { %4664 = vpow2.f32 %v1125_v13 }
 0x293   : > { %1149 = vadd.xlane.f32.xlu0 %v1148_v22  ;;  %v1683_v22 = vsel %vm1084_vm1, %v5415_v47, -inf }
 0x296   : > { %v5456_v0 = vpop.eup %4658 }
 0x297   : > { %v1139_v31 = vsel %vm1084_vm1, %v5456_v0, 0.0  ;;  %v5460_v34 = vpop.eup %4660 }
 0x298   : > { %v1133_v20 = vsel %vm1084_vm1, %v5460_v34, 0.0 }
 0x29c   : > { %v5464_v24 = vpop.eup %4662 }
 0x29d   : > { %v1151_v55 = vsel %vm1084_vm1, %v5464_v24, 0.0 }
 0x29e   : > { %v5468_v10 = vpop.eup %4664 }
 0x29f   : > { %v1145_v11 = vsel %vm1084_vm1, %v5468_v10, 0.0 }
 0x2ac   : > { %1684 = vmax.xlane.f32.xlu1 %v1683_v22 }
 0x2b0   : > { %1678 = vmax.xlane.f32.xlu1 %v1677_v61 }
 0x2b4   : > { %1140 = vadd.xlane.f32.xlu1 %v1139_v31 }
 0x2b8   : > { %1134 = vadd.xlane.f32.xlu1 %v1133_v20 }
 0x2bc   : > { %1152 = vadd.xlane.f32.xlu1 %v1151_v55 }
 0x2c0   : > { %1146 = vadd.xlane.f32.xlu1 %v1145_v11 }
 0x2dc   : > { %v1379_v53 = vpop.xlane.xlu1 %1378 }
 0x2dd   : > { %v1397_v7 = vsub.f32 %v5359_v4, %v1379_v53 }
 0x2df   : > { %v1407_v32 = vmul.f32 1.442695, %v1397_v7 }
 0x2e0   : > { %v1373_v3 = vpop.xlane.xlu1 %1372  ;;  %v1382_v39 = vpop.xlane.xlu0 %1381 }
 0x2e1   : > { %4666 = vpow2.f32 %v1407_v32  ;;  %v1395_v9 = vsub.f32 %v5363_v19, %v1373_v3  ;;  %v1398_v13 = vsub.f32 %v5365_v21, %v1382_v39 }
 0x2e3   : > { %v1403_v22 = vmul.f32 1.442695, %v1395_v9  ;;  %v1409_v61 = vmul.f32 1.442695, %v1398_v13 }
 0x2e4   : > { %v1391_v31 = vpop.xlane.xlu1 %1390  ;;  %v1376_v20 = vpop.xlane.xlu0 %1375 }
 0x2e5   : > { %4668 = vpow2.f32 %v1403_v22  ;;  %v1401_v55 = vsub.f32 %v5375_v29, %v1391_v31  ;;  %v1396_v11 = vsub.f32 %v5371_v27, %v1376_v20 }
 0x2e6   : > { %4670 = vpow2.f32 %v1409_v61 }
 0x2e7   : > { %v1415_v52 = vmul.f32 1.442695, %v1401_v55  ;;  %v1405_v4 = vmul.f32 1.442695, %v1396_v11 }
 0x2e8   : > { %v1385_v53 = vpop.xlane.xlu1 %1384  ;;  %v1394_v7 = vpop.xlane.xlu0 %1393 }
 0x2e9   : > { %4672 = vpow2.f32 %v1415_v52  ;;  %v1399_v32 = vsub.f32 %v5381_v33, %v1385_v53  ;;  %v1402_v19 = vsub.f32 %v5383_v36, %v1394_v7 }
 0x2ea   : > { %4674 = vpow2.f32 %v1405_v4 }
 0x2eb   : > { %v1411_v21 = vmul.f32 1.442695, %v1399_v32  ;;  %v1417_v3 = vmul.f32 1.442695, %v1402_v19 }
 0x2ec   : > { %v1388_v39 = vpop.xlane.xlu0 %1387 }
 0x2ed   : > { %4676 = vpow2.f32 %v1411_v21  ;;  %v1400_v9 = vsub.f32 %v5391_v45, %v1388_v39 }
 0x2ee   : > { %v5480_v29 = vpop.eup %4666  ;;  %4678 = vpow2.f32 %v1417_v3 }
 0x2ef   : > { %v1413_v27 = vmul.f32 1.442695, %v1400_v9  ;;  %v1425_v13 = vsel %vm1084_vm1, %v5480_v29, 0.0 }
 0x2f0   : > { %1426 = vadd.xlane.f32.xlu1 %v1425_v13 }
 0x2f1   : > { %4680 = vpow2.f32 %v1413_v27 }
 0x2f2   : > { %v5484_v52 = vpop.eup %4668 }
 0x2f3   : > { %v5486_v33 = vpop.eup %4670  ;;  %v1419_v36 = vsel %vm1084_vm1, %v5484_v52, 0.0 }
 0x2f4   : > { %1420 = vadd.xlane.f32.xlu1 %v1419_v36  ;;  %v1428_v45 = vsel %vm1084_vm1, %v5486_v33, 0.0 }
 0x2f5   : > { %1429 = vadd.xlane.f32.xlu0 %v1428_v45 }
 0x2f6   : > { %v5492_v22 = vpop.eup %4672 }
 0x2f7   : > { %v5494_v61 = vpop.eup %4674  ;;  %v1437_v31 = vsel %vm1084_vm1, %v5492_v22, 0.0 }
 0x2f8   : > { %1438 = vadd.xlane.f32.xlu1 %v1437_v31  ;;  %v1422_v20 = vsel %vm1084_vm1, %v5494_v61, 0.0 }
 0x2f9   : > { %1423 = vadd.xlane.f32.xlu0 %v1422_v20 }
 0x2fa   : > { %v5500_v55 = vpop.eup %4676 }
 0x2fb   : > { %v5502_v11 = vpop.eup %4678  ;;  %v1431_v4 = vsel %vm1084_vm1, %v5500_v55, 0.0 }
 0x2fc   : > { %1432 = vadd.xlane.f32.xlu1 %v1431_v4  ;;  %v1673_v53 = vpop.xlane.xlu1 %1672  ;;  %v1440_v7 = vsel %vm1084_vm1, %v5502_v11, 0.0 }
 0x2fd   : > { %v1691_v32 = vsub.f32 %v5401_v12, %v1673_v53  ;;  %1441 = vadd.xlane.f32.xlu0 %v1440_v7 }
 0x2fe   : > { %v5509_v19 = vpop.eup %4680 }
 0x2ff   : > { %v1701_v21 = vmul.f32 1.442695, %v1691_v32  ;;  %v1434_v3 = vsel %vm1084_vm1, %v5509_v19, 0.0 }
 0x300   : > { %v1667_v39 = vpop.xlane.xlu1 %1666  ;;  %v1676_v9 = vpop.xlane.xlu0 %1675 }
 0x301   : > { %4682 = vpow2.f32 %v1701_v21  ;;  %v1689_v27 = vsub.f32 %v5405_v18, %v1667_v39  ;;  %1435 = vadd.xlane.f32.xlu0 %v1434_v3  ;;  %v1692_v13 = vsub.f32 %v5407_v30, %v1676_v9 }
 0x303   : > { %v1697_v36 = vmul.f32 1.442695, %v1689_v27  ;;  %v1703_v45 = vmul.f32 1.442695, %v1692_v13 }
 0x304   : > { %v1670_v31 = vpop.xlane.xlu0 %1669  ;;  %v5536_v3 = vpop.permute.xlu1 %1759 }
 0x305   : > { %4684 = vpow2.f32 %v1697_v36  ;;  %v1690_v12 = vsub.f32 %v5413_v1, %v1670_v31 }
 0x306   : > { %4686 = vpow2.f32 %v1703_v45 }
 0x307   : > { %v1699_v20 = vmul.f32 1.442695, %v1690_v12 }
 0x308   : > { %v1688_v21 = vpop.xlane.xlu0 %1687 }
 0x309   : > { %4688 = vpow2.f32 %v1699_v20  ;;  %v1696_v9 = vsub.f32 %v5422_v16, %v1688_v21 }
 0x30b   : > { %v1711_v13 = vmul.f32 1.442695, %v1696_v9 }
 0x30d   : > { %1864 = vrot.lane.b32.xlu1 %v5155_v58, %s4918_s23  ;;  %4690 = vpow2.f32 %v1711_v13 }
 0x30e   : > { %v5518_v4 = vpop.eup %4682 }
 0x30f   : > { %v1719_v18 = vsel %vm1084_vm1, %v5518_v4, 0.0 }
 0x310   : > { %1720 = vadd.xlane.f32.xlu0 %v1719_v18 }
 0x311   : > { %1862 = vrot.lane.b32.xlu1 %v5160_v60, %s4918_s23  ;;  %v1682_v60 = vpop.xlane.xlu0 %1681 }
 0x312   : > { %v5524_v30 = vpop.eup %4684  ;;  %v1694_v20 = vsub.f32 %v5426_v8, %v1682_v60 }
 0x313   : > { %v1713_v1 = vsel %vm1084_vm1, %v5524_v30, 0.0  ;;  %v5528_v53 = vpop.eup %4686 }
 0x314   : > { %1714 = vadd.xlane.f32.xlu0 %v1713_v1  ;;  %v1722_v58 = vsel %vm1084_vm1, %v5528_v53, 0.0  ;;  %v1707_v59 = vmul.f32 1.442695, %v1694_v20 }
 0x315   : > { %v1144_v39 = vpop.xlane.xlu0 %1143 }
 0x316   : > { %v5532_v7 = vpop.eup %4688 }
 0x317   : > { %v1716_v32 = vsel %vm1084_vm1, %v5532_v7, 0.0 }
 0x318   : > { %1723 = vadd.xlane.f32.xlu0 %v1722_v58 }
 0x319   : > { %v1138_v45 = vpop.xlane.xlu0 %1137 }
 0x31a   : > { %4692 = vrcp.f32 %v1138_v45 }
 0x31c   : > { %1717 = vadd.xlane.f32.xlu0 %v1716_v32 }
 0x31d   : > { %v1156_v32 = vpop.xlane.xlu0 %1155 }
 0x332   : > { %1757 = vrot.lane.b32.xlu0 %v5262_v43, %s4917_s18 }
 0x335   : > { %v1685_v27 = vpop.xlane.xlu1 %1684 }
 0x336   : > { %v1695_v36 = vsub.f32 %v5415_v47, %v1685_v27  ;;  %v1150_v47 = vpop.xlane.xlu0 %1149 }
 0x338   : > { %v1709_v18 = vmul.f32 1.442695, %v1695_v36 }
 0x339   : > { %v1679_v31 = vpop.xlane.xlu1 %1678 }
 0x33a   : > { %v1693_v12 = vsub.f32 %v5420_v15, %v1679_v31  ;;  %v5544_v15 = vpop.eup %4690 }
 0x33b   : > { %v4693_v60 = vpop.eup %4692 }
 0x33c   : > { %v1705_v1 = vmul.f32 1.442695, %v1693_v12  ;;  %v1734_v12 = vsel %vm1084_vm1, %v5544_v15, 0.0 }
 0x33d   : > { %v1141_v58 = vpop.xlane.xlu1 %1140 }
 0x33e   : > { %4694 = vpow2.f32 %v1705_v1 }
 0x33f   : > { %4696 = vrcp.f32 %v1141_v58 }
 0x340   : > { %4698 = vpow2.f32 %v1709_v18  ;;  %v5563_v18 = vmul.f32 %v4693_v60, %v5434_v40 }
 0x341   : > { %4700 = vrcp.f32 %v1144_v39  ;;  %v1135_v16 = vpop.xlane.xlu1 %1134 }
 0x342   : > { %4702 = vrcp.f32 %v1135_v16  ;;  %6825 = vst [vmem:[#allocation11_spill] sm:$0xff] %v5563_v18 }
 0x343   : > { %4704 = vpow2.f32 %v1707_v59 }
 0x345   : > { %v1153_v21 = vpop.xlane.xlu1 %1152 }
 0x346   : > { %4706 = vrcp.f32 %v1153_v21 }
 0x347   : > { %4708 = vrcp.f32 %v1150_v47 }
 0x348   : > { %4710 = vrcp.f32 %v1156_v32 }
 0x349   : > { %v1147_v8 = vpop.xlane.xlu1 %1146 }
 0x34a   : > { %4712 = vrcp.f32 %v1147_v8 }
 0x34b   : > { %v5546_v9 = vpop.eup %4694 }
 0x34c   : > { %v4697_v27 = vpop.eup %4696  ;;  %v1725_v13 = vsel %vm1084_vm1, %v5546_v9, 0.0 }
 0x34d   : > { %v5550_v39 = vpop.eup %4698  ;;  %1726 = vadd.xlane.f32.xlu1 %v1725_v13  ;;  %v5553_v45 = vmul.f32 %v4697_v27, %v5456_v0 }
 0x34e   : > { %v4701_v59 = vpop.eup %4700  ;;  %v1731_v31 = vsel %vm1084_vm1, %v5550_v39, 0.0 }
 0x34f   : > { %v4703_v36 = vpop.eup %4702  ;;  %6823 = vst [vmem:[#allocation9_spill] sm:$0xff] %v5553_v45  ;;  %v5568_v58 = vmul.f32 %v4701_v59, %v5430_v25 }
 0x350   : > { %v5560_v20 = vmul.f32 %v4703_v36, %v5460_v34  ;;  %v5565_v1 = vpop.eup %4704 }
 0x351   : > { %6826 = vst [vmem:[#allocation12_spill] sm:$0xff] %v5568_v58  ;;  %1732 = vadd.xlane.f32.xlu0 %v1731_v31  ;;  %1735 = vadd.xlane.f32.xlu1 %v1734_v12  ;;  %v1174_v32 = vpack.c.bf16 %v5568_v58, %v5553_v45  ;;  %v1728_v40 = vsel %vm1084_vm1, %v5565_v1, 0.0 }
 0x352   : > { %6824 = vst [vmem:[#allocation10_spill] sm:$0xff] %v5560_v20  ;;  %v1173_v0 = vpack.c.bf16 %v5563_v18, %v5560_v20 }
 0x353   : > { %v4707_v16 = vpop.eup %4706 }
 0x354   : > { %4325 = vmatprep.mubr.msk.bf16.mxu1 %vm1084_vm1, %v1173_v0  ;;  %v4709_v34 = vpop.eup %4708  ;;  %v5581_v21 = vmul.f32 %v4707_v16, %v5464_v24 }
 0x355   : > { %1729 = vadd.xlane.f32.xlu0 %v1728_v40  ;;  %4326 = vmatmul.mubr.msk.bf16.vlgmr.msra.gmra.mxu1 %vm1084_vm1, %v1174_v32  ;;  %v4711_v25 = vpop.eup %4710  ;;  %v5587_v60 = vmul.f32 %v4709_v34, %v5444_v5 }
 0x356   : > { %4350 = vmatpush3.bf16.msra.mxu1 %v5329_v57  ;;  %6827 = vst [vmem:[#allocation13_spill] sm:$0xff] %v5581_v21  ;;  %v5590_v27 = vmul.f32 %v4711_v25, %v5440_v35 }
 0x357   : > { %v4713_v47 = vpop.eup %4712  ;;  %4351 = vmatprep.subr.bf16.mxu1 %v5373_v28  ;;  %6829 = vst [vmem:[#allocation15_spill] sm:$0xff] %v5587_v60 }
 0x358   : > { %v5584_v8 = vmul.f32 %v4713_v47, %v5468_v10  ;;  %6830 = vst [vmem:[#allocation16_spill] sm:$0xff] %v5590_v27  ;;  %v1176_v24 = vpack.c.bf16 %v5590_v27, %v5581_v21 }
 0x35a   : > { %6828 = vst [vmem:[#allocation14_spill] sm:$0xff] %v5584_v8  ;;  %4352 = vmatpush3.bf16.msra.mxu1 %v5373_v28  ;;  %v1175_v57 = vpack.c.bf16 %v5587_v60, %v5584_v8 }
 0x35b   : > { %4353 = vmatprep.subr.bf16.mxu1 %v5395_v50 }
 0x35c   : > { %4329 = vmatprep.mubr.msk.bf16.mxu1 %vm1084_vm1, %v1175_v57 }
 0x35d   : > { %4330 = vmatmul.mubr.msk.bf16.gmra.mxu1 %vm1084_vm1, %v1176_v24 }
 0x35e   : > { %4354 = vmatpush3.bf16.msra.mxu1 %v5395_v50 }
 0x35f   : > { %4355 = vmatprep.subr.bf16.mxu1 %v5385_v38 }
 0x362   : > { %4356 = vmatpush3.bf16.msra.mxu1 %v5385_v38  ;;  %1858 = vrot.lane.b32.xlu1 %v5144_v46, %s4918_s23 }
 0x363   : > { %4381 = vmatprep.subr.bf16.mxu1 %v5397_v51 }
 0x366   : > { %1852 = vrot.lane.b32.xlu1 %v5192_v6, %s4918_s23 }
 0x36a   : > { %1856 = vrot.lane.b32.xlu1 %v5216_v17, %s4918_s23 }
 0x36b   : > { %1860 = vrot.lane.b32.xlu0 %v5138_v41, %s4918_s23 }
 0x36f   : > { %1850 = vrot.lane.b32.xlu0 %v5117_v23, %s4918_s23 }
 0x373   : > { %1854 = vrot.lane.b32.xlu0 %v5189_v14, %s4918_s23 }
 0x379   : > { %v1427_v28 = vpop.xlane.xlu1 %1426 }
 0x37d   : > { %v1421_v38 = vpop.xlane.xlu1 %1420 }
 0x37e   : > { %v1430_v46 = vpop.xlane.xlu0 %1429 }
 0x37f   : > { %4714 = vrcp.f32 %v1430_v46 }
 0x380   : > { %4716 = vrcp.f32 %v1421_v38 }
 0x381   : > { %v1439_v50 = vpop.xlane.xlu1 %1438  ;;  %4718 = vrcp.f32 %v1427_v28 }
 0x382   : > { %v1424_v6 = vpop.xlane.xlu0 %1423 }
 0x383   : > { %4720 = vrcp.f32 %v1424_v6 }
 0x385   : > { %v1433_v35 = vpop.xlane.xlu1 %1432 }
 0x386   : > { %v1442_v17 = vpop.xlane.xlu0 %1441 }
 0x387   : > { %4722 = vrcp.f32 %v1442_v17 }
 0x388   : > { %4724 = vrcp.f32 %v1433_v35 }
 0x389   : > { %4726 = vrcp.f32 %v1439_v50  ;;  %v1865_v47 = vpop.permute.xlu1 %1864 }
 0x38a   : > { %v1436_v41 = vpop.xlane.xlu0 %1435 }
 0x38b   : > { %4728 = vrcp.f32 %v1436_v41 }
 0x38c   : > { %v4715_v23 = vpop.eup %4714 }
 0x38d   : > { %v4717_v5 = vpop.eup %4716  ;;  %v5617_v13 = vmul.f32 %v4715_v23, %v5486_v33 }
 0x38e   : > { %v4719_v10 = vpop.eup %4718  ;;  %v5620_v59 = vmul.f32 %v4717_v5, %v5484_v52 }
 0x38f   : > { %6831 = vst [vmem:[#allocation17_spill] sm:$0xff] %v5617_v13  ;;  %v5626_v31 = vmul.f32 %v4719_v10, %v5480_v29 }
 0x390   : > { %v4721_v14 = vpop.eup %4720  ;;  %6832 = vst [vmem:[#allocation18_spill] sm:$0xff] %v5620_v59 }
 0x391   : > { %v5623_v36 = vmul.f32 %v4721_v14, %v5494_v61  ;;  %6834 = vst [vmem:[#allocation20_spill] sm:$0xff] %v5626_v31  ;;  %v1460_v0 = vpack.c.bf16 %v5617_v13, %v5626_v31 }
 0x393   : > { %6833 = vst [vmem:[#allocation19_spill] sm:$0xff] %v5623_v36  ;;  %v1459_v12 = vpack.c.bf16 %v5623_v36, %v5620_v59 }
 0x394   : > { %v4723_v32 = vpop.eup %4722 }
 0x395   : > { %4357 = vmatprep.mubr.msk.bf16.mxu1 %vm1084_vm1, %v1459_v12  ;;  %v4725_v33 = vpop.eup %4724  ;;  %v5637_v29 = vmul.f32 %v4723_v32, %v5502_v11 }
 0x396   : > { %4358 = vmatmul.mubr.msk.bf16.vlgmr.msra.gmra.mxu1 %vm1084_vm1, %v1460_v0  ;;  %v4727_v52 = vpop.eup %4726  ;;  %v5640_v40 = vmul.f32 %v4725_v33, %v5500_v55 }
 0x397   : > { %4382 = vmatpush3.bf16.msra.mxu1 %v5397_v51  ;;  %6835 = vst [vmem:[#allocation21_spill] sm:$0xff] %v5637_v29  ;;  %v5646_v25 = vmul.f32 %v4727_v52, %v5492_v22 }
 0x398   : > { %v4729_v61 = vpop.eup %4728  ;;  %4383 = vmatprep.subr.bf16.mxu1 %v5399_v63  ;;  %6836 = vst [vmem:[#allocation22_spill] sm:$0xff] %v5640_v40 }
 0x399   : > { %v1721_v16 = vpop.xlane.xlu0 %1720  ;;  %v5643_v34 = vmul.f32 %v4729_v61, %v5509_v19  ;;  %6838 = vst [vmem:[#allocation24_spill] sm:$0xff] %v5646_v25  ;;  %v1462_v11 = vpack.c.bf16 %v5637_v29, %v5646_v25 }
 0x39b   : > { %6837 = vst [vmem:[#allocation23_spill] sm:$0xff] %v5643_v34  ;;  %4384 = vmatpush3.bf16.msra.mxu1 %v5399_v63  ;;  %v1461_v51 = vpack.c.bf16 %v5643_v34, %v5640_v40 }
 0x39c   : > { %4385 = vmatprep.subr.bf16.mxu1 %v5536_v3 }
 0x39d   : > { %4361 = vmatprep.mubr.msk.bf16.mxu1 %vm1084_vm1, %v1461_v51  ;;  %v1715_v55 = vpop.xlane.xlu0 %1714 }
 0x39e   : > { %4362 = vmatmul.mubr.msk.bf16.gmra.mxu1 %vm1084_vm1, %v1462_v11 }
 0x39f   : > { %4386 = vmatpush3.bf16.msra.mxu1 %v5536_v3 }
 0x3a1   : > { %v1724_v19 = vpop.xlane.xlu0 %1723 }
 0x3a2   : > { %4730 = vrcp.f32 %v1724_v19 }
 0x3a3   : > { %4732 = vrcp.f32 %v1715_v55 }
 0x3a4   : > { %4734 = vrcp.f32 %v1721_v16 }
 0x3a5   : > { %v1718_v63 = vpop.xlane.xlu0 %1717 }
 0x3a6   : > { %4736 = vrcp.f32 %v1718_v63 }
 0x3a9   : > { %v1758_v22 = vpop.permute.xlu0 %1757 }
 0x3aa   : > { %4387 = vmatprep.subr.bf16.mxu1 %v1758_v22 }
 0x3ab   : > { %4388 = vmatpush3.bf16.msra.mxu1 %v1758_v22 }
 0x3ac   : > { %4605 = vmatprep.subr.msk.bf16.mxu1 %vm573_vm0, %v1865_v47 }
 0x3af   : > { %v4731_v57 = vpop.eup %4730 }
 0x3b0   : > { %v4733_v24 = vpop.eup %4732  ;;  %v5659_v46 = vmul.f32 %v4731_v57, %v5528_v53  ;;  %v1888_v53 = vsel %vm573_vm0, %v1865_v47, 0 }
 0x3b1   : > { %v4735_v28 = vpop.eup %4734  ;;  %v5662_v3 = vmul.f32 %v4733_v24, %v5524_v30  ;;  %v1863_v30 = vpop.permute.xlu1 %1862 }
 0x3b2   : > { %6839 = vst [vmem:[#allocation25_spill] sm:$0xff] %v5659_v46  ;;  %v5668_v6 = vmul.f32 %v4735_v28, %v5518_v4 }
 0x3b3   : > { %v4737_v38 = vpop.eup %4736  ;;  %6840 = vst [vmem:[#allocation26_spill] sm:$0xff] %v5662_v3 }
 0x3b4   : > { %v5665_v50 = vmul.f32 %v4737_v38, %v5532_v7  ;;  %6842 = vst [vmem:[#allocation28_spill] sm:$0xff] %v5668_v6  ;;  %v1754_v17 = vpack.c.bf16 %v5659_v46, %v5668_v6  ;;  %v1885_v7 = vsel %vm573_vm0, %v1863_v30, 0 }
 0x3b6   : > { %6841 = vst [vmem:[#allocation27_spill] sm:$0xff] %v5665_v50  ;;  %v1753_v35 = vpack.c.bf16 %v5665_v50, %v5662_v3 }
 0x3b8   : > { %4389 = vmatprep.mubr.msk.bf16.mxu1 %vm1084_vm1, %v1753_v35 }
 0x3b9   : > { %4390 = vmatmul.mubr.msk.bf16.vlgmr.msra.gmra.mxu1 %vm1084_vm1, %v1754_v17 }
 0x3ba   : > { %4398 = vmatpush3.bf16.xpose.msra.mxu1 %v1888_v53 }
 0x3bb   : > { %4606 = vmatprep.subr.msk.bf16.mxu1 %vm573_vm0, %v1863_v30 }
 0x3c2   : > { %4400 = vmatpush3.bf16.xpose.msra.mxu1 %v1885_v7 }
 0x3d6   : > { %v1727_v4 = vpop.xlane.xlu1 %1726 }
 0x3da   : > { %v1736_v41 = vpop.xlane.xlu1 %1735  ;;  %v1733_v23 = vpop.xlane.xlu0 %1732 }
 0x3db   : > { %4738 = vrcp.f32 %v1736_v41 }
 0x3dc   : > { %4740 = vrcp.f32 %v1733_v23 }
 0x3dd   : > { %4742 = vrcp.f32 %v1727_v4 }
 0x3de   : > { %v1730_v5 = vpop.xlane.xlu0 %1729  ;;  %v1859_v12 = vpop.permute.xlu1 %1858 }
 0x3df   : > { %4744 = vrcp.f32 %v1730_v5  ;;  %v1879_v52 = vsel %vm573_vm0, %v1859_v12, 0 }
 0x3e2   : > { %v1861_v10 = vpop.permute.xlu0 %1860  ;;  %v1853_v22 = vpop.permute.xlu1 %1852 }
 0x3e3   : > { %4607 = vmatprep.subr.msk.bf16.mxu1 %vm573_vm0, %v1861_v10  ;;  %v1882_v14 = vsel %vm573_vm0, %v1861_v10, 0 }
 0x3e4   : > { %4402 = vmatpush3.bf16.xpose.msra.mxu1 %v1882_v14 }
 0x3e5   : > { %4608 = vmatprep.subr.msk.bf16.mxu1 %vm573_vm0, %v1859_v12 }
 0x3e6   : > { %v1857_v24 = vpop.permute.xlu1 %1856 }
 0x3e8   : > { %v4739_v0 = vpop.eup %4738 }
 0x3e9   : > { %v4741_v32 = vpop.eup %4740  ;;  %v5687_v51 = vmul.f32 %v4739_v0, %v5544_v15  ;;  %v4906_v15 = vld [vmem:[%s6728_s8] ss:$0 sm:$0xff] }
 0x3ea   : > { %v4743_v33 = vpop.eup %4742  ;;  %v5684_v16 = vmul.f32 %v4741_v32, %v5550_v39  ;;  %v1851_v39 = vpop.permute.xlu0 %1850 }
 0x3eb   : > { %6844 = vst [vmem:[#allocation30_spill] sm:$0xff] %v5687_v51  ;;  %v5691_v11 = vmul.f32 %v4743_v33, %v5546_v9  ;;  %v969_v9 = vadd.f32 %v4906_v15, %v5323_v49 }
 0x3ec   : > { %v4745_v61 = vpop.eup %4744  ;;  %4404 = vmatpush3.bf16.xpose.msra.mxu1 %v1879_v52  ;;  %6843 = vst [vmem:[#allocation29_spill] sm:$0xff] %v5684_v16  ;;  %v1756_v63 = vpack.c.bf16 %v5687_v51, %v5684_v16 }
 0x3ed   : > { %4445 = vmatprep.subr.bf16.mxu1 %v5327_v54  ;;  %6845 = vst [vmem:[#allocation31_spill] sm:$0xff] %v5691_v11  ;;  %v5694_v55 = vmul.f32 %v4745_v61, %v5565_v1  ;;  %v972_v1 = vadd.f32 %v4906_v15, %v5357_v2 }
 0x3ee   : > { %v1855_v57 = vpop.permute.xlu0 %1854 }
 0x3ef   : > { %6846 = vst [vmem:[#allocation32_spill] sm:$0xff] %v5694_v55  ;;  %v1755_v19 = vpack.c.bf16 %v5694_v55, %v5691_v11  ;;  %v5708_v47 = vpack.c.bf16 %v972_v1, %v969_v9 }
 0x3f1   : > { %4393 = vmatprep.mubr.msk.bf16.mxu1 %vm1084_vm1, %v1755_v19 }
 0x3f2   : > { %4394 = vmatmul.mubr.msk.bf16.gmra.mxu1 %vm1084_vm1, %v1756_v63 }
 0x3f3   : > { %4405 = vmatprep.mubr.msk.bf16.mxu1 %vm573_vm0, %v1851_v39 }
 0x3fa   : > { %4406 = vmatmul.mubr.msk.bf16.vlgmr.msra.gmra.mxu1 %vm573_vm0, %v1853_v22 }
 0x3fb   : > { %4446 = vmatpush3.bf16.msra.mxu1 %v5327_v54  ;;  %4409 = vmatprep.mubr.msk.bf16.mxu1 %vm573_vm0, %v1855_v57 }
 0x3fc   : > { %4447 = vmatprep.subr.bf16.mxu1 %v5708_v47 }
 0x3ff   : > { %4448 = vmatpush3.bf16.msra.mxu1 %v5708_v47 }
 0x400   : > { %4449 = vmatprep.subr.bf16.mxu1 %v5318_v44 }
 0x402   : > { %4410 = vmatmul.mubr.msk.bf16.gmra.mxu1 %vm573_vm0, %v1857_v24 }
 0x403   : > { %4450 = vmatpush3.bf16.msra.mxu1 %v5318_v44 }
 0x404   : > { %4451 = vmatprep.subr.bf16.mxu1 %v5321_v48 }
 0x407   : > { %4452 = vmatpush3.bf16.msra.mxu1 %v5321_v48 }
 0x415   : > { %v5720_v49 = vpop.f32.mrf.mxu1 }
 0x416   : > { %6847 = vst [vmem:[#allocation33_spill] sm:$0xff] %v5720_v49 }
 0x417   : > { %v5722_v2 = vpop.f32.mrf.mxu1 }
 0x418   : > { %6848 = vst [vmem:[#allocation34_spill] sm:$0xff] %v5722_v2 }
 0x419   : > { %v5724_v28 = vpop.f32.mrf.mxu1 }
 0x41a   : > { %6849 = vst [vmem:[#allocation35_spill] sm:$0xff] %v5724_v28 }
 0x41b   : > { %v5728_v35 = vpop.f32.mrf.mxu1 }
 0x41c   : > { %6850 = vst [vmem:[#allocation36_spill] sm:$0xff] %v5728_v35 }
 0x41d   : > { %v5732_v53 = vpop.f32.mrf.mxu1 }
 0x41e   : > { %6851 = vst [vmem:[#allocation37_spill] sm:$0xff] %v5732_v53 }
 0x41f   : > { %v5734_v30 = vpop.f32.mrf.mxu1 }
 0x420   : > { %6852 = vst [vmem:[#allocation38_spill] sm:$0xff] %v5734_v30 }
 0x421   : > { %v5736_v7 = vpop.f32.mrf.mxu1 }
 0x422   : > { %6853 = vst [vmem:[#allocation39_spill] sm:$0xff] %v5736_v7 }
 0x423   : > { %v5740_v41 = vpop.f32.mrf.mxu1 }
 0x424   : > { %6854 = vst [vmem:[#allocation40_spill] sm:$0xff] %v5740_v41 }
 0x456   : > { %v5744_v5 = vpop.f32.mrf.mxu1 }
 0x458   : > { %v5746_v10 = vpop.f32.mrf.mxu1 }
 0x45a   : > { %v5748_v14 = vpop.f32.mrf.mxu1 }
 0x45c   : > { %v5752_v0 = vpop.f32.mrf.mxu1 }
 0x45e   : > { %v5756_v33 = vpop.f32.mrf.mxu1 }
 0x460   : > { %v5758_v52 = vpop.f32.mrf.mxu1 }
 0x462   : > { %v5760_v61 = vpop.f32.mrf.mxu1 }
 0x464   : > { %v5764_v63 = vpop.f32.mrf.mxu1 }
 0x479   : > { %v5768_v15 = vpop.f32.mrf.mxu1 }
 0x47b   : > { %v5770_v9 = vpop.f32.mrf.mxu1 }
 0x47d   : > { %v5772_v1 = vpop.f32.mrf.mxu1 }
 0x47f   : > { %v5776_v57 = vpop.f32.mrf.mxu1 }
 0x4b2   : > { %v5780_v4 = vpop.f32.mrf.mxu1 }
 0x4b4   : > { %v5782_v23 = vpop.f32.mrf.mxu1 }
 0x4b6   : > { %v5784_v38 = vpop.f32.mrf.mxu1 }
 0x4b8   : > { %v5788_v19 = vpop.f32.mrf.mxu1 }
 0x4ba   : > { %v4407_v22 = vpop.f32.mrf.mxu1 }
 0x4bb   : > { %v1961_v39 = vsel %vm1084_vm1, %v4407_v22, -inf }
 0x4bc   : > { %1962 = vmax.xlane.f32.xlu0 %v1961_v39  ;;  %v1924_v32 = vpop.f32.mrf.mxu1 }
 0x4bd   : > { %v1955_v16 = vsel %vm1084_vm1, %v1924_v32, -inf }
 0x4be   : > { %v4408_v24 = vpop.f32.mrf.mxu1 }
 0x4bf   : > { %v1964_v17 = vsel %vm1084_vm1, %v4408_v24, -inf }
 0x4c0   : > { %1956 = vmax.xlane.f32.xlu0 %v1955_v16  ;;  %v1927_v51 = vpop.f32.mrf.mxu1 }
 0x4c1   : > { %v1958_v11 = vsel %vm1084_vm1, %v1927_v51, -inf }
 0x4c2   : > { %1959 = vmax.xlane.f32.xlu1 %v1958_v11  ;;  %v4411_v55 = vpop.f32.mrf.mxu1 }
 0x4c3   : > { %v1973_v12 = vsel %vm1084_vm1, %v4411_v55, -inf }
 0x4c4   : > { %1965 = vmax.xlane.f32.xlu0 %v1964_v17  ;;  %v5796_v6 = vpop.f32.mrf.mxu1 }
 0x4c5   : > { %v1967_v3 = vsel %vm1084_vm1, %v5796_v6, -inf }
 0x4c6   : > { %1974 = vmax.xlane.f32.xlu1 %v1973_v12  ;;  %v5799_v46 = vpop.f32.mrf.mxu1 }
 0x4c7   : > { %v1976_v39 = vsel %vm1084_vm1, %v5799_v46, -inf }
 0x4c8   : > { %1977 = vmax.xlane.f32.xlu0 %v1976_v39  ;;  %v1943_v16 = vpop.f32.mrf.mxu1 }
 0x4c9   : > { %v1970_v11 = vsel %vm1084_vm1, %v1943_v16, -inf }
 0x4ca   : > { %1968 = vmax.xlane.f32.xlu1 %v1967_v3 }
 0x4cc   : > { %1971 = vmax.xlane.f32.xlu0 %v1970_v11 }
 0x4db   : > { %2053 = vrot.lane.b32.xlu1 %v5250_v37, %s4918_s23 }
 0x4e2   : > { %2051 = vrot.lane.b32.xlu0 %v5255_v42, %s4918_s23 }
 0x545   : > { %v1963_v17 = vpop.xlane.xlu0 %1962 }
 0x546   : > { %v1981_v12 = vsub.f32 %v4407_v22, %v1963_v17 }
 0x548   : > { %v1991_v50 = vmul.f32 1.442695, %v1981_v12 }
 0x549   : > { %v1957_v21 = vpop.xlane.xlu0 %1956 }
 0x54a   : > { %4746 = vpow2.f32 %v1991_v50  ;;  %v1979_v39 = vsub.f32 %v1924_v32, %v1957_v21 }
 0x54b   : > { %v1960_v27 = vpop.xlane.xlu1 %1959 }
 0x54c   : > { %v1987_v8 = vmul.f32 1.442695, %v1979_v39  ;;  %v1980_v60 = vsub.f32 %v1927_v51, %v1960_v27 }
 0x54d   : > { %v1966_v45 = vpop.xlane.xlu0 %1965 }
 0x54e   : > { %4748 = vpow2.f32 %v1987_v8  ;;  %v1982_v3 = vsub.f32 %v4408_v24, %v1966_v45  ;;  %v1989_v11 = vmul.f32 1.442695, %v1980_v60 }
 0x54f   : > { %v1975_v58 = vpop.xlane.xlu1 %1974 }
 0x550   : > { %v1993_v20 = vmul.f32 1.442695, %v1982_v3  ;;  %v1985_v18 = vsub.f32 %v4411_v55, %v1975_v58 }
 0x551   : > { %v1978_v37 = vpop.xlane.xlu0 %1977 }
 0x552   : > { %4750 = vpow2.f32 %v1993_v20  ;;  %v1999_v42 = vmul.f32 1.442695, %v1985_v18  ;;  %v1986_v3 = vsub.f32 %v5799_v46, %v1978_v37 }
 0x553   : > { %v1969_v25 = vpop.xlane.xlu1 %1968  ;;  %4752 = vpow2.f32 %v1989_v11 }
 0x554   : > { %4754 = vpow2.f32 %v1999_v42  ;;  %v1983_v39 = vsub.f32 %v5796_v6, %v1969_v25  ;;  %v2001_v42 = vmul.f32 1.442695, %v1986_v3 }
 0x555   : > { %v1972_v22 = vpop.xlane.xlu0 %1971 }
 0x556   : > { %v1984_v17 = vsub.f32 %v1943_v16, %v1972_v22  ;;  %v1995_v11 = vmul.f32 1.442695, %v1983_v39 }
 0x557   : > { %v5810_v12 = vpop.eup %4746  ;;  %v2054_v21 = vpop.permute.xlu1 %2053 }
 0x558   : > { %v1997_v50 = vmul.f32 1.442695, %v1984_v17  ;;  %4413 = vmatprep.subr.bf16.mxu0 %v2054_v21  ;;  %v2009_v45 = vsel %vm1084_vm1, %v5810_v12, 0.0 }
 0x559   : > { %4414 = vmatpush3.bf16.msra.mxu0 %v2054_v21  ;;  %2010 = vadd.xlane.f32.xlu1 %v2009_v45  ;;  %v2052_v8 = vpop.permute.xlu0 %2051 }
 0x55a   : > { %4415 = vmatprep.subr.bf16.mxu0 %v2052_v8  ;;  %4756 = vpow2.f32 %v1997_v50 }
 0x55b   : > { %v4749_v58 = vpop.eup %4748  ;;  %4758 = vpow2.f32 %v1995_v11  ;;  %v4907_v11 = vld [vmem:[%s6726_s6] ss:$0 sm:$0xff] }
 0x55c   : > { %v2003_v20 = vsel %vm1084_vm1, %v4749_v58, 0.0  ;;  %4760 = vpow2.f32 %v2001_v42  ;;  %v825_v42 = vadd.f32 %v4907_v11, %v5285_v56  ;;  %v2339_v56 = vsel %vm573_vm0, %v5289_v62, 0 }
 0x55d   : > { %2004 = vadd.xlane.f32.xlu1 %v2003_v20  ;;  %4416 = vmatpush3.bf16.msra.mxu0 %v2052_v8 }
 0x55f   : > { %v4751_v18 = vpop.eup %4750 }
 0x560   : > { %v2012_v60 = vsel %vm1084_vm1, %v4751_v18, 0.0  ;;  %v4753_v27 = vpop.eup %4752 }
 0x561   : > { %2013 = vadd.xlane.f32.xlu0 %v2012_v60  ;;  %v2006_v51 = vsel %vm1084_vm1, %v4753_v27, 0.0  ;;  %v5817_v55 = vpop.eup %4754 }
 0x562   : > { %v2021_v32 = vsel %vm1084_vm1, %v5817_v55, 0.0 }
 0x565   : > { %2007 = vadd.xlane.f32.xlu0 %v2006_v51 }
 0x567   : > { %v5821_v24 = vpop.eup %4756 }
 0x568   : > { %v2018_v16 = vsel %vm1084_vm1, %v5821_v24, 0.0  ;;  %v4759_v22 = vpop.eup %4758 }
 0x569   : > { %2022 = vadd.xlane.f32.xlu0 %v2021_v32  ;;  %v2015_v17 = vsel %vm1084_vm1, %v4759_v22, 0.0  ;;  %v5832_v21 = vpop.eup %4760 }
 0x56d   : > { %2019 = vadd.xlane.f32.xlu0 %v2018_v16 }
 0x56e   : > { %2049 = vrot.lane.b32.xlu1 %v5243_v26, %s4918_s23  ;;  %v2024_v26 = vsel %vm1084_vm1, %v5832_v21, 0.0 }
 0x583   : > { %2047 = vrot.lane.b32.xlu0 %v5262_v43, %s4918_s23 }
 0x592   : > { %2016 = vadd.xlane.f32.xlu1 %v2015_v17  ;;  %v6858_v17 = vld [vmem:[#allocation8_spill] sm:$0xff] }
 0x596   : > { %2025 = vadd.xlane.f32.xlu1 %v2024_v26  ;;  %v828_v26 = vadd.f32 %v4907_v11, %v6858_v17 }
 0x5e2   : > { %v2011_v25 = vpop.xlane.xlu1 %2010 }
 0x5e6   : > { %v2005_v6 = vpop.xlane.xlu1 %2004 }
 0x5ea   : > { %v2050_v46 = vpop.permute.xlu1 %2049  ;;  %v2014_v37 = vpop.xlane.xlu0 %2013 }
 0x5eb   : > { %4417 = vmatprep.subr.bf16.mxu0 %v2050_v46  ;;  %4762 = vrcp.f32 %v2014_v37  ;;  %v6861_v37 = vld [vmem:[#allocation7_spill] sm:$0xff] }
 0x5ec   : > { %4418 = vmatpush3.bf16.msra.mxu0 %v2050_v46  ;;  %4764 = vrcp.f32 %v2005_v6  ;;  %v6860_v6 = vld [vmem:[#allocation6_spill] sm:$0xff] }
 0x5ed   : > { %4766 = vrcp.f32 %v2011_v25  ;;  %v2333_v46 = vsel %vm573_vm0, %v6860_v6, 0 }
 0x5ee   : > { %v2008_v43 = vpop.xlane.xlu0 %2007 }
 0x5ef   : > { %4768 = vrcp.f32 %v2008_v43  ;;  %v2330_v43 = vsel %vm573_vm0, %v6861_v37, 0 }
 0x5f2   : > { %v2023_v50 = vpop.xlane.xlu0 %2022 }
 0x5f6   : > { %v2020_v45 = vpop.xlane.xlu0 %2019 }
 0x5f7   : > { %4770 = vrcp.f32 %v2020_v45 }
 0x5f8   : > { %v4763_v8 = vpop.eup %4762 }
 0x5f9   : > { %v4765_v20 = vpop.eup %4764  ;;  %v5836_v16 = vmul.f32 %v4763_v8, %v4751_v18 }
 0x5fa   : > { %v2048_v60 = vpop.permute.xlu0 %2047  ;;  %v4767_v51 = vpop.eup %4766  ;;  %v5840_v39 = vmul.f32 %v4765_v20, %v4749_v58 }
 0x5fb   : > { %4419 = vmatprep.subr.bf16.mxu0 %v2048_v60  ;;  %6855 = vst [vmem:[#allocation41_spill] sm:$0xff] %v5836_v16  ;;  %v5850_v25 = vmul.f32 %v4767_v51, %v5810_v12 }
 0x5fc   : > { %v4769_v32 = vpop.eup %4768  ;;  %4420 = vmatpush3.bf16.msra.mxu0 %v2048_v60  ;;  %6856 = vst [vmem:[#allocation42_spill] sm:$0xff] %v5840_v39 }
 0x5fd   : > { %4609 = vmatprep.subr.msk.bf16.mxu0 %vm573_vm0, %v5289_v62  ;;  %v5842_v3 = vmul.f32 %v4769_v32, %v4753_v27  ;;  %6859 = vst [vmem:[#allocation8_spill] sm:$0xff] %v5850_v25  ;;  %v2044_v58 = vpack.c.bf16 %v5836_v16, %v5850_v25  ;;  %v5857_v27 = vpack.c.bf16 %v828_v26, %v825_v42 }
 0x5ff   : > { %6857 = vst [vmem:[#allocation43_spill] sm:$0xff] %v5842_v3  ;;  %v2043_v18 = vpack.c.bf16 %v5842_v3, %v5840_v39  ;;  %v2336_v12 = vsel %vm573_vm0, %v5857_v27, 0 }
 0x601   : > { %4421 = vmatprep.mubr.msk.bf16.mxu0 %vm1084_vm1, %v2043_v18  ;;  %v6867_v18 = vld [vmem:[#allocation2_spill] sm:$0xff] }
 0x602   : > { %4422 = vmatmul.mubr.msk.bf16.vlgmr.msra.gmra.mxu0 %vm1084_vm1, %v2044_v58  ;;  %v6868_v58 = vld [vmem:[#allocation5_spill] sm:$0xff] }
 0x603   : > { %4430 = vmatpush3.bf16.xpose.msra.mxu0 %v2339_v56  ;;  %v6869_v56 = vld [vmem:[#allocation4_spill] sm:$0xff] }
 0x604   : > { %4610 = vmatprep.subr.msk.bf16.mxu0 %vm573_vm0, %v5857_v27  ;;  %v4771_v60 = vpop.eup %4770 }
 0x605   : > { %v5877_v11 = vmul.f32 %v4771_v60, %v5821_v24  ;;  %v6866_v24 = vld [vmem:[#allocation3_spill] sm:$0xff] }
 0x607   : > { %6863 = vst [vmem:[#allocation7_spill] sm:$0xff] %v5877_v11 }
 0x60b   : > { %4432 = vmatpush3.bf16.xpose.msra.mxu0 %v2336_v12 }
 0x60c   : > { %4611 = vmatprep.subr.msk.bf16.mxu0 %vm573_vm0, %v6860_v6 }
 0x613   : > { %4434 = vmatpush3.bf16.xpose.msra.mxu0 %v2333_v46 }
 0x614   : > { %4612 = vmatprep.subr.msk.bf16.mxu0 %vm573_vm0, %v6861_v37 }
 0x61b   : > { %4436 = vmatpush3.bf16.xpose.msra.mxu0 %v2330_v43  ;;  %v2017_v8 = vpop.xlane.xlu1 %2016 }
 0x61c   : > { %4772 = vrcp.f32 %v2017_v8 }
 0x61d   : > { %4774 = vrcp.f32 %v2023_v50 }
 0x61f   : > { %v2026_v20 = vpop.xlane.xlu1 %2025 }
 0x620   : > { %4776 = vrcp.f32 %v2026_v20 }
 0x629   : > { %v4773_v51 = vpop.eup %4772 }
 0x62a   : > { %v5874_v32 = vmul.f32 %v4773_v51, %v4759_v22  ;;  %v4775_v42 = vpop.eup %4774 }
 0x62b   : > { %v5883_v26 = vmul.f32 %v4775_v42, %v5817_v55 }
 0x62c   : > { %6862 = vst [vmem:[#allocation6_spill] sm:$0xff] %v5874_v32  ;;  %v2045_v45 = vpack.c.bf16 %v5877_v11, %v5874_v32 }
 0x62d   : > { %v4777_v17 = vpop.eup %4776  ;;  %6864 = vst [vmem:[#allocation44_spill] sm:$0xff] %v5883_v26 }
 0x62e   : > { %4425 = vmatprep.mubr.msk.bf16.mxu0 %vm1084_vm1, %v2045_v45  ;;  %v5886_v50 = vmul.f32 %v4777_v17, %v5832_v21 }
 0x630   : > { %6865 = vst [vmem:[#allocation45_spill] sm:$0xff] %v5886_v50  ;;  %v2046_v22 = vpack.c.bf16 %v5886_v50, %v5883_v26 }
 0x632   : > { %4426 = vmatmul.mubr.msk.bf16.gmra.mxu0 %vm1084_vm1, %v2046_v22 }
 0x633   : > { %4437 = vmatprep.mubr.msk.bf16.mxu0 %vm573_vm0, %v6866_v24 }
 0x63a   : > { %4438 = vmatmul.mubr.msk.bf16.vlgmr.msra.gmra.mxu0 %vm573_vm0, %v6867_v18 }
 0x63b   : > { %4441 = vmatprep.mubr.msk.bf16.mxu0 %vm573_vm0, %v6868_v58 }
 0x642   : > { %4442 = vmatmul.mubr.msk.bf16.gmra.mxu0 %vm573_vm0, %v6869_v56 }
 0x6c2   : > { %v5899_v55 = vpop.f32.mrf.mxu0 }
 0x6c4   : > { %v5901_v21 = vpop.f32.mrf.mxu0 }
 0x6c6   : > { %v5903_v12 = vpop.f32.mrf.mxu0 }
 0x6c8   : > { %v5907_v43 = vpop.f32.mrf.mxu0 }
 0x6f2   : > { %v5911_v20 = vpop.f32.mrf.mxu0 }
 0x6f3   : > { %6870 = vst [vmem:[#allocation3_spill] sm:$0xff] %v5911_v20 }
 0x6f4   : > { %v5913_v60 = vpop.f32.mrf.mxu0 }
 0x6f6   : > { %v5915_v51 = vpop.f32.mrf.mxu0 }
 0x6f7   : > { %6871 = vst [vmem:[#allocation2_spill] sm:$0xff] %v5915_v51 }
 0x6f8   : > { %v5919_v45 = vpop.f32.mrf.mxu0 }
 0x6fa   : > { %v4439_v22 = vpop.f32.mrf.mxu0 }
 0x6fb   : > { %v2412_v46 = vsel %vm1084_vm1, %v4439_v22, -inf }
 0x6fc   : > { %2413 = vmax.xlane.f32.xlu1 %v2412_v46  ;;  %v2375_v26 = vpop.f32.mrf.mxu0 }
 0x6fd   : > { %v2406_v50 = vsel %vm1084_vm1, %v2375_v26, -inf }
 0x6fe   : > { %v4440_v8 = vpop.f32.mrf.mxu0 }
 0x6ff   : > { %v2415_v17 = vsel %vm1084_vm1, %v4440_v8, -inf }
 0x700   : > { %2407 = vmax.xlane.f32.xlu1 %v2406_v50  ;;  %v2378_v32 = vpop.f32.mrf.mxu0 }
 0x701   : > { %v2409_v25 = vsel %vm1084_vm1, %v2378_v32, -inf }
 0x702   : > { %v4443_v11 = vpop.f32.mrf.mxu0 }
 0x703   : > { %v2424_v42 = vsel %vm1084_vm1, %v4443_v11, -inf }
 0x704   : > { %2410 = vmax.xlane.f32.xlu1 %v2409_v25  ;;  %2425 = vmax.xlane.f32.xlu0 %v2424_v42  ;;  %v2391_v16 = vpop.f32.mrf.mxu0 }
 0x705   : > { %v2418_v46 = vsel %vm1084_vm1, %v2391_v16, -inf }
 0x706   : > { %v4444_v39 = vpop.f32.mrf.mxu0 }
 0x707   : > { %v2427_v50 = vsel %vm1084_vm1, %v4444_v39, -inf }
 0x708   : > { %2416 = vmax.xlane.f32.xlu1 %v2415_v17  ;;  %v2394_v3 = vpop.f32.mrf.mxu0 }
 0x709   : > { %v2421_v29 = vsel %vm1084_vm1, %v2394_v3, -inf }
 0x70c   : > { %2419 = vmax.xlane.f32.xlu1 %v2418_v46 }
 0x710   : > { %2422 = vmax.xlane.f32.xlu1 %v2421_v29 }
 0x714   : > { %2428 = vmax.xlane.f32.xlu1 %v2427_v50 }
 0x785   : > { %v2414_v40 = vpop.xlane.xlu1 %2413 }
 0x786   : > { %v2432_v34 = vsub.f32 %v4439_v22, %v2414_v40 }
 0x788   : > { %v2442_v31 = vmul.f32 1.442695, %v2432_v34 }
 0x789   : > { %v2408_v25 = vpop.xlane.xlu1 %2407 }
 0x78a   : > { %4778 = vpow2.f32 %v2442_v31  ;;  %v2430_v42 = vsub.f32 %v2375_v26, %v2408_v25 }
 0x78c   : > { %v2438_v13 = vmul.f32 1.442695, %v2430_v42 }
 0x78d   : > { %v2411_v59 = vpop.xlane.xlu1 %2410  ;;  %v2426_v36 = vpop.xlane.xlu0 %2425 }
 0x78e   : > { %4780 = vpow2.f32 %v2438_v13  ;;  %v2436_v17 = vsub.f32 %v4443_v11, %v2426_v36  ;;  %v2431_v53 = vsub.f32 %v2378_v32, %v2411_v59 }
 0x790   : > { %v2450_v7 = vmul.f32 1.442695, %v2436_v17  ;;  %v2440_v29 = vmul.f32 1.442695, %v2431_v53 }
 0x791   : > { %v2417_v46 = vpop.xlane.xlu1 %2416 }
 0x792   : > { %v2433_v30 = vsub.f32 %v4440_v8, %v2417_v46  ;;  %4782 = vpow2.f32 %v2450_v7 }
 0x794   : > { %v2444_v41 = vmul.f32 1.442695, %v2433_v30 }
 0x796   : > { %4784 = vpow2.f32 %v2444_v41  ;;  %v2420_v41 = vpop.xlane.xlu1 %2419 }
 0x797   : > { %v5931_v50 = vpop.eup %4778  ;;  %4786 = vpow2.f32 %v2440_v29  ;;  %v2434_v11 = vsub.f32 %v2391_v16, %v2420_v41 }
 0x798   : > { %v2460_v31 = vsel %vm1084_vm1, %v5931_v50, 0.0 }
 0x799   : > { %2461 = vadd.xlane.f32.xlu1 %v2460_v31  ;;  %v2446_v8 = vmul.f32 1.442695, %v2434_v11 }
 0x79a   : > { %v2423_v32 = vpop.xlane.xlu1 %2422 }
 0x79b   : > { %v4781_v40 = vpop.eup %4780  ;;  %4788 = vpow2.f32 %v2446_v8  ;;  %v2435_v25 = vsub.f32 %v2394_v3, %v2423_v32 }
 0x79c   : > { %v2454_v34 = vsel %vm1084_vm1, %v4781_v40, 0.0 }
 0x79d   : > { %2455 = vadd.xlane.f32.xlu1 %v2454_v34  ;;  %v2448_v17 = vmul.f32 1.442695, %v2435_v25 }
 0x79e   : > { %v2429_v26 = vpop.xlane.xlu1 %2428 }
 0x79f   : > { %v5936_v13 = vpop.eup %4782  ;;  %v2437_v22 = vsub.f32 %v4444_v39, %v2429_v26 }
 0x7a0   : > { %v2472_v59 = vsel %vm1084_vm1, %v5936_v13, 0.0 }
 0x7a1   : > { %2473 = vadd.xlane.f32.xlu0 %v2472_v59  ;;  %v2452_v42 = vmul.f32 1.442695, %v2437_v22 }
 0x7a3   : > { %v4785_v36 = vpop.eup %4784  ;;  %4790 = vpow2.f32 %v2452_v42 }
 0x7a4   : > { %v2463_v53 = vsel %vm1084_vm1, %v4785_v36, 0.0  ;;  %v4787_v30 = vpop.eup %4786  ;;  %4792 = vpow2.f32 %v2448_v17 }
 0x7a5   : > { %2464 = vadd.xlane.f32.xlu1 %v2463_v53  ;;  %v2457_v7 = vsel %vm1084_vm1, %v4787_v30, 0.0 }
 0x7a8   : > { %v4789_v46 = vpop.eup %4788 }
 0x7a9   : > { %2458 = vadd.xlane.f32.xlu1 %v2457_v7  ;;  %v2466_v29 = vsel %vm1084_vm1, %v4789_v46, 0.0 }
 0x7b0   : > { %v4791_v31 = vpop.eup %4790 }
 0x7b1   : > { %v2475_v34 = vsel %vm1084_vm1, %v4791_v31, 0.0  ;;  %v4793_v59 = vpop.eup %4792 }
 0x7b2   : > { %v2469_v16 = vsel %vm1084_vm1, %v4793_v59, 0.0 }
 0x7b7   : > { %2601 = vrot.lane.b32.xlu0 %v5289_v62, %s4916_s17 }
 0x7ba   : > { %2599 = vrot.lane.b32.xlu1 %v5857_v27, %s4916_s17 }
 0x7bb   : > { %2583 = vrot.lane.b32.xlu0 %v6866_v24, %s4916_s17 }
 0x7be   : > { %2597 = vrot.lane.b32.xlu1 %v6860_v6, %s4916_s17 }
 0x7bf   : > { %2587 = vrot.lane.b32.xlu0 %v6868_v58, %s4916_s17 }
 0x7e2   : > { %2467 = vadd.xlane.f32.xlu1 %v2466_v29 }
 0x7e6   : > { %2476 = vadd.xlane.f32.xlu1 %v2475_v34 }
 0x7ea   : > { %2470 = vadd.xlane.f32.xlu1 %v2469_v16 }
 0x7fb   : > { %2595 = vrot.lane.b32.xlu1 %v6861_v37, %s4916_s17 }
 0x7ff   : > { %2585 = vrot.lane.b32.xlu1 %v6867_v18, %s4916_s17 }
 0x803   : > { %2589 = vrot.lane.b32.xlu1 %v6869_v56, %s4916_s17 }
 0x822   : > { %v2462_v39 = vpop.xlane.xlu1 %2461 }
 0x826   : > { %v2456_v3 = vpop.xlane.xlu1 %2455 }
 0x82a   : > { %v2474_v53 = vpop.xlane.xlu0 %2473 }
 0x82e   : > { %v2465_v7 = vpop.xlane.xlu1 %2464  ;;  %v2602_v41 = vpop.permute.xlu0 %2601 }
 0x82f   : > { %4794 = vrcp.f32 %v2465_v7  ;;  %4613 = vmatprep.subr.msk.bf16.mxu1 %vm573_vm0, %v2602_v41 }
 0x830   : > { %4796 = vrcp.f32 %v2456_v3 }
 0x831   : > { %4798 = vrcp.f32 %v2462_v39 }
 0x832   : > { %v2459_v32 = vpop.xlane.xlu1 %2458 }
 0x833   : > { %4800 = vrcp.f32 %v2459_v32 }
 0x836   : > { %v2600_v39 = vpop.permute.xlu1 %2599 }
 0x83c   : > { %v4795_v11 = vpop.eup %4794 }
 0x83d   : > { %v4797_v26 = vpop.eup %4796  ;;  %v5962_v25 = vmul.f32 %v4795_v11, %v4785_v36  ;;  %v2625_v36 = vsel %vm573_vm0, %v2602_v41, 0 }
 0x83e   : > { %v4799_v8 = vpop.eup %4798  ;;  %v5964_v42 = vmul.f32 %v4797_v26, %v4781_v40  ;;  %v2622_v40 = vsel %vm573_vm0, %v2600_v39, 0 }
 0x83f   : > { %6872 = vst [vmem:[#allocation5_spill] sm:$0xff] %v5962_v25  ;;  %v5969_v29 = vmul.f32 %v4799_v8, %v5931_v50  ;;  %v2598_v50 = vpop.permute.xlu1 %2597 }
 0x840   : > { %v4801_v22 = vpop.eup %4800  ;;  %6873 = vst [vmem:[#allocation4_spill] sm:$0xff] %v5964_v42 }
 0x841   : > { %v5966_v17 = vmul.f32 %v4801_v22, %v4787_v30  ;;  %6875 = vst [vmem:[#allocation47_spill] sm:$0xff] %v5969_v29  ;;  %v2495_v16 = vpack.c.bf16 %v5962_v25, %v5969_v29  ;;  %v2619_v30 = vsel %vm573_vm0, %v2598_v50, 0 }
 0x843   : > { %6874 = vst [vmem:[#allocation46_spill] sm:$0xff] %v5966_v17  ;;  %v2494_v34 = vpack.c.bf16 %v5966_v17, %v5964_v42 }
 0x845   : > { %4453 = vmatprep.mubr.msk.bf16.mxu1 %vm1084_vm1, %v2494_v34 }
 0x846   : > { %4454 = vmatmul.mubr.msk.bf16.vlgmr.msra.gmra.mxu1 %vm1084_vm1, %v2495_v16 }
 0x847   : > { %4462 = vmatpush3.bf16.xpose.msra.mxu1 %v2625_v36 }
 0x848   : > { %4614 = vmatprep.subr.msk.bf16.mxu1 %vm573_vm0, %v2600_v39 }
 0x84f   : > { %4464 = vmatpush3.bf16.xpose.msra.mxu1 %v2622_v40 }
 0x850   : > { %4615 = vmatprep.subr.msk.bf16.mxu1 %vm573_vm0, %v2598_v50 }
 0x857   : > { %4466 = vmatpush3.bf16.xpose.msra.mxu1 %v2619_v30  ;;  %v2584_v30 = vpop.permute.xlu0 %2583 }
 0x86b   : > { %v2468_v3 = vpop.xlane.xlu1 %2467 }
 0x86f   : > { %v2477_v7 = vpop.xlane.xlu1 %2476 }
 0x870   : > { %4802 = vrcp.f32 %v2477_v7 }
 0x871   : > { %4804 = vrcp.f32 %v2468_v3 }
 0x872   : > { %4806 = vrcp.f32 %v2474_v53 }
 0x873   : > { %v2471_v32 = vpop.xlane.xlu1 %2470 }
 0x874   : > { %4808 = vrcp.f32 %v2471_v32 }
 0x877   : > { %v2596_v41 = vpop.permute.xlu1 %2595 }
 0x878   : > { %4616 = vmatprep.subr.msk.bf16.mxu1 %vm573_vm0, %v2596_v41  ;;  %v2616_v11 = vsel %vm573_vm0, %v2596_v41, 0 }
 0x879   : > { %4468 = vmatpush3.bf16.xpose.msra.mxu1 %v2616_v11 }
 0x87d   : > { %v4803_v26 = vpop.eup %4802 }
 0x87e   : > { %v4805_v8 = vpop.eup %4804  ;;  %v5984_v16 = vmul.f32 %v4803_v26, %v4791_v31  ;;  %v2588_v31 = vpop.permute.xlu0 %2587 }
 0x87f   : > { %v4807_v22 = vpop.eup %4806  ;;  %v5986_v36 = vmul.f32 %v4805_v8, %v4789_v46  ;;  %v2586_v46 = vpop.permute.xlu1 %2585 }
 0x880   : > { %6876 = vst [vmem:[#allocation48_spill] sm:$0xff] %v5984_v16  ;;  %v5991_v53 = vmul.f32 %v4807_v22, %v5936_v13 }
 0x881   : > { %v4809_v34 = vpop.eup %4808  ;;  %6877 = vst [vmem:[#allocation49_spill] sm:$0xff] %v5986_v36 }
 0x882   : > { %v5988_v39 = vmul.f32 %v4809_v34, %v4793_v59  ;;  %6879 = vst [vmem:[#allocation51_spill] sm:$0xff] %v5991_v53  ;;  %v2497_v50 = vpack.c.bf16 %v5984_v16, %v5991_v53 }
 0x883   : > { %v2590_v13 = vpop.permute.xlu1 %2589 }
 0x884   : > { %6878 = vst [vmem:[#allocation50_spill] sm:$0xff] %v5988_v39  ;;  %v2496_v40 = vpack.c.bf16 %v5988_v39, %v5986_v36 }
 0x886   : > { %4457 = vmatprep.mubr.msk.bf16.mxu1 %vm1084_vm1, %v2496_v40 }
 0x887   : > { %4458 = vmatmul.mubr.msk.bf16.gmra.mxu1 %vm1084_vm1, %v2497_v50 }
 0x888   : > { %4469 = vmatprep.mubr.msk.bf16.mxu1 %vm573_vm0, %v2584_v30 }
 0x88f   : > { %4470 = vmatmul.mubr.msk.bf16.vlgmr.msra.gmra.mxu1 %vm573_vm0, %v2586_v46 }
 0x890   : > { %4473 = vmatprep.mubr.msk.bf16.mxu1 %vm573_vm0, %v2588_v31 }
 0x897   : > { %4474 = vmatmul.mubr.msk.bf16.gmra.mxu1 %vm573_vm0, %v2590_v13 }
 0x906   : > { %v6003_v59 = vpop.f32.mrf.mxu1 }
 0x907   : > { %6880 = vst [vmem:[#allocation52_spill] sm:$0xff] %v6003_v59 }
 0x908   : > { %v6005_v3 = vpop.f32.mrf.mxu1 }
 0x909   : > { %6881 = vst [vmem:[#allocation53_spill] sm:$0xff] %v6005_v3 }
 0x90a   : > { %v6007_v7 = vpop.f32.mrf.mxu1 }
 0x90b   : > { %6882 = vst [vmem:[#allocation54_spill] sm:$0xff] %v6007_v7 }
 0x90c   : > { %v6011_v41 = vpop.f32.mrf.mxu1 }
 0x90d   : > { %6883 = vst [vmem:[#allocation55_spill] sm:$0xff] %v6011_v41 }
 0x947   : > { %v6015_v26 = vpop.f32.mrf.mxu1 }
 0x948   : > { %6884 = vst [vmem:[#allocation56_spill] sm:$0xff] %v6015_v26 }
 0x949   : > { %v6017_v8 = vpop.f32.mrf.mxu1 }
 0x94a   : > { %6885 = vst [vmem:[#allocation57_spill] sm:$0xff] %v6017_v8 }
 0x94b   : > { %v6019_v22 = vpop.f32.mrf.mxu1 }
 0x94c   : > { %6886 = vst [vmem:[#allocation58_spill] sm:$0xff] %v6019_v22 }
 0x94d   : > { %v6023_v40 = vpop.f32.mrf.mxu1 }
 0x94e   : > { %6887 = vst [vmem:[#allocation59_spill] sm:$0xff] %v6023_v40 }
 0x94f   : > { %v4471_v30 = vpop.f32.mrf.mxu1 }
 0x950   : > { %v2698_v11 = vsel %vm1084_vm1, %v4471_v30, -inf }
 0x951   : > { %v2661_v46 = vpop.f32.mrf.mxu1 }
 0x952   : > { %v2692_v31 = vsel %vm1084_vm1, %v2661_v46, -inf }
 0x953   : > { %2693 = vmax.xlane.f32.xlu0 %v2692_v31  ;;  %v4472_v13 = vpop.f32.mrf.mxu1 }
 0x954   : > { %v2701_v36 = vsel %vm1084_vm1, %v4472_v13, -inf }
 0x955   : > { %v2664_v32 = vpop.f32.mrf.mxu1 }
 0x956   : > { %v2695_v53 = vsel %vm1084_vm1, %v2664_v32, -inf }
 0x957   : > { %2699 = vmax.xlane.f32.xlu0 %v2698_v11  ;;  %2696 = vmax.xlane.f32.xlu1 %v2695_v53  ;;  %v4475_v16 = vpop.f32.mrf.mxu1 }
 0x958   : > { %v2710_v31 = vsel %vm1084_vm1, %v4475_v16, -inf }
 0x959   : > { %v2677_v34 = vpop.f32.mrf.mxu1 }
 0x95a   : > { %v2704_v42 = vsel %vm1084_vm1, %v2677_v34, -inf }
 0x95b   : > { %2702 = vmax.xlane.f32.xlu0 %v2701_v36  ;;  %v4476_v39 = vpop.f32.mrf.mxu1 }
 0x95c   : > { %v2713_v50 = vsel %vm1084_vm1, %v4476_v39, -inf }
 0x95d   : > { %2714 = vmax.xlane.f32.xlu1 %v2713_v50  ;;  %v2680_v29 = vpop.f32.mrf.mxu1 }
 0x95e   : > { %v2707_v25 = vsel %vm1084_vm1, %v2680_v29, -inf }
 0x95f   : > { %2711 = vmax.xlane.f32.xlu0 %v2710_v31 }
 0x961   : > { %2708 = vmax.xlane.f32.xlu1 %v2707_v25 }
 0x963   : > { %2705 = vmax.xlane.f32.xlu0 %v2704_v42 }
 0x972   : > { %2792 = vrot.lane.b32.xlu1 %v5708_v47, %s4916_s17 }
 0x976   : > { %2790 = vrot.lane.b32.xlu1 %v5318_v44, %s4916_s17 }
 0x979   : > { %2794 = vrot.lane.b32.xlu0 %v5327_v54, %s4916_s17 }
 0x97a   : > { %2788 = vrot.lane.b32.xlu1 %v5321_v48, %s4916_s17 }
 0x9dc   : > { %v2694_v36 = vpop.xlane.xlu0 %2693 }
 0x9dd   : > { %v2716_v53 = vsub.f32 %v2661_v46, %v2694_v36 }
 0x9df   : > { %v2724_v31 = vmul.f32 1.442695, %v2716_v53 }
 0x9e0   : > { %v2700_v11 = vpop.xlane.xlu0 %2699  ;;  %v2697_v50 = vpop.xlane.xlu1 %2696 }
 0x9e1   : > { %v2718_v25 = vsub.f32 %v4471_v30, %v2700_v11  ;;  %v2717_v42 = vsub.f32 %v2664_v32, %v2697_v50 }
 0x9e3   : > { %v2728_v17 = vmul.f32 1.442695, %v2718_v25  ;;  %v2726_v40 = vmul.f32 1.442695, %v2717_v42 }
 0x9e4   : > { %v2703_v26 = vpop.xlane.xlu0 %2702 }
 0x9e5   : > { %4810 = vpow2.f32 %v2728_v17  ;;  %v2719_v22 = vsub.f32 %v4472_v13, %v2703_v26 }
 0x9e6   : > { %v2715_v8 = vpop.xlane.xlu1 %2714  ;;  %4812 = vpow2.f32 %v2724_v31 }
 0x9e7   : > { %v2730_v59 = vmul.f32 1.442695, %v2719_v22  ;;  %v2723_v7 = vsub.f32 %v4476_v39, %v2715_v8 }
 0x9e8   : > { %v2712_v3 = vpop.xlane.xlu0 %2711 }
 0x9e9   : > { %4814 = vpow2.f32 %v2730_v59  ;;  %v2722_v41 = vsub.f32 %v4475_v16, %v2712_v3  ;;  %v2738_v46 = vmul.f32 1.442695, %v2723_v7 }
 0x9ea   : > { %v2709_v49 = vpop.xlane.xlu1 %2708  ;;  %4816 = vpow2.f32 %v2726_v40 }
 0x9eb   : > { %v2736_v36 = vmul.f32 1.442695, %v2722_v41  ;;  %v2721_v28 = vsub.f32 %v2680_v29, %v2709_v49 }
 0x9ec   : > { %v2706_v30 = vpop.xlane.xlu0 %2705 }
 0x9ed   : > { %4818 = vpow2.f32 %v2736_v36  ;;  %v2720_v53 = vsub.f32 %v2677_v34, %v2706_v30  ;;  %v2734_v17 = vmul.f32 1.442695, %v2721_v28 }
 0x9ee   : > { %v2793_v32 = vpop.permute.xlu1 %2792  ;;  %4820 = vpow2.f32 %v2738_v46 }
 0x9ef   : > { %v2732_v26 = vmul.f32 1.442695, %v2720_v53 }
 0x9f0   : > { %v2795_v13 = vpop.permute.xlu0 %2794 }
 0x9f1   : > { %4822 = vpow2.f32 %v2732_v26  ;;  %4477 = vmatprep.subr.bf16.mxu0 %v2795_v13 }
 0x9f2   : > { %v6043_v22 = vpop.eup %4810  ;;  %4478 = vmatpush3.bf16.msra.mxu0 %v2795_v13  ;;  %4824 = vpow2.f32 %v2734_v17  ;;  %v2791_v49 = vpop.permute.xlu1 %2790 }
 0x9f3   : > { %4479 = vmatprep.subr.bf16.mxu0 %v2793_v32  ;;  %v2746_v16 = vsel %vm1084_vm1, %v6043_v22, 0.0  ;;  %v4813_v39 = vpop.eup %4812 }
 0x9f4   : > { %2747 = vadd.xlane.f32.xlu0 %v2746_v16  ;;  %v2740_v28 = vsel %vm1084_vm1, %v4813_v39, 0.0 }
 0x9f6   : > { %v4815_v29 = vpop.eup %4814  ;;  %4480 = vmatpush3.bf16.msra.mxu0 %v2793_v32  ;;  %v2789_v41 = vpop.permute.xlu1 %2788 }
 0x9f7   : > { %4481 = vmatprep.subr.bf16.mxu0 %v2791_v49  ;;  %v2749_v59 = vsel %vm1084_vm1, %v4815_v29, 0.0  ;;  %v4817_v3 = vpop.eup %4816 }
 0x9f8   : > { %2741 = vadd.xlane.f32.xlu0 %v2740_v28  ;;  %2750 = vadd.xlane.f32.xlu1 %v2749_v59  ;;  %v2743_v34 = vsel %vm1084_vm1, %v4817_v3, 0.0 }
 0x9fa   : > { %v6049_v7 = vpop.eup %4818  ;;  %4482 = vmatpush3.bf16.msra.mxu0 %v2791_v49 }
 0x9fb   : > { %4483 = vmatprep.subr.bf16.mxu0 %v2789_v41  ;;  %v2758_v8 = vsel %vm1084_vm1, %v6049_v7, 0.0  ;;  %v4821_v40 = vpop.eup %4820 }
 0x9fc   : > { %2759 = vadd.xlane.f32.xlu0 %v2758_v8  ;;  %2744 = vadd.xlane.f32.xlu1 %v2743_v34  ;;  %v2761_v25 = vsel %vm1084_vm1, %v4821_v40, 0.0 }
 0x9fe   : > { %v4823_v11 = vpop.eup %4822  ;;  %4484 = vmatpush3.bf16.msra.mxu0 %v2789_v41 }
 0x9ff   : > { %v2752_v50 = vsel %vm1084_vm1, %v4823_v11, 0.0  ;;  %v4825_v31 = vpop.eup %4824 }
 0xa00   : > { %2753 = vadd.xlane.f32.xlu1 %v2752_v50  ;;  %2762 = vadd.xlane.f32.xlu0 %v2761_v25  ;;  %v2755_v42 = vsel %vm1084_vm1, %v4825_v31, 0.0 }
 0xa04   : > { %2756 = vadd.xlane.f32.xlu0 %v2755_v42 }
 0xa11   : > { %2893 = vrot.lane.b32.xlu1 %v5857_v27, %s4917_s18 }
 0xa15   : > { %2891 = vrot.lane.b32.xlu1 %v6860_v6, %s4917_s18 }
 0xa19   : > { %2889 = vrot.lane.b32.xlu1 %v6861_v37, %s4917_s18 }
 0xa1a   : > { %2895 = vrot.lane.b32.xlu0 %v5289_v62, %s4917_s18 }
 0xa1d   : > { %2883 = vrot.lane.b32.xlu1 %v6867_v18, %s4917_s18 }
 0xa1e   : > { %2881 = vrot.lane.b32.xlu0 %v6866_v24, %s4917_s18 }
 0xa21   : > { %2887 = vrot.lane.b32.xlu1 %v6869_v56, %s4917_s18 }
 0xa22   : > { %2885 = vrot.lane.b32.xlu0 %v6868_v58, %s4917_s18 }
 0xa7d   : > { %v2748_v46 = vpop.xlane.xlu0 %2747 }
 0xa81   : > { %v2742_v36 = vpop.xlane.xlu0 %2741  ;;  %v2751_v30 = vpop.xlane.xlu1 %2750 }
 0xa82   : > { %4826 = vrcp.f32 %v2751_v30 }
 0xa83   : > { %4828 = vrcp.f32 %v2742_v36 }
 0xa84   : > { %4830 = vrcp.f32 %v2748_v46 }
 0xa85   : > { %v2760_v53 = vpop.xlane.xlu0 %2759  ;;  %v2745_v32 = vpop.xlane.xlu1 %2744 }
 0xa86   : > { %4832 = vrcp.f32 %v2745_v32 }
 0xa89   : > { %v2763_v17 = vpop.xlane.xlu0 %2762  ;;  %v2754_v26 = vpop.xlane.xlu1 %2753 }
 0xa8a   : > { %4834 = vrcp.f32 %v2763_v17 }
 0xa8b   : > { %4836 = vrcp.f32 %v2754_v26 }
 0xa8c   : > { %4838 = vrcp.f32 %v2760_v53 }
 0xa8d   : > { %v2757_v13 = vpop.xlane.xlu0 %2756 }
 0xa8e   : > { %4840 = vrcp.f32 %v2757_v13 }
 0xa8f   : > { %v4827_v16 = vpop.eup %4826 }
 0xa90   : > { %v4829_v28 = vpop.eup %4828  ;;  %v6074_v8 = vmul.f32 %v4827_v16, %v4815_v29 }
 0xa91   : > { %v2896_v49 = vpop.permute.xlu0 %2895  ;;  %v4831_v59 = vpop.eup %4830  ;;  %v6076_v34 = vmul.f32 %v4829_v28, %v4813_v39 }
 0xa92   : > { %4617 = vmatprep.subr.msk.bf16.mxu0 %vm573_vm0, %v2896_v49  ;;  %6888 = vst [vmem:[#allocation60_spill] sm:$0xff] %v6074_v8  ;;  %v6081_v25 = vmul.f32 %v4831_v59, %v6043_v22  ;;  %v2919_v39 = vsel %vm573_vm0, %v2896_v49, 0 }
 0xa93   : > { %v4833_v41 = vpop.eup %4832  ;;  %6889 = vst [vmem:[#allocation61_spill] sm:$0xff] %v6076_v34 }
 0xa94   : > { %v6078_v50 = vmul.f32 %v4833_v41, %v4817_v3  ;;  %6891 = vst [vmem:[#allocation63_spill] sm:$0xff] %v6081_v25  ;;  %v2781_v36 = vpack.c.bf16 %v6074_v8, %v6081_v25  ;;  %v2894_v3 = vpop.permute.xlu1 %2893 }
 0xa95   : > { %v2882_v49 = vpop.permute.xlu0 %2881 }
 0xa96   : > { %6890 = vst [vmem:[#allocation62_spill] sm:$0xff] %v6078_v50  ;;  %v2780_v42 = vpack.c.bf16 %v6078_v50, %v6076_v34 }
 0xa97   : > { %v4835_v46 = vpop.eup %4834 }
 0xa98   : > { %v4837_v30 = vpop.eup %4836  ;;  %4485 = vmatprep.mubr.msk.bf16.mxu0 %vm1084_vm1, %v2780_v42  ;;  %v6095_v17 = vmul.f32 %v4835_v46, %v4821_v40 }
 0xa99   : > { %v4839_v53 = vpop.eup %4838  ;;  %4486 = vmatmul.mubr.msk.bf16.vlgmr.msra.gmra.mxu0 %vm1084_vm1, %v2781_v36  ;;  %v6091_v22 = vmul.f32 %v4837_v30, %v4823_v11  ;;  %v2916_v11 = vsel %vm573_vm0, %v2894_v3, 0  ;;  %v2886_v41 = vpop.permute.xlu0 %2885 }
 0xa9a   : > { %4494 = vmatpush3.bf16.xpose.msra.mxu0 %v2919_v39  ;;  %6894 = vst [vmem:[#allocation66_spill] sm:$0xff] %v6095_v17  ;;  %v6100_v13 = vmul.f32 %v4839_v53, %v6049_v7 }
 0xa9b   : > { %v4841_v29 = vpop.eup %4840  ;;  %4618 = vmatprep.subr.msk.bf16.mxu0 %vm573_vm0, %v2894_v3  ;;  %6892 = vst [vmem:[#allocation64_spill] sm:$0xff] %v6091_v22 }
 0xa9c   : > { %v6093_v32 = vmul.f32 %v4841_v29, %v4825_v31  ;;  %6895 = vst [vmem:[#allocation67_spill] sm:$0xff] %v6100_v13  ;;  %v2783_v16 = vpack.c.bf16 %v6095_v17, %v6100_v13  ;;  %v2892_v31 = vpop.permute.xlu1 %2891 }
 0xa9d   : > { %v2913_v40 = vsel %vm573_vm0, %v2892_v31, 0 }
 0xa9e   : > { %6893 = vst [vmem:[#allocation65_spill] sm:$0xff] %v6093_v32  ;;  %v2782_v26 = vpack.c.bf16 %v6093_v32, %v6091_v22 }
 0xaa0   : > { %4489 = vmatprep.mubr.msk.bf16.mxu0 %vm1084_vm1, %v2782_v26  ;;  %v2890_v7 = vpop.permute.xlu1 %2889 }
 0xaa1   : > { %4490 = vmatmul.mubr.msk.bf16.gmra.mxu0 %vm1084_vm1, %v2783_v16  ;;  %v2910_v28 = vsel %vm573_vm0, %v2890_v7, 0 }
 0xaa2   : > { %4496 = vmatpush3.bf16.xpose.msra.mxu0 %v2916_v11  ;;  %4501 = vmatprep.mubr.msk.bf16.mxu0 %vm573_vm0, %v2882_v49 }
 0xaa3   : > { %4619 = vmatprep.subr.msk.bf16.mxu0 %vm573_vm0, %v2892_v31 }
 0xaa4   : > { %v2884_v59 = vpop.permute.xlu1 %2883 }
 0xaa8   : > { %v2888_v42 = vpop.permute.xlu1 %2887 }
 0xaaa   : > { %4498 = vmatpush3.bf16.xpose.msra.mxu0 %v2913_v40 }
 0xaab   : > { %4620 = vmatprep.subr.msk.bf16.mxu0 %vm573_vm0, %v2890_v7 }
 0xab2   : > { %4500 = vmatpush3.bf16.xpose.msra.mxu0 %v2910_v28 }
 0xab9   : > { %4502 = vmatmul.mubr.msk.bf16.vlgmr.msra.gmra.mxu0 %vm573_vm0, %v2884_v59 }
 0xaba   : > { %4505 = vmatprep.mubr.msk.bf16.mxu0 %vm573_vm0, %v2886_v41 }
 0xac1   : > { %4506 = vmatmul.mubr.msk.bf16.gmra.mxu0 %vm573_vm0, %v2888_v42 }
 0xb59   : > { %v6115_v46 = vpop.f32.mrf.mxu0 }
 0xb5a   : > { %6896 = vst [vmem:[#allocation68_spill] sm:$0xff] %v6115_v46 }
 0xb5b   : > { %v6117_v36 = vpop.f32.mrf.mxu0 }
 0xb5d   : > { %v6119_v30 = vpop.f32.mrf.mxu0 }
 0xb5e   : > { %6897 = vst [vmem:[#allocation69_spill] sm:$0xff] %v6119_v30 }
 0xb5f   : > { %v6123_v39 = vpop.f32.mrf.mxu0 }
 0xb61   : > { %v6127_v3 = vpop.f32.mrf.mxu0 }
 0xb62   : > { %6898 = vst [vmem:[#allocation70_spill] sm:$0xff] %v6127_v3 }
 0xb63   : > { %v6129_v26 = vpop.f32.mrf.mxu0 }
 0xb65   : > { %v6131_v16 = vpop.f32.mrf.mxu0 }
 0xb66   : > { %6899 = vst [vmem:[#allocation71_spill] sm:$0xff] %v6131_v16 }
 0xb67   : > { %v6135_v11 = vpop.f32.mrf.mxu0 }
 0xb79   : > { %v4503_v40 = vpop.f32.mrf.mxu0 }
 0xb7a   : > { %v2992_v42 = vsel %vm1084_vm1, %v4503_v40, -inf }
 0xb7b   : > { %v2955_v7 = vpop.f32.mrf.mxu0 }
 0xb7c   : > { %v2986_v28 = vsel %vm1084_vm1, %v2955_v7, -inf }
 0xb7d   : > { %2987 = vmax.xlane.f32.xlu0 %v2986_v28  ;;  %v4504_v59 = vpop.f32.mrf.mxu0 }
 0xb7e   : > { %v2995_v13 = vsel %vm1084_vm1, %v4504_v59, -inf }
 0xb7f   : > { %v2958_v41 = vpop.f32.mrf.mxu0 }
 0xb80   : > { %v2989_v53 = vsel %vm1084_vm1, %v2958_v41, -inf }
 0xb81   : > { %2993 = vmax.xlane.f32.xlu0 %v2992_v42  ;;  %2990 = vmax.xlane.f32.xlu1 %v2989_v53  ;;  %v4507_v29 = vpop.f32.mrf.mxu0 }
 0xb82   : > { %v3004_v28 = vsel %vm1084_vm1, %v4507_v29, -inf }
 0xb83   : > { %v2971_v49 = vpop.f32.mrf.mxu0 }
 0xb84   : > { %v2998_v25 = vsel %vm1084_vm1, %v2971_v49, -inf }
 0xb85   : > { %2996 = vmax.xlane.f32.xlu0 %v2995_v13  ;;  %v4508_v17 = vpop.f32.mrf.mxu0 }
 0xb86   : > { %v3007_v31 = vsel %vm1084_vm1, %v4508_v17, -inf }
 0xb87   : > { %3008 = vmax.xlane.f32.xlu1 %v3007_v31  ;;  %v2974_v22 = vpop.f32.mrf.mxu0 }
 0xb88   : > { %v3001_v32 = vsel %vm1084_vm1, %v2974_v22, -inf }
 0xb89   : > { %3005 = vmax.xlane.f32.xlu0 %v3004_v28 }
 0xb8b   : > { %3002 = vmax.xlane.f32.xlu1 %v3001_v32 }
 0xb8d   : > { %2999 = vmax.xlane.f32.xlu0 %v2998_v25 }
 0xb9c   : > { %3082 = vrot.lane.b32.xlu1 %v5708_v47, %s4917_s18 }
 0xba0   : > { %3080 = vrot.lane.b32.xlu1 %v5318_v44, %s4917_s18 }
 0xba3   : > { %3084 = vrot.lane.b32.xlu0 %v5327_v54, %s4917_s18 }
 0xba4   : > { %3078 = vrot.lane.b32.xlu1 %v5321_v48, %s4917_s18 }
 0xc06   : > { %v2988_v13 = vpop.xlane.xlu0 %2987 }
 0xc07   : > { %v3010_v53 = vsub.f32 %v2955_v7, %v2988_v13 }
 0xc09   : > { %v3018_v28 = vmul.f32 1.442695, %v3010_v53 }
 0xc0a   : > { %v2994_v31 = vpop.xlane.xlu0 %2993  ;;  %v2991_v42 = vpop.xlane.xlu1 %2990 }
 0xc0b   : > { %v3012_v32 = vsub.f32 %v4503_v40, %v2994_v31  ;;  %v3011_v25 = vsub.f32 %v2958_v41, %v2991_v42 }
 0xc0d   : > { %v3022_v8 = vmul.f32 1.442695, %v3012_v32  ;;  %v3020_v35 = vmul.f32 1.442695, %v3011_v25 }
 0xc0e   : > { %v2997_v34 = vpop.xlane.xlu0 %2996 }
 0xc0f   : > { %4842 = vpow2.f32 %v3022_v8  ;;  %v3013_v50 = vsub.f32 %v4504_v59, %v2997_v34 }
 0xc10   : > { %v3009_v2 = vpop.xlane.xlu1 %3008  ;;  %4844 = vpow2.f32 %v3018_v28 }
 0xc11   : > { %v3024_v3 = vmul.f32 1.442695, %v3013_v50  ;;  %v3017_v16 = vsub.f32 %v4508_v17, %v3009_v2 }
 0xc12   : > { %v3006_v46 = vpop.xlane.xlu0 %3005 }
 0xc13   : > { %4846 = vpow2.f32 %v3024_v3  ;;  %v3016_v30 = vsub.f32 %v4507_v29, %v3006_v46  ;;  %v3032_v7 = vmul.f32 1.442695, %v3017_v16 }
 0xc14   : > { %v3003_v20 = vpop.xlane.xlu1 %3002  ;;  %4848 = vpow2.f32 %v3020_v35 }
 0xc15   : > { %v3030_v13 = vmul.f32 1.442695, %v3016_v30  ;;  %v3015_v51 = vsub.f32 %v2974_v22, %v3003_v20 }
 0xc16   : > { %v3000_v40 = vpop.xlane.xlu0 %2999 }
 0xc17   : > { %4850 = vpow2.f32 %v3030_v13  ;;  %v3014_v53 = vsub.f32 %v2971_v49, %v3000_v40  ;;  %v3028_v8 = vmul.f32 1.442695, %v3015_v51 }
 0xc18   : > { %v3083_v41 = vpop.permute.xlu1 %3082  ;;  %4852 = vpow2.f32 %v3032_v7 }
 0xc19   : > { %v3026_v34 = vmul.f32 1.442695, %v3014_v53 }
 0xc1a   : > { %v3085_v59 = vpop.permute.xlu0 %3084 }
 0xc1b   : > { %4854 = vpow2.f32 %v3026_v34  ;;  %4509 = vmatprep.subr.bf16.mxu1 %v3085_v59 }
 0xc1c   : > { %v6155_v50 = vpop.eup %4842  ;;  %4510 = vmatpush3.bf16.msra.mxu1 %v3085_v59  ;;  %4856 = vpow2.f32 %v3028_v8  ;;  %v3081_v20 = vpop.permute.xlu1 %3080 }
 0xc1d   : > { %4511 = vmatprep.subr.bf16.mxu1 %v3083_v41  ;;  %v3040_v2 = vsel %vm1084_vm1, %v6155_v50, 0.0  ;;  %v4845_v35 = vpop.eup %4844 }
 0xc1e   : > { %3041 = vadd.xlane.f32.xlu0 %v3040_v2  ;;  %v3034_v51 = vsel %vm1084_vm1, %v4845_v35, 0.0 }
 0xc20   : > { %v4847_v22 = vpop.eup %4846  ;;  %4512 = vmatpush3.bf16.msra.mxu1 %v3083_v41  ;;  %v3079_v29 = vpop.permute.xlu1 %3078 }
 0xc21   : > { %4513 = vmatprep.subr.bf16.mxu1 %v3081_v20  ;;  %v3043_v17 = vsel %vm1084_vm1, %v4847_v22, 0.0  ;;  %v4849_v46 = vpop.eup %4848 }
 0xc22   : > { %3035 = vadd.xlane.f32.xlu0 %v3034_v51  ;;  %3044 = vadd.xlane.f32.xlu1 %v3043_v17  ;;  %v3037_v16 = vsel %vm1084_vm1, %v4849_v46, 0.0 }
 0xc24   : > { %v6161_v30 = vpop.eup %4850  ;;  %4514 = vmatpush3.bf16.msra.mxu1 %v3081_v20 }
 0xc25   : > { %4515 = vmatprep.subr.bf16.mxu1 %v3079_v29  ;;  %v3052_v3 = vsel %vm1084_vm1, %v6161_v30, 0.0  ;;  %v4853_v49 = vpop.eup %4852 }
 0xc26   : > { %3053 = vadd.xlane.f32.xlu0 %v3052_v3  ;;  %3038 = vadd.xlane.f32.xlu1 %v3037_v16  ;;  %v3055_v32 = vsel %vm1084_vm1, %v4853_v49, 0.0 }
 0xc28   : > { %v4855_v31 = vpop.eup %4854  ;;  %4516 = vmatpush3.bf16.msra.mxu1 %v3079_v29 }
 0xc29   : > { %v3046_v42 = vsel %vm1084_vm1, %v4855_v31, 0.0  ;;  %v4857_v28 = vpop.eup %4856 }
 0xc2a   : > { %3047 = vadd.xlane.f32.xlu1 %v3046_v42  ;;  %3056 = vadd.xlane.f32.xlu0 %v3055_v32  ;;  %v3049_v25 = vsel %vm1084_vm1, %v4857_v28, 0.0 }
 0xc2e   : > { %3050 = vadd.xlane.f32.xlu0 %v3049_v25 }
 0xc3b   : > { %3183 = vrot.lane.b32.xlu1 %v5857_v27, %s4918_s23 }
 0xc3f   : > { %3181 = vrot.lane.b32.xlu1 %v6860_v6, %s4918_s23 }
 0xc43   : > { %3179 = vrot.lane.b32.xlu1 %v6861_v37, %s4918_s23 }
 0xc44   : > { %3185 = vrot.lane.b32.xlu0 %v5289_v62, %s4918_s23 }
 0xc47   : > { %3173 = vrot.lane.b32.xlu1 %v6867_v18, %s4918_s23 }
 0xc48   : > { %3171 = vrot.lane.b32.xlu0 %v6866_v24, %s4918_s23 }
 0xc4b   : > { %3177 = vrot.lane.b32.xlu1 %v6869_v56, %s4918_s23 }
 0xc4c   : > { %3175 = vrot.lane.b32.xlu0 %v6868_v58, %s4918_s23 }
 0xca7   : > { %v3042_v27 = vpop.xlane.xlu0 %3041 }
 0xcab   : > { %v3036_v6 = vpop.xlane.xlu0 %3035  ;;  %v3045_v7 = vpop.xlane.xlu1 %3044 }
 0xcac   : > { %4858 = vrcp.f32 %v3045_v7 }
 0xcad   : > { %4860 = vrcp.f32 %v3036_v6 }
 0xcae   : > { %4862 = vrcp.f32 %v3042_v27 }
 0xcaf   : > { %v3054_v37 = vpop.xlane.xlu0 %3053  ;;  %v3039_v13 = vpop.xlane.xlu1 %3038 }
 0xcb0   : > { %4864 = vrcp.f32 %v3039_v13 }
 0xcb3   : > { %v3057_v62 = vpop.xlane.xlu0 %3056  ;;  %v3048_v18 = vpop.xlane.xlu1 %3047 }
 0xcb4   : > { %4866 = vrcp.f32 %v3057_v62 }
 0xcb5   : > { %4868 = vrcp.f32 %v3048_v18 }
 0xcb6   : > { %4870 = vrcp.f32 %v3054_v37 }
 0xcb7   : > { %v3051_v24 = vpop.xlane.xlu0 %3050 }
 0xcb8   : > { %4872 = vrcp.f32 %v3051_v24 }
 0xcb9   : > { %v4859_v56 = vpop.eup %4858 }
 0xcba   : > { %v4861_v53 = vpop.eup %4860  ;;  %v6186_v8 = vmul.f32 %v4859_v56, %v4847_v22 }
 0xcbb   : > { %v3186_v40 = vpop.permute.xlu0 %3185  ;;  %v4863_v58 = vpop.eup %4862  ;;  %v6188_v34 = vmul.f32 %v4861_v53, %v4845_v35 }
 0xcbc   : > { %4621 = vmatprep.subr.msk.bf16.mxu1 %vm573_vm0, %v3186_v40  ;;  %6900 = vst [vmem:[#allocation72_spill] sm:$0xff] %v6186_v8  ;;  %v6193_v2 = vmul.f32 %v4863_v58, %v6155_v50  ;;  %v3209_v22 = vsel %vm573_vm0, %v3186_v40, 0 }
 0xcbd   : > { %v4865_v41 = vpop.eup %4864  ;;  %6901 = vst [vmem:[#allocation73_spill] sm:$0xff] %v6188_v34 }
 0xcbe   : > { %v6190_v59 = vmul.f32 %v4865_v41, %v4849_v46  ;;  %6902 = vst [vmem:[#allocation74_spill] sm:$0xff] %v6193_v2  ;;  %v3075_v17 = vpack.c.bf16 %v6186_v8, %v6193_v2  ;;  %v3184_v46 = vpop.permute.xlu1 %3183 }
 0xcbf   : > { %v3206_v6 = vsel %vm573_vm0, %v3184_v46, 0  ;;  %v3172_v7 = vpop.permute.xlu0 %3171 }
 0xcc0   : > { %v3074_v20 = vpack.c.bf16 %v6190_v59, %v6188_v34 }
 0xcc1   : > { %v4867_v51 = vpop.eup %4866 }
 0xcc2   : > { %v4869_v29 = vpop.eup %4868  ;;  %4517 = vmatprep.mubr.msk.bf16.mxu1 %vm1084_vm1, %v3074_v20  ;;  %v6207_v42 = vmul.f32 %v4867_v51, %v4853_v49 }
 0xcc3   : > { %v4871_v3 = vpop.eup %4870  ;;  %4518 = vmatmul.mubr.msk.bf16.vlgmr.msra.gmra.mxu1 %vm1084_vm1, %v3075_v17  ;;  %v6203_v50 = vmul.f32 %v4869_v29, %v4855_v31  ;;  %v3182_v31 = vpop.permute.xlu1 %3181 }
 0xcc4   : > { %4526 = vmatpush3.bf16.xpose.msra.mxu1 %v3209_v22  ;;  %6905 = vst [vmem:[#allocation77_spill] sm:$0xff] %v6207_v42  ;;  %v6212_v25 = vmul.f32 %v4871_v3, %v6161_v30  ;;  %v3203_v49 = vsel %vm573_vm0, %v3182_v31, 0  ;;  %v3176_v13 = vpop.permute.xlu0 %3175 }
 0xcc5   : > { %v4873_v35 = vpop.eup %4872  ;;  %4622 = vmatprep.subr.msk.bf16.mxu1 %vm573_vm0, %v3184_v46  ;;  %6903 = vst [vmem:[#allocation75_spill] sm:$0xff] %v6203_v50 }
 0xcc6   : > { %v6205_v16 = vmul.f32 %v4873_v35, %v4857_v28  ;;  %6906 = vst [vmem:[#allocation78_spill] sm:$0xff] %v6212_v25  ;;  %v3077_v27 = vpack.c.bf16 %v6207_v42, %v6212_v25 }
 0xcc7   : > { %v3180_v30 = vpop.permute.xlu1 %3179 }
 0xcc8   : > { %6904 = vst [vmem:[#allocation76_spill] sm:$0xff] %v6205_v16  ;;  %v3076_v32 = vpack.c.bf16 %v6205_v16, %v6203_v50  ;;  %v3200_v28 = vsel %vm573_vm0, %v3180_v30, 0 }
 0xcca   : > { %4521 = vmatprep.mubr.msk.bf16.mxu1 %vm1084_vm1, %v3076_v32 }
 0xccb   : > { %4522 = vmatmul.mubr.msk.bf16.gmra.mxu1 %vm1084_vm1, %v3077_v27  ;;  %v3174_v37 = vpop.permute.xlu1 %3173 }
 0xccc   : > { %4528 = vmatpush3.bf16.xpose.msra.mxu1 %v3206_v6  ;;  %4533 = vmatprep.mubr.msk.bf16.mxu1 %vm573_vm0, %v3172_v7 }
 0xccd   : > { %4623 = vmatprep.subr.msk.bf16.mxu1 %vm573_vm0, %v3182_v31 }
 0xccf   : > { %v3178_v62 = vpop.permute.xlu1 %3177 }
 0xcd4   : > { %4530 = vmatpush3.bf16.xpose.msra.mxu1 %v3203_v49 }
 0xcd5   : > { %4624 = vmatprep.subr.msk.bf16.mxu1 %vm573_vm0, %v3180_v30 }
 0xcdc   : > { %4532 = vmatpush3.bf16.xpose.msra.mxu1 %v3200_v28 }
 0xce3   : > { %4534 = vmatmul.mubr.msk.bf16.vlgmr.msra.gmra.mxu1 %vm573_vm0, %v3174_v37 }
 0xce4   : > { %4537 = vmatprep.mubr.msk.bf16.mxu1 %vm573_vm0, %v3176_v13 }
 0xceb   : > { %4538 = vmatmul.mubr.msk.bf16.gmra.mxu1 %vm573_vm0, %v3178_v62 }
 0xd83   : > { %v6227_v18 = vpop.f32.mrf.mxu1 }
 0xd85   : > { %v6229_v24 = vpop.f32.mrf.mxu1 }
 0xd87   : > { %v6231_v56 = vpop.f32.mrf.mxu1 }
 0xd89   : > { %v6235_v53 = vpop.f32.mrf.mxu1 }
 0xd8b   : > { %v6239_v41 = vpop.f32.mrf.mxu1 }
 0xd8d   : > { %v6241_v20 = vpop.f32.mrf.mxu1 }
 0xd8f   : > { %v6243_v51 = vpop.f32.mrf.mxu1 }
 0xd91   : > { %v6247_v29 = vpop.f32.mrf.mxu1 }
 0xda3   : > { %v4535_v22 = vpop.f32.mrf.mxu1 }
 0xda4   : > { %v3282_v6 = vsel %vm1084_vm1, %v4535_v22, -inf }
 0xda5   : > { %v3245_v35 = vpop.f32.mrf.mxu1 }
 0xda6   : > { %v3276_v46 = vsel %vm1084_vm1, %v3245_v35, -inf }
 0xda7   : > { %3277 = vmax.xlane.f32.xlu0 %v3276_v46  ;;  %v4536_v32 = vpop.f32.mrf.mxu1 }
 0xda8   : > { %v3285_v30 = vsel %vm1084_vm1, %v4536_v32, -inf }
 0xda9   : > { %v3248_v27 = vpop.f32.mrf.mxu1 }
 0xdaa   : > { %v3279_v7 = vsel %vm1084_vm1, %v3248_v27, -inf }
 0xdab   : > { %3283 = vmax.xlane.f32.xlu0 %v3282_v6  ;;  %3280 = vmax.xlane.f32.xlu1 %v3279_v7  ;;  %v4539_v31 = vpop.f32.mrf.mxu1 }
 0xdac   : > { %v3294_v46 = vsel %vm1084_vm1, %v4539_v31, -inf }
 0xdad   : > { %v3261_v49 = vpop.f32.mrf.mxu1 }
 0xdae   : > { %v3288_v62 = vsel %vm1084_vm1, %v3261_v49, -inf }
 0xdaf   : > { %3286 = vmax.xlane.f32.xlu0 %v3285_v30  ;;  %v4540_v28 = vpop.f32.mrf.mxu1 }
 0xdb0   : > { %v3297_v3 = vsel %vm1084_vm1, %v4540_v28, -inf }
 0xdb1   : > { %v3264_v37 = vpop.f32.mrf.mxu1 }
 0xdb2   : > { %v3291_v13 = vsel %vm1084_vm1, %v3264_v37, -inf }
 0xdb3   : > { %3289 = vmax.xlane.f32.xlu0 %v3288_v62  ;;  %3292 = vmax.xlane.f32.xlu1 %v3291_v13 }
 0xdb7   : > { %3295 = vmax.xlane.f32.xlu0 %v3294_v46  ;;  %3298 = vmax.xlane.f32.xlu1 %v3297_v3 }
 0xe30   : > { %v3278_v6 = vpop.xlane.xlu0 %3277 }
 0xe31   : > { %v3300_v7 = vsub.f32 %v3245_v35, %v3278_v6 }
 0xe33   : > { %v3308_v30 = vmul.f32 1.442695, %v3300_v7 }
 0xe34   : > { %v3284_v17 = vpop.xlane.xlu0 %3283  ;;  %v3281_v40 = vpop.xlane.xlu1 %3280 }
 0xe35   : > { %v3302_v58 = vsub.f32 %v4535_v22, %v3284_v17  ;;  %v3301_v42 = vsub.f32 %v3248_v27, %v3281_v40 }
 0xe37   : > { %v3312_v25 = vmul.f32 1.442695, %v3302_v58  ;;  %v3310_v62 = vmul.f32 1.442695, %v3301_v42 }
 0xe38   : > { %v3287_v50 = vpop.xlane.xlu0 %3286 }
 0xe39   : > { %4874 = vpow2.f32 %v3312_v25  ;;  %v3303_v16 = vsub.f32 %v4536_v32, %v3287_v50 }
 0xe3a   : > { %4876 = vpow2.f32 %v3308_v30 }
 0xe3b   : > { %v3314_v13 = vmul.f32 1.442695, %v3303_v16 }
 0xe3c   : > { %v3290_v2 = vpop.xlane.xlu0 %3289  ;;  %v3293_v32 = vpop.xlane.xlu1 %3292 }
 0xe3d   : > { %4878 = vpow2.f32 %v3314_v13  ;;  %v3304_v8 = vsub.f32 %v3261_v49, %v3290_v2  ;;  %v6907_v49 = vpack.c.bf16 %v5752_v0, %v5746_v10  ;;  %v3305_v7 = vsub.f32 %v3264_v37, %v3293_v32 }
 0xe3e   : > { %4880 = vpow2.f32 %v3310_v62  ;;  %v6911_v10 = vpack.c.bf16 %v5788_v19, %v5782_v23  ;;  %v6914_v19 = vpack.c.bf16 %v6235_v53, %v6229_v24 }
 0xe3f   : > { %v3316_v34 = vmul.f32 1.442695, %v3304_v8  ;;  %v3318_v62 = vmul.f32 1.442695, %v3305_v7 }
 0xe40   : > { %v3296_v46 = vpop.xlane.xlu0 %3295  ;;  %v3299_v27 = vpop.xlane.xlu1 %3298 }
 0xe41   : > { %v3306_v3 = vsub.f32 %v4539_v31, %v3296_v46  ;;  %v3307_v31 = vsub.f32 %v4540_v28, %v3299_v27 }
 0xe43   : > { %v3320_v35 = vmul.f32 1.442695, %v3306_v3  ;;  %v3322_v30 = vmul.f32 1.442695, %v3307_v31 }
 0xe45   : > { %4882 = vpow2.f32 %v3320_v35 }
 0xe46   : > { %v6259_v6 = vpop.eup %4874  ;;  %4884 = vpow2.f32 %v3316_v34 }
 0xe47   : > { %v3330_v40 = vsel %vm1084_vm1, %v6259_v6, 0.0  ;;  %v6263_v25 = vpop.eup %4876  ;;  %4886 = vpow2.f32 %v3322_v30 }
 0xe48   : > { %3331 = vadd.xlane.f32.xlu0 %v3330_v40  ;;  %v3324_v16 = vsel %vm1084_vm1, %v6263_v25, 0.0  ;;  %4888 = vpow2.f32 %v3318_v62 }
 0xe4a   : > { %v6265_v50 = vpop.eup %4878 }
 0xe4b   : > { %v3333_v2 = vsel %vm1084_vm1, %v6265_v50, 0.0  ;;  %v6271_v8 = vpop.eup %4880 }
 0xe4c   : > { %3325 = vadd.xlane.f32.xlu0 %v3324_v16  ;;  %3334 = vadd.xlane.f32.xlu1 %v3333_v2  ;;  %v3327_v34 = vsel %vm1084_vm1, %v6271_v8, 0.0 }
 0xe50   : > { %3328 = vadd.xlane.f32.xlu1 %v3327_v34 }
 0xe52   : > { %v6275_v42 = vpop.eup %4882 }
 0xe53   : > { %v3342_v58 = vsel %vm1084_vm1, %v6275_v42, 0.0  ;;  %v6279_v17 = vpop.eup %4884 }
 0xe54   : > { %3343 = vadd.xlane.f32.xlu0 %v3342_v58  ;;  %v3336_v22 = vsel %vm1084_vm1, %v6279_v17, 0.0  ;;  %v6309_v0 = vpop.eup %4886  ;;  %v4642_v58 = vld [vmem:[%s6729_s9 + $0x38] sm:$0xff]  }
 0xe58   : > { %3337 = vadd.xlane.f32.xlu0 %v3336_v22 }
 0xe61   : > { %3372 = vrot.lane.b32.xlu1 %v5708_v47, %s4918_s23  ;;  %v6908_v47 = vpack.c.bf16 %v5776_v57, %v5770_v9  ;;  %v6912_v9 = vpack.c.bf16 %v5919_v45, %v5913_v60  ;;  %v3345_v57 = vsel %vm1084_vm1, %v6309_v0, 0.0  ;;  %v6917_v60 = vpack.c.bf16 %v5772_v1, %v5768_v15  ;;  %v6924_v1 = vld [vmem:[#allocation69_spill] sm:$0xff] }
 0xe62   : > { %v6918_v45 = vpack.c.bf16 %v5903_v12, %v5899_v55  ;;  %v6929_v12 = vld [vmem:[#allocation70_spill] sm:$0xff] }
 0xe65   : > { %3370 = vrot.lane.b32.xlu1 %v5318_v44, %s4918_s23  ;;  %v6909_v44 = vpack.c.bf16 %v5907_v43, %v5901_v21  ;;  %v6317_v21 = vpop.eup %4888  ;;  %v6916_v43 = vpack.c.bf16 %v5748_v14, %v5744_v5  ;;  %v6921_v5 = vld [vmem:[#allocation2_spill] sm:$0xff]  ;;  %v6922_v14 = vld [vmem:[#allocation3_spill] sm:$0xff] }
 0xe66   : > { %v3339_v23 = vsel %vm1084_vm1, %v6317_v21, 0.0  ;;  %v6923_v15 = vpack.c.bf16 %v6921_v5, %v6922_v14 }
 0xe6e   : > { %3374 = vrot.lane.b32.xlu0 %v5327_v54, %s4918_s23  ;;  %v6910_v54 = vpack.c.bf16 %v5764_v63, %v5758_v52  ;;  %v6913_v52 = vpack.c.bf16 %v6123_v39, %v6117_v36  ;;  %v6915_v63 = vpack.c.bf16 %v6135_v11, %v6129_v26  ;;  %v6919_v36 = vpack.c.bf16 %v5760_v61, %v5756_v33  ;;  %v6925_v39 = vld [vmem:[#allocation68_spill] sm:$0xff]  ;;  %v6928_v61 = vld [vmem:[#allocation71_spill] sm:$0xff] }
 0xe6f   : > { %v6926_v55 = vpack.c.bf16 %v6924_v1, %v6925_v39  ;;  %v6927_v33 = vpack.c.bf16 %v6231_v56, %v6227_v18  ;;  %v4649_v1 = vld [vmem:[%s6729_s9] sm:$0xff]  }
 0xe72   : > { %2240 = vrot.lane.b32.xlu0 %v6907_v49, %s4918_s23 }
 0xe76   : > { %2252 = vrot.lane.b32.xlu0 %v6908_v47, %s4917_s18 }
 0xe7a   : > { %2264 = vrot.lane.b32.xlu0 %v6909_v44, %s4916_s17 }
 0xe7e   : > { %2244 = vrot.lane.b32.xlu0 %v6910_v54, %s4918_s23 }
 0xe82   : > { %2256 = vrot.lane.b32.xlu0 %v6911_v10, %s4917_s18 }
 0xe86   : > { %2268 = vrot.lane.b32.xlu0 %v6912_v9, %s4916_s17 }
 0xe89   : > { %3346 = vadd.xlane.f32.xlu1 %v3345_v57  ;;  %v4645_v57 = vld [vmem:[%s6729_s9 + $0x20] sm:$0xff]  }
 0xe8a   : > { %3562 = vrot.lane.b32.xlu0 %v6913_v52, %s4918_s23 }
 0xe8d   : > { %3340 = vadd.xlane.f32.xlu1 %v3339_v23 }
 0xe8e   : > { %3574 = vrot.lane.b32.xlu0 %v6914_v19, %s4917_s18  ;;  %v6931_v19 = vld [vmem:[#allocation36_spill] sm:$0xff] }
 0xe92   : > { %3566 = vrot.lane.b32.xlu0 %v6915_v63, %s4918_s23  ;;  %v6932_v63 = vld [vmem:[#allocation34_spill] sm:$0xff] }
 0xe9e   : > { %3368 = vrot.lane.b32.xlu1 %v5321_v48, %s4918_s23  ;;  %v6920_v48 = vpack.c.bf16 %v5784_v38, %v5780_v4  ;;  %v6930_v38 = vpack.c.bf16 %v6928_v61, %v6929_v12  ;;  %v6934_v61 = vld [vmem:[#allocation35_spill] sm:$0xff]  ;;  %v6935_v12 = vld [vmem:[#allocation33_spill] sm:$0xff] }
 0xea2   : > { %2242 = vrot.lane.b32.xlu1 %v6916_v43, %s4918_s23  ;;  %v6933_v43 = vpack.c.bf16 %v6931_v19, %v6932_v63  ;;  %v6945_v19 = vld [vmem:[#allocation19_spill] sm:$0xff]  ;;  %v6480_v63 = vld [vmem:[%s6730_s10] ss:$0 sm:$0xff] }
 0xea6   : > { %2254 = vrot.lane.b32.xlu1 %v6917_v60, %s4917_s18 }
 0xeaa   : > { %2266 = vrot.lane.b32.xlu1 %v6918_v45, %s4916_s17 }
 0xeae   : > { %2246 = vrot.lane.b32.xlu1 %v6919_v36, %s4918_s23 }
 0xeb2   : > { %2258 = vrot.lane.b32.xlu1 %v6920_v48, %s4917_s18  ;;  %v4647_v48 = vld [vmem:[%s6729_s9 + $0x10] sm:$0xff]  }
 0xeb6   : > { %2270 = vrot.lane.b32.xlu1 %v6923_v15, %s4916_s17  ;;  %v4648_v15 = vld [vmem:[%s6729_s9 + $0x8] sm:$0xff]  }
 0xeba   : > { %3564 = vrot.lane.b32.xlu1 %v6926_v55, %s4918_s23 }
 0xebe   : > { %3576 = vrot.lane.b32.xlu1 %v6927_v33, %s4917_s18 }
 0xec2   : > { %3568 = vrot.lane.b32.xlu1 %v6930_v38, %s4918_s23  ;;  %v6936_v38 = vpack.c.bf16 %v6934_v61, %v6935_v12  ;;  %v6955_v61 = vld [vmem:[#allocation41_spill] sm:$0xff]  ;;  %s6593_s23 = scalar_lea.vmem %s6732_s12, %s4066_s22 }
 0xed1   : > { %v3332_v4 = vpop.xlane.xlu0 %3331 }
 0xed5   : > { %v3326_v26 = vpop.xlane.xlu0 %3325  ;;  %v3335_v11 = vpop.xlane.xlu1 %3334 }
 0xed6   : > { %4890 = vrcp.f32 %v3326_v26  ;;  %v6937_v26 = vld [vmem:[#allocation40_spill] sm:$0xff] }
 0xed9   : > { %v3329_v24 = vpop.xlane.xlu1 %3328 }
 0xeda   : > { %4892 = vrcp.f32 %v3329_v24 }
 0xedb   : > { %4894 = vrcp.f32 %v3335_v11  ;;  %v6938_v11 = vld [vmem:[#allocation38_spill] sm:$0xff] }
 0xedc   : > { %4896 = vrcp.f32 %v3332_v4  ;;  %v6939_v24 = vpack.c.bf16 %v6937_v26, %v6938_v11 }
 0xedd   : > { %v3344_v53 = vpop.xlane.xlu0 %3343  ;;  %v3373_v13 = vpop.permute.xlu1 %3372 }
 0xee1   : > { %v3338_v28 = vpop.xlane.xlu0 %3337  ;;  %v3371_v40 = vpop.permute.xlu1 %3370 }
 0xee3   : > { %v4891_v37 = vpop.eup %4890 }
 0xee4   : > { %v6372_v18 = vmul.f32 %v4891_v37, %v6263_v25 }
 0xee5   : > { %v3375_v46 = vpop.permute.xlu0 %3374 }
 0xee6   : > { %4541 = vmatprep.subr.bf16.mxu0 %v3375_v46 }
 0xee7   : > { %v4893_v3 = vpop.eup %4892  ;;  %4542 = vmatpush3.bf16.msra.mxu0 %v3375_v46 }
 0xee8   : > { %4543 = vmatprep.subr.bf16.mxu0 %v3373_v13  ;;  %v6375_v56 = vmul.f32 %v4893_v3, %v6271_v8  ;;  %v4895_v2 = vpop.eup %4894 }
 0xee9   : > { %v4897_v8 = vpop.eup %4896  ;;  %v6381_v34 = vmul.f32 %v4895_v2, %v6265_v50  ;;  %v2241_v27 = vpop.permute.xlu0 %2240  ;;  %v4643_v50 = vld [vmem:[%s6729_s9 + $0x30] sm:$0xff]  }
 0xeea   : > { %v3364_v35 = vpack.c.bf16 %v6375_v56, %v6372_v18  ;;  %v6387_v32 = vmul.f32 %v4897_v8, %v6259_v6  ;;  %v4644_v6 = vld [vmem:[%s6729_s9 + $0x28] sm:$0xff]  }
 0xeeb   : > { %4544 = vmatpush3.bf16.msra.mxu0 %v3373_v13 }
 0xeec   : > { %4545 = vmatprep.subr.bf16.mxu0 %v3371_v40  ;;  %4549 = vmatprep.mubr.msk.bf16.mxu0 %vm1084_vm1, %v3364_v35  ;;  %v3365_v31 = vpack.c.bf16 %v6381_v34, %v6387_v32 }
 0xeed   : > { %v2253_v7 = vpop.permute.xlu0 %2252 }
 0xeef   : > { %4546 = vmatpush3.bf16.msra.mxu0 %v3371_v40  ;;  %v6940_v40 = vld [vmem:[#allocation39_spill] sm:$0xff] }
 0xef1   : > { %v2265_v23 = vpop.permute.xlu0 %2264 }
 0xef5   : > { %v2245_v5 = vpop.permute.xlu0 %2244 }
 0xef9   : > { %v2257_v39 = vpop.permute.xlu0 %2256 }
 0xefd   : > { %v2269_v33 = vpop.permute.xlu0 %2268 }
 0xf12   : > { %v3347_v16 = vpop.xlane.xlu1 %3346 }
 0xf13   : > { %4898 = vrcp.f32 %v3347_v16  ;;  %v6941_v16 = vld [vmem:[#allocation37_spill] sm:$0xff] }
 0xf14   : > { %4900 = vrcp.f32 %v3338_v28  ;;  %v6942_v2 = vpack.c.bf16 %v6940_v40, %v6941_v16  ;;  %v6963_v40 = vld [vmem:[#allocation60_spill] sm:$0xff]  ;;  %v6964_v16 = vld [vmem:[#allocation63_spill] sm:$0xff] }
 0xf15   : > { %4902 = vrcp.f32 %v3344_v53  ;;  %v2280_v53 = vsel %vm573_vm0, %v6939_v24, %v2245_v5  ;;  %v6957_v24 = vld [vmem:[#allocation7_spill] sm:$0xff] }
 0xf16   : > { %v3341_v25 = vpop.xlane.xlu1 %3340  ;;  %v2289_v13 = vsel %vm1084_vm1, %v2280_v53, %v2257_v39  ;;  %v6954_v39 = vld [vmem:[#allocation42_spill] sm:$0xff] }
 0xf17   : > { %4904 = vrcp.f32 %v3341_v25  ;;  %v2300_v3 = vsel %vm2292_vm2, %v2289_v13, %v2269_v33  ;;  %v6959_v13 = vld [vmem:[#allocation45_spill] sm:$0xff] }
 0xf1a   : > { %v3369_v22 = vpop.permute.xlu1 %3368 }
 0xf1b   : > { %4547 = vmatprep.subr.bf16.mxu0 %v3369_v22 }
 0xf1c   : > { %4548 = vmatpush3.bf16.msra.mxu0 %v3369_v22 }
 0xf1d   : > { %4557 = vmatprep.subr.bf16.mxu0 %v4642_v58 }
 0xf1e   : > { %v2243_v54 = vpop.permute.xlu1 %2242 }
 0xf1f   : > { %4550 = vmatmul.mubr.msk.bf16.vlgmr.msra.gmra.mxu0 %vm1084_vm1, %v3365_v31  ;;  %v2277_v4 = vsel %vm573_vm0, %v6936_v38, %v2243_v54 }
 0xf20   : > { %4558 = vmatpush3.bf16.msra.mxu0 %v4642_v58  ;;  %v4899_v49 = vpop.eup %4898 }
 0xf21   : > { %4559 = vmatprep.subr.bf16.mxu0 %v4643_v50  ;;  %v4901_v30 = vpop.eup %4900  ;;  %v6399_v44 = vmul.f32 %v4899_v49, %v6309_v0 }
 0xf22   : > { %v4903_v47 = vpop.eup %4902  ;;  %v6402_v10 = vmul.f32 %v4901_v30, %v6279_v17  ;;  %v2274_v17 = vsel %vm573_vm0, %v6933_v43, %v2241_v27  ;;  %v2255_v36 = vpop.permute.xlu1 %2254 }
 0xf23   : > { %v6411_v52 = vmul.f32 %v4903_v47, %v6275_v42  ;;  %v2285_v60 = vsel %vm1084_vm1, %v2274_v17, %v2253_v7  ;;  %v4646_v42 = vld [vmem:[%s6729_s9 + $0x18] sm:$0xff]   ;;  %v2287_v28 = vsel %vm1084_vm1, %v2277_v4, %v2255_v36  ;;  %v6950_v17 = vld [vmem:[#allocation22_spill] sm:$0xff]  ;;  %v6956_v4 = vld [vmem:[#allocation8_spill] sm:$0xff] }
 0xf24   : > { %v4905_v62 = vpop.eup %4904  ;;  %4560 = vmatpush3.bf16.msra.mxu0 %v4643_v50  ;;  %v2294_v45 = vsel %vm2292_vm2, %v2285_v60, %v2265_v23  ;;  %v6951_v60 = vld [vmem:[#allocation21_spill] sm:$0xff] }
 0xf25   : > { %4561 = vmatprep.subr.bf16.mxu0 %v4644_v6  ;;  %v6405_v9 = vmul.f32 %v4905_v62, %v6317_v21  ;;  %v3367_v21 = vpack.c.bf16 %v6399_v44, %v6411_v52  ;;  %v6944_v62 = vpack.c.bf16 %v6247_v29, %v6241_v20  ;;  %v6948_v20 = vld [vmem:[#allocation20_spill] sm:$0xff]  ;;  %v6949_v29 = vld [vmem:[#allocation23_spill] sm:$0xff] }
 0xf26   : > { %v2267_v14 = vpop.permute.xlu1 %2266 }
 0xf27   : > { %v3366_v0 = vpack.c.bf16 %v6405_v9, %v6402_v10  ;;  %v2297_v46 = vsel %vm2292_vm2, %v2287_v28, %v2267_v14  ;;  %v6953_v14 = vld [vmem:[#allocation43_spill] sm:$0xff] }
 0xf28   : > { %4562 = vmatpush3.bf16.msra.mxu0 %v4644_v6  ;;  %v6943_v6 = vpack.c.bf16 %v6243_v51, %v6239_v41  ;;  %v6946_v41 = vld [vmem:[#allocation18_spill] sm:$0xff]  ;;  %v6947_v51 = vld [vmem:[#allocation17_spill] sm:$0xff] }
 0xf29   : > { %4553 = vmatprep.mubr.msk.bf16.mxu0 %vm1084_vm1, %v3366_v0  ;;  %4563 = vmatprep.subr.bf16.mxu0 %v4645_v57 }
 0xf2a   : > { %4554 = vmatmul.mubr.msk.bf16.gmra.mxu0 %vm1084_vm1, %v3367_v21  ;;  %v2247_v55 = vpop.permute.xlu1 %2246 }
 0xf2b   : > { %4573 = vmatprep.mubr.bf16.mxu0 %v2294_v45  ;;  %v2283_v25 = vsel %vm573_vm0, %v6942_v2, %v2247_v55  ;;  %v6965_v2 = vld [vmem:[#allocation65_spill] sm:$0xff] }
 0xf2c   : > { %4564 = vmatpush3.bf16.msra.mxu0 %v4645_v57 }
 0xf2d   : > { %4565 = vmatprep.subr.bf16.mxu0 %v4646_v42 }
 0xf2e   : > { %v2259_v37 = vpop.permute.xlu1 %2258 }
 0xf2f   : > { %v2291_v8 = vsel %vm1084_vm1, %v2283_v25, %v2259_v37  ;;  %v6958_v37 = vld [vmem:[#allocation6_spill] sm:$0xff]  ;;  %v6966_v25 = vld [vmem:[#allocation64_spill] sm:$0xff] }
 0xf30   : > { %4566 = vmatpush3.bf16.msra.mxu0 %v4646_v42 }
 0xf31   : > { %4567 = vmatprep.subr.bf16.mxu0 %v4647_v48 }
 0xf32   : > { %v2271_v35 = vpop.permute.xlu1 %2270 }
 0xf33   : > { %v2303_v58 = vsel %vm2292_vm2, %v2291_v8, %v2271_v35  ;;  %v6962_v35 = vld [vmem:[#allocation61_spill] sm:$0xff]  ;;  %v6967_v8 = vld [vmem:[#allocation66_spill] sm:$0xff] }
 0xf34   : > { %4568 = vmatpush3.bf16.msra.mxu0 %v4647_v48  ;;  %v6952_v48 = vld [vmem:[#allocation24_spill] sm:$0xff] }
 0xf35   : > { %4569 = vmatprep.subr.bf16.mxu0 %v4648_v15 }
 0xf38   : > { %4570 = vmatpush3.bf16.msra.mxu0 %v4648_v15 }
 0xf39   : > { %4571 = vmatprep.subr.bf16.mxu0 %v4649_v1 }
 0xf3c   : > { %4572 = vmatpush3.bf16.msra.mxu0 %v4649_v1 }
 0xf3f   : > { %4574 = vmatmul.mubr.bf16.vlgmr.msra.gmra.mxu0 %v2297_v46  ;;  %v6960_v46 = vld [vmem:[#allocation44_spill] sm:$0xff] }
 0xf40   : > { %4577 = vmatprep.mubr.bf16.mxu0 %v2300_v3  ;;  %v6961_v3 = vld [vmem:[#allocation62_spill] sm:$0xff] }
 0xf47   : > { %4578 = vmatmul.mubr.bf16.gmra.mxu0 %v2303_v58  ;;  %v6968_v58 = vld [vmem:[#allocation67_spill] sm:$0xff] }
 0xfdf   : > { %v4551_v22 = vpop.f32.mrf.mxu0 }
 0xfe1   : > { %v3426_v27 = vpop.f32.mrf.mxu0 }
 0xfe3   : > { %v4552_v31 = vpop.f32.mrf.mxu0 }
 0xfe4   : > { %v3458_v50 = vpack.c.bf16 %v4552_v31, %v4551_v22 }
 0xfe5   : > { %v3429_v49 = vpop.f32.mrf.mxu0 }
 0xfe6   : > { %v3457_v7 = vpack.c.bf16 %v3429_v49, %v3426_v27  ;;  %3588 = vrot.lane.b32.xlu1 %v3458_v50, %s4916_s17  ;;  %v6970_v50 = vld [vmem:[#allocation53_spill] sm:$0xff] }
 0xfe8   : > { %3586 = vrot.lane.b32.xlu0 %v3457_v7, %s4916_s17 }
 0xfea   : > { %3580 = vrot.lane.b32.xlu1 %v6943_v6, %s4917_s18  ;;  %v4555_v30 = vpop.f32.mrf.mxu0  ;;  %v6973_v6 = vld [vmem:[#allocation52_spill] sm:$0xff] }
 0xfec   : > { %v3442_v47 = vpop.f32.mrf.mxu0  ;;  %3578 = vrot.lane.b32.xlu0 %v6944_v62, %s4917_s18 }
 0xfee   : > { %v4556_v54 = vpop.f32.mrf.mxu0 }
 0xfef   : > { %v3460_v57 = vpack.c.bf16 %v4556_v54, %v4555_v30 }
 0xff0   : > { %v3445_v23 = vpop.f32.mrf.mxu0 }
 0xff1   : > { %v3459_v0 = vpack.c.bf16 %v3445_v23, %v3442_v47  ;;  %3592 = vrot.lane.b32.xlu1 %v3460_v57, %s4916_s17 }
 0xff3   : > { %3590 = vrot.lane.b32.xlu0 %v3459_v0, %s4916_s17 }
 0xff5   : > { %2150 = vrot.lane.b32.xlu1 %v6945_v19, %s4917_s18 }
 0xff7   : > { %2148 = vrot.lane.b32.xlu0 %v6946_v41, %s4917_s18  ;;  %v6975_v41 = vld [vmem:[#allocation59_spill] sm:$0xff] }
 0xff9   : > { %2154 = vrot.lane.b32.xlu1 %v6947_v51, %s4917_s18  ;;  %v6976_v51 = vld [vmem:[#allocation57_spill] sm:$0xff] }
 0xffb   : > { %2152 = vrot.lane.b32.xlu0 %v6948_v20, %s4917_s18  ;;  %v6977_v20 = vpack.c.bf16 %v6975_v41, %v6976_v51  ;;  %v6997_v41 = vld [vmem:[#allocation46_spill] sm:$0xff] }
 0xffd   : > { %2158 = vrot.lane.b32.xlu1 %v6949_v29, %s4917_s18 }
 0xfff   : > { %v4575_v43 = vpop.f32.mrf.mxu0  ;;  %2156 = vrot.lane.b32.xlu0 %v6950_v17, %s4917_s18  ;;  %v6979_v17 = vld [vmem:[#allocation56_spill] sm:$0xff] }
0x1000   : > { %v3740_v21 = vadd.f32 %v4575_v43, %v6480_v63  ;;  %v6978_v43 = vld [vmem:[#allocation58_spill] sm:$0xff] }
0x1001   : > { %2162 = vrot.lane.b32.xlu1 %v6951_v60, %s4917_s18  ;;  %v3731_v42 = vpop.f32.mrf.mxu0 }
0x1002   : > { %3796 = vst.msk [vmem:[%s6486_s19 + $0x10] sm:$0xff] %vm573_vm0, %v3740_v21  ;;  %v3732_v45 = vadd.f32 %v6480_v63, %v3731_v42  ;;  %v6980_v21 = vpack.c.bf16 %v6978_v43, %v6979_v17 }
0x1003   : > { %v4576_v36 = vpop.f32.mrf.mxu0  ;;  %2160 = vrot.lane.b32.xlu0 %v6952_v48, %s4917_s18 }
0x1004   : > { %3794 = vst.msk [vmem:[%s6486_s19] sm:$0xff] %vm573_vm0, %v3732_v45  ;;  %v3743_v5 = vadd.f32 %v4576_v36, %v6480_v63 }
0x1005   : > { %2182 = vrot.lane.b32.xlu1 %v6953_v14, %s4917_s18  ;;  %v3734_v15 = vpop.f32.mrf.mxu0 }
0x1006   : > { %3797 = vst.msk [vmem:[%s6486_s19 + $0x18] sm:$0xff] %vm573_vm0, %v3743_v5  ;;  %v3735_v1 = vadd.f32 %v6480_v63, %v3734_v15  ;;  %v6981_v15 = vld [vmem:[#allocation11_spill] sm:$0xff] }
0x1007   : > { %2180 = vrot.lane.b32.xlu0 %v6954_v39, %s4917_s18  ;;  %v4579_v55 = vpop.f32.mrf.mxu0 }
0x1008   : > { %3795 = vst.msk [vmem:[%s6486_s19 + $0x8] sm:$0xff] %vm573_vm0, %v3735_v1  ;;  %v3756_v33 = vadd.f32 %v4579_v55, %v6480_v63  ;;  %v6982_v55 = vld [vmem:[#allocation10_spill] sm:$0xff] }
0x1009   : > { %2186 = vrot.lane.b32.xlu1 %v6955_v61, %s4917_s18  ;;  %v3747_v12 = vpop.f32.mrf.mxu0 }
0x100a   : > { %3800 = vst.msk [vmem:[%s6486_s19 + $0x30] sm:$0xff] %vm573_vm0, %v3756_v33  ;;  %v3748_v38 = vadd.f32 %v6480_v63, %v3747_v12  ;;  %v6983_v12 = vld [vmem:[#allocation12_spill] sm:$0xff] }
0x100b   : > { %2184 = vrot.lane.b32.xlu0 %v6956_v4, %s4917_s18  ;;  %v4580_v26 = vpop.f32.mrf.mxu0 }
0x100c   : > { %3798 = vst.msk [vmem:[%s6486_s19 + $0x20] sm:$0xff] %vm573_vm0, %v3748_v38  ;;  %v3759_v11 = vadd.f32 %v4580_v26, %v6480_v63  ;;  %v6984_v26 = vld [vmem:[#allocation9_spill] sm:$0xff] }
0x100d   : > { %2190 = vrot.lane.b32.xlu1 %v6957_v24, %s4917_s18  ;;  %v3750_v53 = vpop.f32.mrf.mxu0 }
0x100e   : > { %3801 = vst.msk [vmem:[%s6486_s19 + $0x38] sm:$0xff] %vm573_vm0, %v3759_v11  ;;  %v3751_v28 = vadd.f32 %v6480_v63, %v3750_v53  ;;  %v6985_v53 = vld [vmem:[#allocation15_spill] sm:$0xff] }
0x100f   : > { %2188 = vrot.lane.b32.xlu0 %v6958_v37, %s4917_s18 }
0x1010   : > { %3799 = vst.msk [vmem:[%s6486_s19 + $0x28] sm:$0xff] %vm573_vm0, %v3751_v28 }
0x1011   : > { %2194 = vrot.lane.b32.xlu1 %v6959_v13, %s4917_s18  ;;  %v6986_v13 = vld [vmem:[#allocation14_spill] sm:$0xff] }
0x1013   : > { %2192 = vrot.lane.b32.xlu0 %v6960_v46, %s4917_s18 }
0x1015   : > { %3471 = vrot.lane.b32.xlu1 %v6961_v3, %s4917_s18 }
0x1017   : > { %3469 = vrot.lane.b32.xlu0 %v6962_v35, %s4917_s18  ;;  %v6987_v35 = vld [vmem:[#allocation16_spill] sm:$0xff] }
0x1019   : > { %3475 = vrot.lane.b32.xlu1 %v6963_v40, %s4917_s18 }
0x101b   : > { %3473 = vrot.lane.b32.xlu0 %v6964_v16, %s4917_s18 }
0x101d   : > { %3479 = vrot.lane.b32.xlu1 %v6965_v2, %s4917_s18  ;;  %v6988_v2 = vld [vmem:[#allocation13_spill] sm:$0xff] }
0x101f   : > { %3477 = vrot.lane.b32.xlu0 %v6966_v25, %s4917_s18 }
0x1021   : > { %3483 = vrot.lane.b32.xlu1 %v6967_v8, %s4917_s18 }
0x1023   : > { %3481 = vrot.lane.b32.xlu0 %v6968_v58, %s4917_s18  ;;  %v6989_v58 = vld [vmem:[#allocation27_spill] sm:$0xff] }
0x1025   : > { %3503 = vrot.lane.b32.xlu1 %v6375_v56, %s4917_s18  ;;  %v3565_v56 = vpop.permute.xlu1 %3564 }
0x1027   : > { %3501 = vrot.lane.b32.xlu0 %v6372_v18, %s4917_s18  ;;  %v3563_v18 = vpop.permute.xlu0 %3562 }
0x1029   : > { %3507 = vrot.lane.b32.xlu1 %v6381_v34, %s4917_s18  ;;  %v3577_v22 = vpop.permute.xlu1 %3576 }
0x102b   : > { %3505 = vrot.lane.b32.xlu0 %v6387_v32, %s4917_s18  ;;  %v3575_v27 = vpop.permute.xlu0 %3574  ;;  %v6969_v32 = vld [vmem:[#allocation55_spill] sm:$0xff] }
0x102d   : > { %3511 = vrot.lane.b32.xlu1 %v6405_v9, %s4917_s18  ;;  %v3569_v34 = vpop.permute.xlu1 %3568  ;;  %v6971_v9 = vpack.c.bf16 %v6969_v32, %v6970_v50 }
0x102e   : > { %v3605_v60 = vsel %vm573_vm0, %v6980_v21, %v3569_v34  ;;  %v6999_v21 = vld [vmem:[#allocation5_spill] sm:$0xff] }
0x102f   : > { %3509 = vrot.lane.b32.xlu0 %v6402_v10, %s4917_s18  ;;  %v3567_v31 = vpop.permute.xlu0 %3566  ;;  %v3596_v49 = vsel %vm573_vm0, %v6971_v9, %v3563_v18  ;;  %v6992_v9 = vld [vmem:[#allocation28_spill] sm:$0xff] }
0x1030   : > { %v3607_v7 = vsel %vm1084_vm1, %v3596_v49, %v3575_v27  ;;  %v3602_v29 = vsel %vm573_vm0, %v6977_v20, %v3567_v31  ;;  %v6991_v31 = vld [vmem:[#allocation25_spill] sm:$0xff] }
0x1031   : > { %3515 = vrot.lane.b32.xlu1 %v6399_v44, %s4917_s18  ;;  %v6972_v44 = vld [vmem:[#allocation54_spill] sm:$0xff] }
0x1032   : > { %v6974_v30 = vpack.c.bf16 %v6972_v44, %v6973_v6 }
0x1033   : > { %3513 = vrot.lane.b32.xlu0 %v6411_v52, %s4917_s18 }
0x1034   : > { %v3599_v52 = vsel %vm573_vm0, %v6974_v30, %v3565_v56  ;;  %v6994_v30 = vld [vmem:[#allocation31_spill] sm:$0xff] }
0x1035   : > { %v3609_v62 = vsel %vm1084_vm1, %v3599_v52, %v3577_v22  ;;  %v6990_v22 = vld [vmem:[#allocation26_spill] sm:$0xff] }
0x1058   : > { %v3589_v10 = vpop.permute.xlu1 %3588 }
0x1059   : > { %v3618_v57 = vsel %vm2292_vm2, %v3609_v62, %v3589_v10  ;;  %v6995_v62 = vld [vmem:[#allocation30_spill] sm:$0xff] }
0x105a   : > { %v3587_v47 = vpop.permute.xlu0 %3586 }
0x105b   : > { %v3615_v54 = vsel %vm2292_vm2, %v3607_v7, %v3587_v47  ;;  %v6993_v7 = vld [vmem:[#allocation32_spill] sm:$0xff] }
0x105c   : > { %4581 = vmatprep.mubr.bf16.mxu0 %v3615_v54  ;;  %v3581_v23 = vpop.permute.xlu1 %3580 }
0x105d   : > { %4582 = vmatmul.mubr.bf16.gmra.mxu0 %v3618_v57  ;;  %v3613_v36 = vsel %vm1084_vm1, %v3605_v60, %v3581_v23  ;;  %v6996_v23 = vld [vmem:[#allocation29_spill] sm:$0xff] }
0x105e   : > { %v3579_v0 = vpop.permute.xlu0 %3578 }
0x105f   : > { %v3611_v42 = vsel %vm1084_vm1, %v3602_v29, %v3579_v0  ;;  %v6998_v29 = vld [vmem:[#allocation4_spill] sm:$0xff] }
0x1063   : > { %v3593_v19 = vpop.permute.xlu1 %3592 }
0x1064   : > { %v3624_v14 = vsel %vm2292_vm2, %v3613_v36, %v3593_v19 }
0x1065   : > { %v3591_v45 = vpop.permute.xlu0 %3590 }
0x1066   : > { %v3621_v48 = vsel %vm2292_vm2, %v3611_v42, %v3591_v45  ;;  %v7000_v45 = vld [vmem:[#allocation47_spill] sm:$0xff] }
0x1067   : > { %v2151_v5 = vpop.permute.xlu1 %2150  ;;  %4585 = vmatprep.mubr.bf16.mxu0 %v3621_v48 }
0x1068   : > { %v2205_v1 = vsel %vm1084_vm1, %v6981_v15, %v2151_v5  ;;  %4586 = vmatmul.mubr.bf16.gmra.mxu0 %v3624_v14  ;;  %v7001_v5 = vld [vmem:[#allocation50_spill] sm:$0xff] }
0x1069   : > { %2222 = vst [vmem:[%s6593_s23 + $0x10] sm:$0xff] %v2205_v1  ;;  %v2149_v39 = vpop.permute.xlu0 %2148  ;;  %v7002_v1 = vld [vmem:[#allocation49_spill] sm:$0xff] }
0x106a   : > { %v2204_v33 = vsel %vm1084_vm1, %v6982_v55, %v2149_v39 }
0x106b   : > { %2220 = vst [vmem:[%s6593_s23] sm:$0xff] %v2204_v33  ;;  %v2155_v61 = vpop.permute.xlu1 %2154  ;;  %v7003_v33 = vld [vmem:[#allocation48_spill] sm:$0xff] }
0x106c   : > { %v2207_v38 = vsel %vm1084_vm1, %v6983_v12, %v2155_v61 }
0x106d   : > { %2226 = vst [vmem:[%s6593_s23 + $0x30] sm:$0xff] %v2207_v38  ;;  %v2153_v4 = vpop.permute.xlu0 %2152  ;;  %v7004_v38 = vld [vmem:[#allocation51_spill] sm:$0xff] }
0x106e   : > { %v2206_v11 = vsel %vm1084_vm1, %v6984_v26, %v2153_v4 }
0x106f   : > { %2224 = vst [vmem:[%s6593_s23 + $0x20] sm:$0xff] %v2206_v11  ;;  %v2159_v24 = vpop.permute.xlu1 %2158 }
0x1070   : > { %v2209_v28 = vsel %vm1084_vm1, %v6985_v53, %v2159_v24  ;;  %v7005_v53 = vld [vmem:[#allocation73_spill] sm:$0xff] }
0x1071   : > { %2230 = vst [vmem:[%s6593_s23 + $0x50] sm:$0xff] %v2209_v28  ;;  %v2157_v37 = vpop.permute.xlu0 %2156 }
0x1072   : > { %v2208_v46 = vsel %vm1084_vm1, %v6986_v13, %v2157_v37  ;;  %v7006_v13 = vld [vmem:[#allocation72_spill] sm:$0xff] }
0x1073   : > { %2228 = vst [vmem:[%s6593_s23 + $0x40] sm:$0xff] %v2208_v46  ;;  %v2163_v3 = vpop.permute.xlu1 %2162 }
0x1074   : > { %v2211_v40 = vsel %vm1084_vm1, %v6987_v35, %v2163_v3  ;;  %v7007_v35 = vld [vmem:[#allocation74_spill] sm:$0xff] }
0x1075   : > { %2234 = vst [vmem:[%s6593_s23 + $0x70] sm:$0xff] %v2211_v40  ;;  %v2161_v16 = vpop.permute.xlu0 %2160 }
0x1076   : > { %v2210_v25 = vsel %vm1084_vm1, %v6988_v2, %v2161_v16  ;;  %v7008_v16 = vld [vmem:[#allocation76_spill] sm:$0xff] }
0x1077   : > { %2232 = vst [vmem:[%s6593_s23 + $0x60] sm:$0xff] %v2210_v25  ;;  %v2183_v8 = vpop.permute.xlu1 %2182 }
0x1078   : > { %v2213_v56 = vsel %vm1084_vm1, %v6989_v58, %v2183_v8  ;;  %v7009_v8 = vld [vmem:[#allocation75_spill] sm:$0xff] }
0x1079   : > { %2223 = vst [vmem:[%s6593_s23 + $0x18] sm:$0xff] %v2213_v56  ;;  %v2181_v18 = vpop.permute.xlu0 %2180 }
0x107a   : > { %v2212_v27 = vsel %vm1084_vm1, %v6990_v22, %v2181_v18  ;;  %v7010_v18 = vld [vmem:[#allocation77_spill] sm:$0xff] }
0x107b   : > { %2221 = vst [vmem:[%s6593_s23 + $0x8] sm:$0xff] %v2212_v27  ;;  %v2187_v34 = vpop.permute.xlu1 %2186 }
0x107c   : > { %v2215_v32 = vsel %vm1084_vm1, %v6991_v31, %v2187_v34  ;;  %v7011_v34 = vld [vmem:[#allocation78_spill] sm:$0xff] }
0x107d   : > { %2227 = vst [vmem:[%s6593_s23 + $0x38] sm:$0xff] %v2215_v32  ;;  %v2185_v50 = vpop.permute.xlu0 %2184 }
0x107e   : > { %v2214_v49 = vsel %vm1084_vm1, %v6992_v9, %v2185_v50 }
0x107f   : > { %2225 = vst [vmem:[%s6593_s23 + $0x28] sm:$0xff] %v2214_v49  ;;  %v2191_v10 = vpop.permute.xlu1 %2190 }
0x1080   : > { %v2217_v44 = vsel %vm1084_vm1, %v6993_v7, %v2191_v10 }
0x1081   : > { %2231 = vst [vmem:[%s6593_s23 + $0x58] sm:$0xff] %v2217_v44  ;;  %v2189_v6 = vpop.permute.xlu0 %2188 }
0x1082   : > { %v2216_v52 = vsel %vm1084_vm1, %v6994_v30, %v2189_v6 }
0x1083   : > { %2229 = vst [vmem:[%s6593_s23 + $0x48] sm:$0xff] %v2216_v52  ;;  %v2195_v47 = vpop.permute.xlu1 %2194 }
0x1084   : > { %v2219_v54 = vsel %vm1084_vm1, %v6995_v62, %v2195_v47 }
0x1085   : > { %2235 = vst [vmem:[%s6593_s23 + $0x78] sm:$0xff] %v2219_v54  ;;  %v2193_v57 = vpop.permute.xlu0 %2192 }
0x1086   : > { %v2218_v0 = vsel %vm1084_vm1, %v6996_v23, %v2193_v57 }
0x1087   : > { %2233 = vst [vmem:[%s6593_s23 + $0x68] sm:$0xff] %v2218_v0  ;;  %v3472_v19 = vpop.permute.xlu1 %3471 }
0x1088   : > { %v3526_v51 = vsel %vm1084_vm1, %v6997_v41, %v3472_v19 }
0x1089   : > { %4041 = vst [vmem:[%s6593_s23 + $0x90] sm:$0xff] %v3526_v51  ;;  %v3470_v20 = vpop.permute.xlu0 %3469 }
0x108a   : > { %v3525_v43 = vsel %vm1084_vm1, %v6998_v29, %v3470_v20 }
0x108b   : > { %4039 = vst [vmem:[%s6593_s23 + $0x80] sm:$0xff] %v3525_v43  ;;  %v3476_v17 = vpop.permute.xlu1 %3475 }
0x108c   : > { %v3528_v60 = vsel %vm1084_vm1, %v6999_v21, %v3476_v17 }
0x108d   : > { %4045 = vst [vmem:[%s6593_s23 + $0xb0] sm:$0xff] %v3528_v60  ;;  %v3474_v42 = vpop.permute.xlu0 %3473 }
0x108e   : > { %v3527_v36 = vsel %vm1084_vm1, %v7000_v45, %v3474_v42 }
0x108f   : > { %4043 = vst [vmem:[%s6593_s23 + $0xa0] sm:$0xff] %v3527_v36  ;;  %v3480_v48 = vpop.permute.xlu1 %3479 }
0x1090   : > { %v3530_v14 = vsel %vm1084_vm1, %v7001_v5, %v3480_v48 }
0x1091   : > { %4049 = vst [vmem:[%s6593_s23 + $0xd0] sm:$0xff] %v3530_v14  ;;  %v3478_v15 = vpop.permute.xlu0 %3477 }
0x1092   : > { %v3529_v39 = vsel %vm1084_vm1, %v7002_v1, %v3478_v15 }
0x1093   : > { %4047 = vst [vmem:[%s6593_s23 + $0xc0] sm:$0xff] %v3529_v39  ;;  %v3484_v55 = vpop.permute.xlu1 %3483 }
0x1094   : > { %v3532_v61 = vsel %vm1084_vm1, %v7003_v33, %v3484_v55 }
0x1095   : > { %4053 = vst [vmem:[%s6593_s23 + $0xf0] sm:$0xff] %v3532_v61  ;;  %v3482_v12 = vpop.permute.xlu0 %3481 }
0x1096   : > { %v3531_v4 = vsel %vm1084_vm1, %v7004_v38, %v3482_v12 }
0x1097   : > { %4051 = vst [vmem:[%s6593_s23 + $0xe0] sm:$0xff] %v3531_v4  ;;  %v3504_v26 = vpop.permute.xlu1 %3503 }
0x1098   : > { %v3534_v11 = vsel %vm1084_vm1, %v6190_v59, %v3504_v26 }
0x1099   : > { %4042 = vst [vmem:[%s6593_s23 + $0x98] sm:$0xff] %v3534_v11  ;;  %v3502_v24 = vpop.permute.xlu0 %3501 }
0x109a   : > { %v3533_v28 = vsel %vm1084_vm1, %v7005_v53, %v3502_v24 }
0x109b   : > { %4040 = vst [vmem:[%s6593_s23 + $0x88] sm:$0xff] %v3533_v28  ;;  %v3508_v37 = vpop.permute.xlu1 %3507 }
0x109c   : > { %v3536_v46 = vsel %vm1084_vm1, %v7006_v13, %v3508_v37 }
0x109d   : > { %4046 = vst [vmem:[%s6593_s23 + $0xb8] sm:$0xff] %v3536_v46  ;;  %v3506_v3 = vpop.permute.xlu0 %3505 }
0x109e   : > { %v3535_v40 = vsel %vm1084_vm1, %v7007_v35, %v3506_v3 }
0x109f   : > { %4044 = vst [vmem:[%s6593_s23 + $0xa8] sm:$0xff] %v3535_v40  ;;  %v3512_v59 = vpop.permute.xlu1 %3511 }
0x10a0   : > { %v3538_v2 = vsel %vm1084_vm1, %v7008_v16, %v3512_v59 }
0x10a1   : > { %4050 = vst [vmem:[%s6593_s23 + $0xd8] sm:$0xff] %v3538_v2  ;;  %v3510_v25 = vpop.permute.xlu0 %3509 }
0x10a2   : > { %v3537_v58 = vsel %vm1084_vm1, %v7009_v8, %v3510_v25 }
0x10a3   : > { %4048 = vst [vmem:[%s6593_s23 + $0xc8] sm:$0xff] %v3537_v58  ;;  %v3516_v56 = vpop.permute.xlu1 %3515 }
0x10a4   : > { %v3540_v22 = vsel %vm1084_vm1, %v7010_v18, %v3516_v56 }
0x10a5   : > { %4054 = vst [vmem:[%s6593_s23 + $0xf8] sm:$0xff] %v3540_v22  ;;  %v3514_v27 = vpop.permute.xlu0 %3513 }
0x10a6   : > { %v3539_v31 = vsel %vm1084_vm1, %v7011_v34, %v3514_v27 }
0x10a7   : > { %4052 = vst [vmem:[%s6593_s23 + $0xe8] sm:$0xff] %v3539_v31 }
0x111d   : > { %v4583_v32 = vpop.f32.mrf.mxu0 }
0x111e   : > { %v3772_v50 = vadd.f32 %v4583_v32, %v6480_v63 }
0x111f   : > { %v3763_v9 = vpop.f32.mrf.mxu0 }
0x1120   : > { %3804 = vst.msk [vmem:[%s6486_s19 + $0x50] sm:$0xff] %vm573_vm0, %v3772_v50  ;;  %v3764_v49 = vadd.f32 %v6480_v63, %v3763_v9 }
0x1121   : > { %v4584_v10 = vpop.f32.mrf.mxu0 }
0x1122   : > { %3802 = vst.msk [vmem:[%s6486_s19 + $0x40] sm:$0xff] %vm573_vm0, %v3764_v49  ;;  %v3775_v7 = vadd.f32 %v4584_v10, %v6480_v63 }
0x1123   : > { %v3766_v44 = vpop.f32.mrf.mxu0 }
0x1124   : > { %3805 = vst.msk [vmem:[%s6486_s19 + $0x58] sm:$0xff] %vm573_vm0, %v3775_v7  ;;  %v3767_v6 = vadd.f32 %v6480_v63, %v3766_v44 }
0x1126   : > { %3803 = vst.msk [vmem:[%s6486_s19 + $0x48] sm:$0xff] %vm573_vm0, %v3767_v6 }
0x1128   : > { %v4587_v30 = vpop.f32.mrf.mxu0 }
0x1129   : > { %v3788_v52 = vadd.f32 %v4587_v30, %v6480_v63 }
0x112a   : > { %v3779_v47 = vpop.f32.mrf.mxu0 }
0x112b   : > { %3808 = vst.msk [vmem:[%s6486_s19 + $0x70] sm:$0xff] %vm573_vm0, %v3788_v52  ;;  %v3780_v62 = vadd.f32 %v6480_v63, %v3779_v47 }
0x112c   : > { %v4588_v54 = vpop.f32.mrf.mxu0 }
0x112d   : > { %3806 = vst.msk [vmem:[%s6486_s19 + $0x60] sm:$0xff] %vm573_vm0, %v3780_v62  ;;  %v3791_v57 = vadd.f32 %v4588_v54, %v6480_v63 }
0x112e   : > { %v3782_v23 = vpop.f32.mrf.mxu0 }
0x112f   : > { %3809 = vst.msk [vmem:[%s6486_s19 + $0x78] sm:$0xff] %vm573_vm0, %v3791_v57  ;;  %v3783_v0 = vadd.f32 %v6480_v63, %v3782_v23 }
0x1131   : > { %3807 = vst.msk [vmem:[%s6486_s19 + $0x68] sm:$0xff] %vm573_vm0, %v3783_v0 }
0x1132 PF: > { %s23_s21 = sadd.s32 1, %s4914_s21  }
0x1133   : > { %p20_p5 = scmp.ge.s32.totalorder %s23_s21, 4  }
0x1135   :  { %22 = sbr.rel (!%p20_p5) target bundleno = 1 (0x1), region = 113 }

</bundles_post_ra>
